<compile_context>
chip_gen: v7x
topology: tpu7x:2x2x1
jax: 0.10.0
libtpu: 0.0.40
codegen_flags: <defaults>
</compile_context>

<pallas_src>
import functools

import jax
import jax.numpy as jnp
from jax import lax
from jax.experimental import pallas as pl
from jax.experimental.pallas import tpu as pltpu

_F32 = jnp.float32
_BF16 = jnp.bfloat16


# ----------------------------- math helpers ------------------------------ #
def _layernorm(x, w, b, eps=1e-5):
    # PyTorch nn.LayerNorm: biased variance over last dim, eps=1e-5 (f32).
    mu = jnp.mean(x, axis=-1, keepdims=True)
    xc = x - mu
    var = jnp.mean(xc * xc, axis=-1, keepdims=True)
    return xc * lax.rsqrt(var + eps) * w + b


def _gelu_exact(x):
    # PyTorch nn.GELU() default: 0.5*x*(1+erf(x/sqrt(2))).
    # TODO(synk): tanh-approx GELU would run on the EUP slot (co-issues with MXU) but is a
    # deliberate numerics deviation from the PyTorch module; keeping exact erf for fidelity.
    return 0.5 * x * (1.0 + lax.erf(x * jnp.float32(0.7071067811865476)))


# ------------------------------ Pallas kernel ----------------------------- #
def encoder_block_kernel(
    x_ref, ln1w_ref, ln1b_ref, wqkv_ref, wproj_ref, bproj_ref,
    ln2w_ref, ln2b_ref, w1_ref, b1_ref, w2_ref, b2_ref,
    o_ref, x1_cache, k_cache, v_cache, *, num_heads, q_tile,
):
    N, C = x_ref.shape[1], x_ref.shape[2]
    H = num_heads
    dh = C // H
    scale = jnp.float32(dh ** -0.5)
    nq = pl.program_id(1)

    # ---- per-batch-element cache: LN1(x) (bf16) and K/V projections (bf16) ----
    # Computed once at nq == 0, reused by every query tile of this batch element
    # (nq axis is "arbitrary", so steps run in order on one core and scratch persists).
    @pl.when(nq == 0)
    def _():
        x_full = x_ref[0]                                          # (N, C) f32
        x1 = _layernorm(x_full, ln1w_ref[0], ln1b_ref[0])
        x1_bf = x1.astype(_BF16)
        x1_cache[...] = x1_bf
        kv = jnp.dot(x1_bf, wqkv_ref[:, C:],
                     preferred_element_type=_F32)                  # (N, 2C) f32 acc
        k_cache[...] = kv[:, :C].astype(_BF16)
        v_cache[...] = kv[:, C:].astype(_BF16)

    if q_tile == N:
        x_q = x_ref[0]                                             # (N, C) f32 residual
        x1_q = x1_cache[...]                                       # (N, C) bf16
    else:
        row0 = pl.multiple_of(nq * q_tile, q_tile)
        x_q = x_ref[0, pl.ds(row0, q_tile), :]                     # (Nt, C) f32
        x1_q = x1_cache[pl.ds(row0, q_tile), :]                    # (Nt, C) bf16

    # ---- attention branch: out = x + proj(MHA(LN1(x))) ----
    q = jnp.dot(x1_q, wqkv_ref[:, :C], preferred_element_type=_F32)  # (Nt, C) f32
    q = q * scale                       # fold 1/sqrt(dh) into q (cheaper than scaling scores)
    qh = q.reshape(q_tile, H, dh).astype(_BF16)
    kh = k_cache[...].reshape(N, H, dh)
    vh = v_cache[...].reshape(N, H, dh)

    # Batched-head attention; softmax stats stay f32.
    s = jnp.einsum("qhd,khd->hqk", qh, kh, preferred_element_type=_F32)   # (H, Nt, N)
    m = jnp.max(s, axis=-1, keepdims=True)
    e = jnp.exp(s - m)                                                    # (H, Nt, N)
    denom = jnp.sum(e, axis=-1)                                           # (H, Nt)

    # Deferred normalization: PV on unnormalized probabilities (e <= 1, safe in bf16),
    # then scale the much smaller (Nt, H, dh) output by 1/denom (approx recip -> EUP).
    o = jnp.einsum("hqk,khd->qhd", e.astype(_BF16), vh,
                   preferred_element_type=_F32)                           # (Nt, H, dh)
    inv = pl.reciprocal(denom, approx=True)                               # (H, Nt)
    o = o * jnp.transpose(inv)[:, :, None]                                # (Nt, H, dh)

    attn = o.reshape(q_tile, C)
    attn = jnp.dot(attn.astype(_BF16), wproj_ref[...],
                   preferred_element_type=_F32) + bproj_ref[0]
    xa = x_q + attn                                    # dropout p=0 -> identity

    # ---- MLP branch: out = xa + W2(GELU(W1(LN2(xa)))) ----
    x2 = _layernorm(xa, ln2w_ref[0], ln2b_ref[0])
    h1 = jnp.dot(x2.astype(_BF16), w1_ref[...], preferred_element_type=_F32) + b1_ref[0]
    h1 = _gelu_exact(h1)
    h2 = jnp.dot(h1.astype(_BF16), w2_ref[...], preferred_element_type=_F32) + b2_ref[0]

    o_ref[0] = xa + h2


# ------------------------------- wrapper ---------------------------------- #
def _vmem_capacity_bytes():
    try:
        return int(pltpu.get_tpu_info().vmem_capacity_bytes)
    except Exception:
        return 128 * 2 ** 20          # v5e/v6e physical VMEM as a conservative default


def _pick_q_tile(n, num_heads, vmem_cap):
    """Full sequence for small N; otherwise >=128 and bounded by the f32 score budget."""
    if n <= 256:
        return n
    score_budget = vmem_cap // 4                      # budget for the (H, q_tile, N) f32 scores
    max_qt = max(128, score_budget // (4 * num_heads * n))
    for t in (512, 256, 128):
        if t <= max_qt and n % t == 0:
            return t
    # TODO(synk): pad N to a multiple of 128 (with key masking) instead of this fallback.
    return n


def _encoder_block_call(x, p, num_heads, single_buffer_weights):
    B, N, C = x.shape
    assert C % num_heads == 0
    hid = p["w1"].shape[1]
    vmem_cap = _vmem_capacity_bytes()
    q_tile = _pick_q_tile(N, num_heads, vmem_cap)
    n_qt = N // q_tile

    if single_buffer_weights:
        # Constant-index blocks: double-buffering them only wastes VMEM.
        def const(shape):
            return pl.BlockSpec(shape, lambda *a, _n=len(shape): (0,) * _n,
                                pipeline_mode=pl.Buffered(1))
    else:
        def const(shape):
            return pl.BlockSpec(shape, lambda *a, _n=len(shape): (0,) * _n)

    in_specs = [
        pl.BlockSpec((1, N, C), lambda b, nq: (b, 0, 0)),   # x (full seq; same block over nq)
        const((1, C)), const((1, C)),                       # ln1 w, b          (f32)
        const((C, 3 * C)),                                  # Wqkv^T            (bf16)
        const((C, C)), const((1, C)),                       # Wproj^T, bproj
        const((1, C)), const((1, C)),                       # ln2 w, b
        const((C, hid)), const((1, hid)),                   # W1^T, b1
        const((hid, C)), const((1, C)),                     # W2^T, b2
    ]

    scratch_shapes = [
        pltpu.VMEM((N, C), jnp.bfloat16),                   # cached LN1(x)
        pltpu.VMEM((N, C), jnp.bfloat16),                   # cached K projection
        pltpu.VMEM((N, C), jnp.bfloat16),                   # cached V projection
    ]

    # Per-step VMEM budget: bf16 weights (+ double-buffer if not single-buffered),
    # bf16 KV/LN caches, f32 activations, plus slack for compiler scratch/spills.
    weight_bytes = 2 * (3 * C * C + C * C + 2 * C * hid)
    cache_bytes = 2 * 3 * N * C
    act_bytes = 4 * (4 * N * C + num_heads * q_tile * N + q_tile * (hid + 6 * C))
    derived = ((1 if single_buffer_weights else 2) * weight_bytes
               + cache_bytes + 2 * act_bytes + (4 << 20))
    vmem_limit = int(min(max(derived, 32 * 2 ** 20), 0.85 * vmem_cap))

    kernel = functools.partial(encoder_block_kernel, num_heads=num_heads, q_tile=q_tile)
    return pl.pallas_call(
        kernel,
        out_shape=jax.ShapeDtypeStruct((B, N, C), jnp.float32),
        grid=(B, n_qt),
        in_specs=in_specs,
        out_specs=pl.BlockSpec((1, q_tile, C), lambda b, nq: (b, nq, 0)),
        scratch_shapes=scratch_shapes,
        compiler_params=pltpu.CompilerParams(
            # B parallel (megacore); nq must be "arbitrary" so the per-batch KV/LN cache
            # written at nq==0 is valid for nq>0 on the same core.
            dimension_semantics=("parallel", "arbitrary"),
            vmem_limit_bytes=vmem_limit,
        ),
    )(x, p["ln1w"], p["ln1b"], p["wqkv"], p["wproj"], p["bproj"],
      p["ln2w"], p["ln2b"], p["w1"], p["b1"], p["w2"], p["b2"])


_SINGLE_BUFFER_OK = None  # probed once: does this JAX support pipeline_mode=pl.Buffered(1)?


def encoder_block(x, p, num_heads):
    """One DEncoderBlock via pallas_call. x: (B, N, C) f32, weights stored bf16."""
    global _SINGLE_BUFFER_OK
    if _SINGLE_BUFFER_OK is None:
        try:
            out = jax.block_until_ready(_encoder_block_call(x, p, num_heads, True))
            _SINGLE_BUFFER_OK = True
            return out
        except Exception:
            _SINGLE_BUFFER_OK = False
    return _encoder_block_call(x, p, num_heads, _SINGLE_BUFFER_OK)


def dtransformer_encoder(x, params_list, num_heads):
    for p in params_list:
        x = encoder_block(x, p, num_heads)
    return x


# --------------------------- pure-JAX reference --------------------------- #
def ref_block(x, p, num_heads):
    """Same math, outside Pallas: bf16 matmul operands, f32 accumulation, exact softmax."""
    B, N, C = x.shape
    H = num_heads
    dh = C // H
    scale = dh ** -0.5
    bf = jnp.bfloat16
    f32 = jnp.float32

    x1 = _layernorm(x, p["ln1w"][0], p["ln1b"][0])
    qkv = jnp.einsum("bnc,cd->bnd", x1.astype(bf), p["wqkv"], preferred_element_type=f32)
    q, k, v = qkv[..., :C], qkv[..., C:2 * C], qkv[..., 2 * C:]
    q = q * jnp.float32(scale)                               # scale folded into q (as in kernel)
    qh = q.reshape(B, N, H, dh).astype(bf)
    kh = k.reshape(B, N, H, dh).astype(bf)
    vh = v.reshape(B, N, H, dh).astype(bf)
    s = jnp.einsum("bqhd,bkhd->bhqk", qh, kh, preferred_element_type=f32)
    pattn = jax.nn.softmax(s, axis=-1)
    o = jnp.einsum("bhqk,bkhd->bqhd", pattn.astype(bf), vh, preferred_element_type=f32)
    o = o.reshape(B, N, C)
    x = x + jnp.einsum("bnc,cd->bnd", o.astype(bf), p["wproj"],
                       preferred_element_type=f32) + p["bproj"][0]

    x2 = _layernorm(x, p["ln2w"][0], p["ln2b"][0])
    h1 = _gelu_exact(jnp.einsum("bnc,ch->bnh", x2.astype(bf), p["w1"],
                                preferred_element_type=f32) + p["b1"][0])
    h2 = jnp.einsum("bnh,hc->bnc", h1.astype(bf), p["w2"],
                    preferred_element_type=f32) + p["b2"][0]
    return x + h2


# ------------------------------ param init -------------------------------- #
def init_block_params(key, dim, mlp_ratio=4):
    hid = dim * mlp_ratio
    ks = jax.random.split(key, 4)
    std = 0.02
    return {
        "ln1w": jnp.ones((1, dim), jnp.float32),
        "ln1b": jnp.zeros((1, dim), jnp.float32),
        # weights stored pre-transposed (in, out) and in bf16 (MXU-native operand dtype)
        "wqkv": (std * jax.random.normal(ks[0], (dim, 3 * dim), jnp.float32)).astype(jnp.bfloat16),
        "wproj": (std * jax.random.normal(ks[1], (dim, dim), jnp.float32)).astype(jnp.bfloat16),
        "bproj": jnp.zeros((1, dim), jnp.float32),
        "ln2w": jnp.ones((1, dim), jnp.float32),
        "ln2b": jnp.zeros((1, dim), jnp.float32),
        "w1": (std * jax.random.normal(ks[2], (dim, hid), jnp.float32)).astype(jnp.bfloat16),
        "b1": jnp.zeros((1, hid), jnp.float32),
        "w2": (std * jax.random.normal(ks[3], (hid, dim), jnp.float32)).astype(jnp.bfloat16),
        "b2": jnp.zeros((1, dim), jnp.float32),
    }


if __name__ == "__main__":
    B, N, dim = 2, 8, 64
    num_heads, n_blocks = 8, 2

    key = jax.random.PRNGKey(0)
    kx, kp = jax.random.split(key)
    x = jax.random.normal(kx, (B, N, dim), jnp.float32)

    block_keys = jax.random.split(kp, n_blocks)
    params_list = [init_block_params(block_keys[i], dim) for i in range(n_blocks)]

    y = dtransformer_encoder(x, params_list, num_heads)
    y = jax.block_until_ready(y)

    # cross-check against a pure-JAX reference of the same (bf16-operand) math
    yr = x
    for p in params_list:
        yr = ref_block(yr, p, num_heads)
    assert y.shape == (B, N, dim)
    assert jnp.allclose(y, yr, atol=2e-2, rtol=2e-2), "mismatch vs reference"

    print("KERNEL_OK")
</pallas_src>

<mosaic_0001>
module attributes {stable_mosaic.version = 11 : i64} {
  func.func @encoder_block_kernel(%arg0: i32, %arg1: i32, %arg2: memref<1x8x64xf32, #tpu.memory_space<vmem>>, %arg3: memref<1x64xf32, #tpu.memory_space<vmem>>, %arg4: memref<1x64xf32, #tpu.memory_space<vmem>>, %arg5: memref<64x192xbf16, #tpu.memory_space<vmem>>, %arg6: memref<64x64xbf16, #tpu.memory_space<vmem>>, %arg7: memref<1x64xf32, #tpu.memory_space<vmem>>, %arg8: memref<1x64xf32, #tpu.memory_space<vmem>>, %arg9: memref<1x64xf32, #tpu.memory_space<vmem>>, %arg10: memref<64x256xbf16, #tpu.memory_space<vmem>>, %arg11: memref<1x256xf32, #tpu.memory_space<vmem>>, %arg12: memref<256x64xbf16, #tpu.memory_space<vmem>>, %arg13: memref<1x64xf32, #tpu.memory_space<vmem>>, %arg14: memref<1x8x64xf32, #tpu.memory_space<vmem>>, %arg15: memref<8x64xbf16, #tpu.memory_space<vmem>>, %arg16: memref<8x64xbf16, #tpu.memory_space<vmem>>, %arg17: memref<8x64xbf16, #tpu.memory_space<vmem>>) attributes {dimension_semantics = [#tpu.dimension_semantics<parallel>, #tpu.dimension_semantics<arbitrary>], iteration_bounds = array<i64: 2, 1>, scalar_prefetch = 0 : i64, scratch_operands = 3 : i64, tpu.core_type = #tpu.core_type<tc>, window_params = [{transform_indices = @transform_0, window_bounds = array<i64: 1, 8, 64>}, {pipeline_mode = #tpu.pipeline_mode<synchronous>, transform_indices = @transform_1, window_bounds = array<i64: 1, 64>}, {pipeline_mode = #tpu.pipeline_mode<synchronous>, transform_indices = @transform_2, window_bounds = array<i64: 1, 64>}, {pipeline_mode = #tpu.pipeline_mode<synchronous>, transform_indices = @transform_3, window_bounds = array<i64: 64, 192>}, {pipeline_mode = #tpu.pipeline_mode<synchronous>, transform_indices = @transform_4, window_bounds = array<i64: 64, 64>}, {pipeline_mode = #tpu.pipeline_mode<synchronous>, transform_indices = @transform_5, window_bounds = array<i64: 1, 64>}, {pipeline_mode = #tpu.pipeline_mode<synchronous>, transform_indices = @transform_6, window_bounds = array<i64: 1, 64>}, {pipeline_mode = #tpu.pipeline_mode<synchronous>, transform_indices = @transform_7, window_bounds = array<i64: 1, 64>}, {pipeline_mode = #tpu.pipeline_mode<synchronous>, transform_indices = @transform_8, window_bounds = array<i64: 64, 256>}, {pipeline_mode = #tpu.pipeline_mode<synchronous>, transform_indices = @transform_9, window_bounds = array<i64: 1, 256>}, {pipeline_mode = #tpu.pipeline_mode<synchronous>, transform_indices = @transform_10, window_bounds = array<i64: 256, 64>}, {pipeline_mode = #tpu.pipeline_mode<synchronous>, transform_indices = @transform_11, window_bounds = array<i64: 1, 64>}, {transform_indices = @transform_12, window_bounds = array<i64: 1, 8, 64>}]} {
    %c0_i32 = arith.constant 0 : i32
    %0 = arith.cmpi eq, %arg1, %c0_i32 : i32
    %1 = arith.extui %0 : i1 to i32
    %c0_i32_0 = arith.constant 0 : i32
    %2 = arith.cmpi ne, %1, %c0_i32_0 : i32
    scf.if %2 {
      %c0_46 = arith.constant 0 : index
      %c0_47 = arith.constant 0 : index
      %c0_48 = arith.constant 0 : index
      %95 = vector.load %arg2[%c0_46, %c0_47, %c0_48] : memref<1x8x64xf32, #tpu.memory_space<vmem>>, vector<1x8x64xf32>
      %96 = vector.shape_cast %95 : vector<1x8x64xf32> to vector<8x64xf32>
      %c0_49 = arith.constant 0 : index
      %c0_50 = arith.constant 0 : index
      %97 = vector.load %arg3[%c0_49, %c0_50] : memref<1x64xf32, #tpu.memory_space<vmem>>, vector<1x64xf32>
      %98 = vector.shape_cast %97 : vector<1x64xf32> to vector<64xf32>
      %c0_51 = arith.constant 0 : index
      %c0_52 = arith.constant 0 : index
      %99 = vector.load %arg4[%c0_51, %c0_52] : memref<1x64xf32, #tpu.memory_space<vmem>>, vector<1x64xf32>
      %100 = vector.shape_cast %99 : vector<1x64xf32> to vector<64xf32>
      %cst_53 = arith.constant dense<0.000000e+00> : vector<8xf32>
      %101 = vector.multi_reduction <add>, %96, %cst_53 [1] : vector<8x64xf32> to vector<8xf32>
      %102 = vector.shape_cast %101 : vector<8xf32> to vector<8x1xf32>
      %cst_54 = arith.constant 6.400000e+01 : f32
      %103 = vector.broadcast %cst_54 : f32 to vector<8x1xf32>
      %104 = arith.divf %102, %103 : vector<8x1xf32>
      %105 = vector.broadcast %104 : vector<8x1xf32> to vector<8x64xf32>
      %106 = arith.subf %96, %105 : vector<8x64xf32>
      %107 = arith.mulf %106, %106 : vector<8x64xf32>
      %cst_55 = arith.constant dense<0.000000e+00> : vector<8xf32>
      %108 = vector.multi_reduction <add>, %107, %cst_55 [1] : vector<8x64xf32> to vector<8xf32>
      %109 = vector.shape_cast %108 : vector<8xf32> to vector<8x1xf32>
      %cst_56 = arith.constant 6.400000e+01 : f32
      %110 = vector.broadcast %cst_56 : f32 to vector<8x1xf32>
      %111 = arith.divf %109, %110 : vector<8x1xf32>
      %cst_57 = arith.constant 9.99999974E-6 : f32
      %112 = vector.broadcast %cst_57 : f32 to vector<8x1xf32>
      %113 = arith.addf %111, %112 : vector<8x1xf32>
      %114 = math.rsqrt %113 : vector<8x1xf32>
      %115 = vector.broadcast %114 : vector<8x1xf32> to vector<8x64xf32>
      %116 = arith.mulf %106, %115 : vector<8x64xf32>
      %117 = vector.shape_cast %98 : vector<64xf32> to vector<1x64xf32>
      %118 = vector.broadcast %117 : vector<1x64xf32> to vector<8x64xf32>
      %119 = arith.mulf %116, %118 : vector<8x64xf32>
      %120 = vector.shape_cast %100 : vector<64xf32> to vector<1x64xf32>
      %121 = vector.broadcast %120 : vector<1x64xf32> to vector<8x64xf32>
      %122 = arith.addf %119, %121 : vector<8x64xf32>
      %123 = arith.truncf %122 : vector<8x64xf32> to vector<8x64xbf16>
      %c0_58 = arith.constant 0 : index
      %c0_59 = arith.constant 0 : index
      %124 = vector.load %arg15[%c0_58, %c0_59] : memref<8x64xbf16, #tpu.memory_space<vmem>>, vector<8x64xbf16>
      tpu.vector_store %arg15[%c0_58, %c0_59], %123 {strides = array<i32>} : memref<8x64xbf16, #tpu.memory_space<vmem>>, vector<8x64xbf16>,
      %c0_60 = arith.constant 0 : index
      %c64 = arith.constant 64 : index
      %125 = vector.load %arg5[%c0_60, %c64] : memref<64x192xbf16, #tpu.memory_space<vmem>>, vector<64x128xbf16>
      %cst_61 = arith.constant dense<0.000000e+00> : vector<8x128xf32>
      %126 = tpu.matmul %123, %125, %cst_61 {dimension_numbers = #tpu.dot_dimension_numbers<[1], [0], [0], [1], [0, 0, 1, 1], [], []>} : vector<8x64xbf16>, vector<64x128xbf16>, vector<8x128xf32> -> vector<8x128xf32>
      %127 = vector.extract_strided_slice %126 {offsets = [0, 0], sizes = [8, 64], strides = [1, 1]} : vector<8x128xf32> to vector<8x64xf32>
      %128 = arith.truncf %127 : vector<8x64xf32> to vector<8x64xbf16>
      %c0_62 = arith.constant 0 : index
      %c0_63 = arith.constant 0 : index
      %129 = vector.load %arg16[%c0_62, %c0_63] : memref<8x64xbf16, #tpu.memory_space<vmem>>, vector<8x64xbf16>
      tpu.vector_store %arg16[%c0_62, %c0_63], %128 {strides = array<i32>} : memref<8x64xbf16, #tpu.memory_space<vmem>>, vector<8x64xbf16>,
      %130 = vector.extract_strided_slice %126 {offsets = [0, 64], sizes = [8, 64], strides = [1, 1]} : vector<8x128xf32> to vector<8x64xf32>
      %131 = arith.truncf %130 : vector<8x64xf32> to vector<8x64xbf16>
      %c0_64 = arith.constant 0 : index
      %c0_65 = arith.constant 0 : index
      %132 = vector.load %arg17[%c0_64, %c0_65] : memref<8x64xbf16, #tpu.memory_space<vmem>>, vector<8x64xbf16>
      tpu.vector_store %arg17[%c0_64, %c0_65], %131 {strides = array<i32>} : memref<8x64xbf16, #tpu.memory_space<vmem>>, vector<8x64xbf16>,
    } else {
    }
    %c0 = arith.constant 0 : index
    %c0_1 = arith.constant 0 : index
    %c0_2 = arith.constant 0 : index
    %3 = vector.load %arg2[%c0, %c0_1, %c0_2] : memref<1x8x64xf32, #tpu.memory_space<vmem>>, vector<1x8x64xf32>
    %4 = vector.shape_cast %3 : vector<1x8x64xf32> to vector<8x64xf32>
    %c0_3 = arith.constant 0 : index
    %c0_4 = arith.constant 0 : index
    %5 = vector.load %arg15[%c0_3, %c0_4] : memref<8x64xbf16, #tpu.memory_space<vmem>>, vector<8x64xbf16>
    %c0_5 = arith.constant 0 : index
    %c0_6 = arith.constant 0 : index
    %6 = vector.load %arg5[%c0_5, %c0_6] : memref<64x192xbf16, #tpu.memory_space<vmem>>, vector<64x64xbf16>
    %cst = arith.constant dense<0.000000e+00> : vector<8x64xf32>
    %7 = tpu.matmul %5, %6, %cst {dimension_numbers = #tpu.dot_dimension_numbers<[1], [0], [0], [1], [0, 0, 1, 1], [], []>} : vector<8x64xbf16>, vector<64x64xbf16>, vector<8x64xf32> -> vector<8x64xf32>
    %cst_7 = arith.constant 0.353553385 : f32
    %8 = vector.broadcast %cst_7 : f32 to vector<8x64xf32>
    %9 = arith.mulf %7, %8 : vector<8x64xf32>
    %10 = vector.shape_cast %9 : vector<8x64xf32> to vector<8x8x8xf32>
    %11 = arith.truncf %10 : vector<8x8x8xf32> to vector<8x8x8xbf16>
    %c0_8 = arith.constant 0 : index
    %c0_9 = arith.constant 0 : index
    %12 = vector.load %arg16[%c0_8, %c0_9] : memref<8x64xbf16, #tpu.memory_space<vmem>>, vector<8x64xbf16>
    %13 = vector.shape_cast %12 : vector<8x64xbf16> to vector<8x8x8xbf16>
    %c0_10 = arith.constant 0 : index
    %c0_11 = arith.constant 0 : index
    %14 = vector.load %arg17[%c0_10, %c0_11] : memref<8x64xbf16, #tpu.memory_space<vmem>>, vector<8x64xbf16>
    %15 = vector.shape_cast %14 : vector<8x64xbf16> to vector<8x8x8xbf16>
    "tpu.trace_start"() <{level = 10 : i32, message = "qhd,khd->hqk"}> : () -> ()
    %cst_12 = arith.constant dense<0.000000e+00> : vector<8x8x8xf32>
    %16 = tpu.matmul %11, %13, %cst_12 {dimension_numbers = #tpu.dot_dimension_numbers<[2], [2], [0], [0], [0, 1, 0, 0, 1, 0], [1], [1]>} : vector<8x8x8xbf16>, vector<8x8x8xbf16>, vector<8x8x8xf32> -> vector<8x8x8xf32>
    "tpu.trace_stop"() : () -> ()
    %cst_13 = arith.constant dense<0xFF800000> : vector<8x8xf32>
    %17 = vector.multi_reduction <maximumf>, %16, %cst_13 [2] : vector<8x8x8xf32> to vector<8x8xf32>
    %18 = vector.shape_cast %17 : vector<8x8xf32> to vector<8x8x1xf32>
    %19 = vector.broadcast %18 : vector<8x8x1xf32> to vector<8x8x8xf32>
    %20 = arith.subf %16, %19 : vector<8x8x8xf32>
    %21 = math.exp %20 : vector<8x8x8xf32>
    %cst_14 = arith.constant dense<0.000000e+00> : vector<8x8xf32>
    %22 = vector.multi_reduction <add>, %21, %cst_14 [2] : vector<8x8x8xf32> to vector<8x8xf32>
    %23 = arith.truncf %21 : vector<8x8x8xf32> to vector<8x8x8xbf16>
    "tpu.trace_start"() <{level = 10 : i32, message = "hqk,khd->qhd"}> : () -> ()
    %cst_15 = arith.constant dense<0.000000e+00> : vector<8x8x8xf32>
    %24 = tpu.matmul %15, %23, %cst_15 {dimension_numbers = #tpu.dot_dimension_numbers<[0], [2], [2], [1], [0, 1, 0, 2, 1, 1], [1], [0]>} : vector<8x8x8xbf16>, vector<8x8x8xbf16>, vector<8x8x8xf32> -> vector<8x8x8xf32>
    %25 = tpu.transpose %24, [2, 0, 1] : vector<8x8x8xf32> -> vector<8x8x8xf32>
    "tpu.trace_stop"() : () -> ()
    %26 = tpu.reciprocal %22 {approx = true} : vector<8x8xf32> -> vector<8x8xf32>
    %27 = tpu.transpose %26, [1, 0] : vector<8x8xf32> -> vector<8x8xf32>
    %28 = vector.shape_cast %27 : vector<8x8xf32> to vector<8x8x1xf32>
    %29 = vector.broadcast %28 : vector<8x8x1xf32> to vector<8x8x8xf32>
    %30 = arith.mulf %25, %29 : vector<8x8x8xf32>
    %31 = vector.shape_cast %30 : vector<8x8x8xf32> to vector<8x64xf32>
    %32 = arith.truncf %31 : vector<8x64xf32> to vector<8x64xbf16>
    %c0_16 = arith.constant 0 : index
    %c0_17 = arith.constant 0 : index
    %33 = vector.load %arg6[%c0_16, %c0_17] : memref<64x64xbf16, #tpu.memory_space<vmem>>, vector<64x64xbf16>
    %cst_18 = arith.constant dense<0.000000e+00> : vector<8x64xf32>
    %34 = tpu.matmul %32, %33, %cst_18 {dimension_numbers = #tpu.dot_dimension_numbers<[1], [0], [0], [1], [0, 0, 1, 1], [], []>} : vector<8x64xbf16>, vector<64x64xbf16>, vector<8x64xf32> -> vector<8x64xf32>
    %c0_19 = arith.constant 0 : index
    %c0_20 = arith.constant 0 : index
    %35 = vector.load %arg7[%c0_19, %c0_20] : memref<1x64xf32, #tpu.memory_space<vmem>>, vector<1x64xf32>
    %36 = vector.shape_cast %35 : vector<1x64xf32> to vector<64xf32>
    %37 = vector.shape_cast %36 : vector<64xf32> to vector<1x64xf32>
    %38 = vector.broadcast %37 : vector<1x64xf32> to vector<8x64xf32>
    %39 = arith.addf %34, %38 : vector<8x64xf32>
    %40 = arith.addf %4, %39 : vector<8x64xf32>
    %c0_21 = arith.constant 0 : index
    %c0_22 = arith.constant 0 : index
    %41 = vector.load %arg8[%c0_21, %c0_22] : memref<1x64xf32, #tpu.memory_space<vmem>>, vector<1x64xf32>
    %42 = vector.shape_cast %41 : vector<1x64xf32> to vector<64xf32>
    %c0_23 = arith.constant 0 : index
    %c0_24 = arith.constant 0 : index
    %43 = vector.load %arg9[%c0_23, %c0_24] : memref<1x64xf32, #tpu.memory_space<vmem>>, vector<1x64xf32>
    %44 = vector.shape_cast %43 : vector<1x64xf32> to vector<64xf32>
    %cst_25 = arith.constant dense<0.000000e+00> : vector<8xf32>
    %45 = vector.multi_reduction <add>, %40, %cst_25 [1] : vector<8x64xf32> to vector<8xf32>
    %46 = vector.shape_cast %45 : vector<8xf32> to vector<8x1xf32>
    %cst_26 = arith.constant 6.400000e+01 : f32
    %47 = vector.broadcast %cst_26 : f32 to vector<8x1xf32>
    %48 = arith.divf %46, %47 : vector<8x1xf32>
    %49 = vector.broadcast %48 : vector<8x1xf32> to vector<8x64xf32>
    %50 = arith.subf %40, %49 : vector<8x64xf32>
    %51 = arith.mulf %50, %50 : vector<8x64xf32>
    %cst_27 = arith.constant dense<0.000000e+00> : vector<8xf32>
    %52 = vector.multi_reduction <add>, %51, %cst_27 [1] : vector<8x64xf32> to vector<8xf32>
    %53 = vector.shape_cast %52 : vector<8xf32> to vector<8x1xf32>
    %cst_28 = arith.constant 6.400000e+01 : f32
    %54 = vector.broadcast %cst_28 : f32 to vector<8x1xf32>
    %55 = arith.divf %53, %54 : vector<8x1xf32>
    %cst_29 = arith.constant 9.99999974E-6 : f32
    %56 = vector.broadcast %cst_29 : f32 to vector<8x1xf32>
    %57 = arith.addf %55, %56 : vector<8x1xf32>
    %58 = math.rsqrt %57 : vector<8x1xf32>
    %59 = vector.broadcast %58 : vector<8x1xf32> to vector<8x64xf32>
    %60 = arith.mulf %50, %59 : vector<8x64xf32>
    %61 = vector.shape_cast %42 : vector<64xf32> to vector<1x64xf32>
    %62 = vector.broadcast %61 : vector<1x64xf32> to vector<8x64xf32>
    %63 = arith.mulf %60, %62 : vector<8x64xf32>
    %64 = vector.shape_cast %44 : vector<64xf32> to vector<1x64xf32>
    %65 = vector.broadcast %64 : vector<1x64xf32> to vector<8x64xf32>
    %66 = arith.addf %63, %65 : vector<8x64xf32>
    %67 = arith.truncf %66 : vector<8x64xf32> to vector<8x64xbf16>
    %c0_30 = arith.constant 0 : index
    %c0_31 = arith.constant 0 : index
    %68 = vector.load %arg10[%c0_30, %c0_31] : memref<64x256xbf16, #tpu.memory_space<vmem>>, vector<64x256xbf16>
    %cst_32 = arith.constant dense<0.000000e+00> : vector<8x256xf32>
    %69 = tpu.matmul %67, %68, %cst_32 {dimension_numbers = #tpu.dot_dimension_numbers<[1], [0], [0], [1], [0, 0, 1, 1], [], []>} : vector<8x64xbf16>, vector<64x256xbf16>, vector<8x256xf32> -> vector<8x256xf32>
    %c0_33 = arith.constant 0 : index
    %c0_34 = arith.constant 0 : index
    %70 = vector.load %arg11[%c0_33, %c0_34] : memref<1x256xf32, #tpu.memory_space<vmem>>, vector<1x256xf32>
    %71 = vector.shape_cast %70 : vector<1x256xf32> to vector<256xf32>
    %72 = vector.shape_cast %71 : vector<256xf32> to vector<1x256xf32>
    %73 = vector.broadcast %72 : vector<1x256xf32> to vector<8x256xf32>
    %74 = arith.addf %69, %73 : vector<8x256xf32>
    %cst_35 = arith.constant 5.000000e-01 : f32
    %75 = vector.broadcast %cst_35 : f32 to vector<8x256xf32>
    %76 = arith.mulf %75, %74 : vector<8x256xf32>
    %cst_36 = arith.constant 0.707106769 : f32
    %77 = vector.broadcast %cst_36 : f32 to vector<8x256xf32>
    %78 = arith.mulf %74, %77 : vector<8x256xf32>
    %79 = math.erf %78 : vector<8x256xf32>
    %cst_37 = arith.constant 1.000000e+00 : f32
    %80 = vector.broadcast %cst_37 : f32 to vector<8x256xf32>
    %81 = arith.addf %80, %79 : vector<8x256xf32>
    %82 = arith.mulf %76, %81 : vector<8x256xf32>
    %83 = arith.truncf %82 : vector<8x256xf32> to vector<8x256xbf16>
    %c0_38 = arith.constant 0 : index
    %c0_39 = arith.constant 0 : index
    %84 = vector.load %arg12[%c0_38, %c0_39] : memref<256x64xbf16, #tpu.memory_space<vmem>>, vector<256x64xbf16>
    %cst_40 = arith.constant dense<0.000000e+00> : vector<8x64xf32>
    %85 = tpu.matmul %83, %84, %cst_40 {dimension_numbers = #tpu.dot_dimension_numbers<[1], [0], [0], [1], [0, 0, 1, 1], [], []>} : vector<8x256xbf16>, vector<256x64xbf16>, vector<8x64xf32> -> vector<8x64xf32>
    %c0_41 = arith.constant 0 : index
    %c0_42 = arith.constant 0 : index
    %86 = vector.load %arg13[%c0_41, %c0_42] : memref<1x64xf32, #tpu.memory_space<vmem>>, vector<1x64xf32>
    %87 = vector.shape_cast %86 : vector<1x64xf32> to vector<64xf32>
    %88 = vector.shape_cast %87 : vector<64xf32> to vector<1x64xf32>
    %89 = vector.broadcast %88 : vector<1x64xf32> to vector<8x64xf32>
    %90 = arith.addf %85, %89 : vector<8x64xf32>
    %91 = arith.addf %40, %90 : vector<8x64xf32>
    %c0_43 = arith.constant 0 : index
    %c0_44 = arith.constant 0 : index
    %c0_45 = arith.constant 0 : index
    %92 = vector.load %arg14[%c0_43, %c0_44, %c0_45] : memref<1x8x64xf32, #tpu.memory_space<vmem>>, vector<1x8x64xf32>
    %93 = vector.shape_cast %92 : vector<1x8x64xf32> to vector<8x64xf32>
    %94 = vector.shape_cast %91 : vector<8x64xf32> to vector<1x8x64xf32>
    tpu.vector_store %arg14[%c0_43, %c0_44, %c0_45], %94 {strides = array<i32>} : memref<1x8x64xf32, #tpu.memory_space<vmem>>, vector<1x8x64xf32>,
    return
  }
  func.func @transform_0(%arg0: i32, %arg1: i32) -> (i32, i32, i32) {
    %c0_i32 = arith.constant 0 : i32
    %c0_i32_0 = arith.constant 0 : i32
    %c0_i32_1 = arith.constant 0 : i32
    return %arg0, %c0_i32, %c0_i32_0 : i32, i32, i32
  }
  func.func @transform_1(%arg0: i32, %arg1: i32) -> (i32, i32) {
    %c0_i32 = arith.constant 0 : i32
    %c0_i32_0 = arith.constant 0 : i32
    %c0_i32_1 = arith.constant 0 : i32
    return %c0_i32, %c0_i32_0 : i32, i32
  }
  func.func @transform_2(%arg0: i32, %arg1: i32) -> (i32, i32) {
    %c0_i32 = arith.constant 0 : i32
    %c0_i32_0 = arith.constant 0 : i32
    %c0_i32_1 = arith.constant 0 : i32
    return %c0_i32, %c0_i32_0 : i32, i32
  }
  func.func @transform_3(%arg0: i32, %arg1: i32) -> (i32, i32) {
    %c0_i32 = arith.constant 0 : i32
    %c0_i32_0 = arith.constant 0 : i32
    %c0_i32_1 = arith.constant 0 : i32
    return %c0_i32, %c0_i32_0 : i32, i32
  }
  func.func @transform_4(%arg0: i32, %arg1: i32) -> (i32, i32) {
    %c0_i32 = arith.constant 0 : i32
    %c0_i32_0 = arith.constant 0 : i32
    %c0_i32_1 = arith.constant 0 : i32
    return %c0_i32, %c0_i32_0 : i32, i32
  }
  func.func @transform_5(%arg0: i32, %arg1: i32) -> (i32, i32) {
    %c0_i32 = arith.constant 0 : i32
    %c0_i32_0 = arith.constant 0 : i32
    %c0_i32_1 = arith.constant 0 : i32
    return %c0_i32, %c0_i32_0 : i32, i32
  }
  func.func @transform_6(%arg0: i32, %arg1: i32) -> (i32, i32) {
    %c0_i32 = arith.constant 0 : i32
    %c0_i32_0 = arith.constant 0 : i32
    %c0_i32_1 = arith.constant 0 : i32
    return %c0_i32, %c0_i32_0 : i32, i32
  }
  func.func @transform_7(%arg0: i32, %arg1: i32) -> (i32, i32) {
    %c0_i32 = arith.constant 0 : i32
    %c0_i32_0 = arith.constant 0 : i32
    %c0_i32_1 = arith.constant 0 : i32
    return %c0_i32, %c0_i32_0 : i32, i32
  }
  func.func @transform_8(%arg0: i32, %arg1: i32) -> (i32, i32) {
    %c0_i32 = arith.constant 0 : i32
    %c0_i32_0 = arith.constant 0 : i32
    %c0_i32_1 = arith.constant 0 : i32
    return %c0_i32, %c0_i32_0 : i32, i32
  }
  func.func @transform_9(%arg0: i32, %arg1: i32) -> (i32, i32) {
    %c0_i32 = arith.constant 0 : i32
    %c0_i32_0 = arith.constant 0 : i32
    %c0_i32_1 = arith.constant 0 : i32
    return %c0_i32, %c0_i32_0 : i32, i32
  }
  func.func @transform_10(%arg0: i32, %arg1: i32) -> (i32, i32) {
    %c0_i32 = arith.constant 0 : i32
    %c0_i32_0 = arith.constant 0 : i32
    %c0_i32_1 = arith.constant 0 : i32
    return %c0_i32, %c0_i32_0 : i32, i32
  }
  func.func @transform_11(%arg0: i32, %arg1: i32) -> (i32, i32) {
    %c0_i32 = arith.constant 0 : i32
    %c0_i32_0 = arith.constant 0 : i32
    %c0_i32_1 = arith.constant 0 : i32
    return %c0_i32, %c0_i32_0 : i32, i32
  }
  func.func @transform_12(%arg0: i32, %arg1: i32) -> (i32, i32, i32) {
    %c0_i32 = arith.constant 0 : i32
    %c0_i32_0 = arith.constant 0 : i32
    return %arg0, %arg1, %c0_i32 : i32, i32, i32
  }
}

module attributes {stable_mosaic.version = 11 : i64} {
  func.func @encoder_block_kernel(%arg0: i32, %arg1: i32, %arg2: memref<1x8x64xf32, #tpu.memory_space<vmem>>, %arg3: memref<1x64xf32, #tpu.memory_space<vmem>>, %arg4: memref<1x64xf32, #tpu.memory_space<vmem>>, %arg5: memref<64x192xbf16, #tpu.memory_space<vmem>>, %arg6: memref<64x64xbf16, #tpu.memory_space<vmem>>, %arg7: memref<1x64xf32, #tpu.memory_space<vmem>>, %arg8: memref<1x64xf32, #tpu.memory_space<vmem>>, %arg9: memref<1x64xf32, #tpu.memory_space<vmem>>, %arg10: memref<64x256xbf16, #tpu.memory_space<vmem>>, %arg11: memref<1x256xf32, #tpu.memory_space<vmem>>, %arg12: memref<256x64xbf16, #tpu.memory_space<vmem>>, %arg13: memref<1x64xf32, #tpu.memory_space<vmem>>, %arg14: memref<1x8x64xf32, #tpu.memory_space<vmem>>, %arg15: memref<8x64xbf16, #tpu.memory_space<vmem>>, %arg16: memref<8x64xbf16, #tpu.memory_space<vmem>>, %arg17: memref<8x64xbf16, #tpu.memory_space<vmem>>) attributes {dimension_semantics = [#tpu.dimension_semantics<parallel>, #tpu.dimension_semantics<arbitrary>], iteration_bounds = array<i64: 2, 1>, scalar_prefetch = 0 : i64, scratch_operands = 3 : i64, tpu.core_type = #tpu.core_type<tc>, window_params = [{transform_indices = @transform_0, window_bounds = array<i64: 1, 8, 64>}, {pipeline_mode = #tpu.pipeline_mode<synchronous>, transform_indices = @transform_1, window_bounds = array<i64: 1, 64>}, {pipeline_mode = #tpu.pipeline_mode<synchronous>, transform_indices = @transform_2, window_bounds = array<i64: 1, 64>}, {pipeline_mode = #tpu.pipeline_mode<synchronous>, transform_indices = @transform_3, window_bounds = array<i64: 64, 192>}, {pipeline_mode = #tpu.pipeline_mode<synchronous>, transform_indices = @transform_4, window_bounds = array<i64: 64, 64>}, {pipeline_mode = #tpu.pipeline_mode<synchronous>, transform_indices = @transform_5, window_bounds = array<i64: 1, 64>}, {pipeline_mode = #tpu.pipeline_mode<synchronous>, transform_indices = @transform_6, window_bounds = array<i64: 1, 64>}, {pipeline_mode = #tpu.pipeline_mode<synchronous>, transform_indices = @transform_7, window_bounds = array<i64: 1, 64>}, {pipeline_mode = #tpu.pipeline_mode<synchronous>, transform_indices = @transform_8, window_bounds = array<i64: 64, 256>}, {pipeline_mode = #tpu.pipeline_mode<synchronous>, transform_indices = @transform_9, window_bounds = array<i64: 1, 256>}, {pipeline_mode = #tpu.pipeline_mode<synchronous>, transform_indices = @transform_10, window_bounds = array<i64: 256, 64>}, {pipeline_mode = #tpu.pipeline_mode<synchronous>, transform_indices = @transform_11, window_bounds = array<i64: 1, 64>}, {transform_indices = @transform_12, window_bounds = array<i64: 1, 8, 64>}]} {
    %c0_i32 = arith.constant 0 : i32
    %0 = arith.cmpi eq, %arg1, %c0_i32 : i32
    %1 = arith.extui %0 : i1 to i32
    %c0_i32_0 = arith.constant 0 : i32
    %2 = arith.cmpi ne, %1, %c0_i32_0 : i32
    scf.if %2 {
      %c0_46 = arith.constant 0 : index
      %c0_47 = arith.constant 0 : index
      %c0_48 = arith.constant 0 : index
      %95 = vector.load %arg2[%c0_46, %c0_47, %c0_48] : memref<1x8x64xf32, #tpu.memory_space<vmem>>, vector<1x8x64xf32>
      %96 = vector.shape_cast %95 : vector<1x8x64xf32> to vector<8x64xf32>
      %c0_49 = arith.constant 0 : index
      %c0_50 = arith.constant 0 : index
      %97 = vector.load %arg3[%c0_49, %c0_50] : memref<1x64xf32, #tpu.memory_space<vmem>>, vector<1x64xf32>
      %98 = vector.shape_cast %97 : vector<1x64xf32> to vector<64xf32>
      %c0_51 = arith.constant 0 : index
      %c0_52 = arith.constant 0 : index
      %99 = vector.load %arg4[%c0_51, %c0_52] : memref<1x64xf32, #tpu.memory_space<vmem>>, vector<1x64xf32>
      %100 = vector.shape_cast %99 : vector<1x64xf32> to vector<64xf32>
      %cst_53 = arith.constant dense<0.000000e+00> : vector<8xf32>
      %101 = vector.multi_reduction <add>, %96, %cst_53 [1] : vector<8x64xf32> to vector<8xf32>
      %102 = vector.shape_cast %101 : vector<8xf32> to vector<8x1xf32>
      %cst_54 = arith.constant 6.400000e+01 : f32
      %103 = vector.broadcast %cst_54 : f32 to vector<8x1xf32>
      %104 = arith.divf %102, %103 : vector<8x1xf32>
      %105 = vector.broadcast %104 : vector<8x1xf32> to vector<8x64xf32>
      %106 = arith.subf %96, %105 : vector<8x64xf32>
      %107 = arith.mulf %106, %106 : vector<8x64xf32>
      %cst_55 = arith.constant dense<0.000000e+00> : vector<8xf32>
      %108 = vector.multi_reduction <add>, %107, %cst_55 [1] : vector<8x64xf32> to vector<8xf32>
      %109 = vector.shape_cast %108 : vector<8xf32> to vector<8x1xf32>
      %cst_56 = arith.constant 6.400000e+01 : f32
      %110 = vector.broadcast %cst_56 : f32 to vector<8x1xf32>
      %111 = arith.divf %109, %110 : vector<8x1xf32>
      %cst_57 = arith.constant 9.99999974E-6 : f32
      %112 = vector.broadcast %cst_57 : f32 to vector<8x1xf32>
      %113 = arith.addf %111, %112 : vector<8x1xf32>
      %114 = math.rsqrt %113 : vector<8x1xf32>
      %115 = vector.broadcast %114 : vector<8x1xf32> to vector<8x64xf32>
      %116 = arith.mulf %106, %115 : vector<8x64xf32>
      %117 = vector.shape_cast %98 : vector<64xf32> to vector<1x64xf32>
      %118 = vector.broadcast %117 : vector<1x64xf32> to vector<8x64xf32>
      %119 = arith.mulf %116, %118 : vector<8x64xf32>
      %120 = vector.shape_cast %100 : vector<64xf32> to vector<1x64xf32>
      %121 = vector.broadcast %120 : vector<1x64xf32> to vector<8x64xf32>
      %122 = arith.addf %119, %121 : vector<8x64xf32>
      %123 = arith.truncf %122 : vector<8x64xf32> to vector<8x64xbf16>
      %c0_58 = arith.constant 0 : index
      %c0_59 = arith.constant 0 : index
      %124 = vector.load %arg15[%c0_58, %c0_59] : memref<8x64xbf16, #tpu.memory_space<vmem>>, vector<8x64xbf16>
      tpu.vector_store %arg15[%c0_58, %c0_59], %123 {strides = array<i32>} : memref<8x64xbf16, #tpu.memory_space<vmem>>, vector<8x64xbf16>,
      %c0_60 = arith.constant 0 : index
      %c64 = arith.constant 64 : index
      %125 = vector.load %arg5[%c0_60, %c64] : memref<64x192xbf16, #tpu.memory_space<vmem>>, vector<64x128xbf16>
      %cst_61 = arith.constant dense<0.000000e+00> : vector<8x128xf32>
      %126 = tpu.matmul %123, %125, %cst_61 {dimension_numbers = #tpu.dot_dimension_numbers<[1], [0], [0], [1], [0, 0, 1, 1], [], []>} : vector<8x64xbf16>, vector<64x128xbf16>, vector<8x128xf32> -> vector<8x128xf32>
      %127 = vector.extract_strided_slice %126 {offsets = [0, 0], sizes = [8, 64], strides = [1, 1]} : vector<8x128xf32> to vector<8x64xf32>
      %128 = arith.truncf %127 : vector<8x64xf32> to vector<8x64xbf16>
      %c0_62 = arith.constant 0 : index
      %c0_63 = arith.constant 0 : index
      %129 = vector.load %arg16[%c0_62, %c0_63] : memref<8x64xbf16, #tpu.memory_space<vmem>>, vector<8x64xbf16>
      tpu.vector_store %arg16[%c0_62, %c0_63], %128 {strides = array<i32>} : memref<8x64xbf16, #tpu.memory_space<vmem>>, vector<8x64xbf16>,
      %130 = vector.extract_strided_slice %126 {offsets = [0, 64], sizes = [8, 64], strides = [1, 1]} : vector<8x128xf32> to vector<8x64xf32>
      %131 = arith.truncf %130 : vector<8x64xf32> to vector<8x64xbf16>
      %c0_64 = arith.constant 0 : index
      %c0_65 = arith.constant 0 : index
      %132 = vector.load %arg17[%c0_64, %c0_65] : memref<8x64xbf16, #tpu.memory_space<vmem>>, vector<8x64xbf16>
      tpu.vector_store %arg17[%c0_64, %c0_65], %131 {strides = array<i32>} : memref<8x64xbf16, #tpu.memory_space<vmem>>, vector<8x64xbf16>,
    } else {
    }
    %c0 = arith.constant 0 : index
    %c0_1 = arith.constant 0 : index
    %c0_2 = arith.constant 0 : index
    %3 = vector.load %arg2[%c0, %c0_1, %c0_2] : memref<1x8x64xf32, #tpu.memory_space<vmem>>, vector<1x8x64xf32>
    %4 = vector.shape_cast %3 : vector<1x8x64xf32> to vector<8x64xf32>
    %c0_3 = arith.constant 0 : index
    %c0_4 = arith.constant 0 : index
    %5 = vector.load %arg15[%c0_3, %c0_4] : memref<8x64xbf16, #tpu.memory_space<vmem>>, vector<8x64xbf16>
    %c0_5 = arith.constant 0 : index
    %c0_6 = arith.constant 0 : index
    %6 = vector.load %arg5[%c0_5, %c0_6] : memref<64x192xbf16, #tpu.memory_space<vmem>>, vector<64x64xbf16>
    %cst = arith.constant dense<0.000000e+00> : vector<8x64xf32>
    %7 = tpu.matmul %5, %6, %cst {dimension_numbers = #tpu.dot_dimension_numbers<[1], [0], [0], [1], [0, 0, 1, 1], [], []>} : vector<8x64xbf16>, vector<64x64xbf16>, vector<8x64xf32> -> vector<8x64xf32>
    %cst_7 = arith.constant 0.353553385 : f32
    %8 = vector.broadcast %cst_7 : f32 to vector<8x64xf32>
    %9 = arith.mulf %7, %8 : vector<8x64xf32>
    %10 = vector.shape_cast %9 : vector<8x64xf32> to vector<8x8x8xf32>
    %11 = arith.truncf %10 : vector<8x8x8xf32> to vector<8x8x8xbf16>
    %c0_8 = arith.constant 0 : index
    %c0_9 = arith.constant 0 : index
    %12 = vector.load %arg16[%c0_8, %c0_9] : memref<8x64xbf16, #tpu.memory_space<vmem>>, vector<8x64xbf16>
    %13 = vector.shape_cast %12 : vector<8x64xbf16> to vector<8x8x8xbf16>
    %c0_10 = arith.constant 0 : index
    %c0_11 = arith.constant 0 : index
    %14 = vector.load %arg17[%c0_10, %c0_11] : memref<8x64xbf16, #tpu.memory_space<vmem>>, vector<8x64xbf16>
    %15 = vector.shape_cast %14 : vector<8x64xbf16> to vector<8x8x8xbf16>
    "tpu.trace_start"() <{level = 10 : i32, message = "qhd,khd->hqk"}> : () -> ()
    %cst_12 = arith.constant dense<0.000000e+00> : vector<8x8x8xf32>
    %16 = tpu.matmul %11, %13, %cst_12 {dimension_numbers = #tpu.dot_dimension_numbers<[2], [2], [0], [0], [0, 1, 0, 0, 1, 0], [1], [1]>} : vector<8x8x8xbf16>, vector<8x8x8xbf16>, vector<8x8x8xf32> -> vector<8x8x8xf32>
    "tpu.trace_stop"() : () -> ()
    %cst_13 = arith.constant dense<0xFF800000> : vector<8x8xf32>
    %17 = vector.multi_reduction <maximumf>, %16, %cst_13 [2] : vector<8x8x8xf32> to vector<8x8xf32>
    %18 = vector.shape_cast %17 : vector<8x8xf32> to vector<8x8x1xf32>
    %19 = vector.broadcast %18 : vector<8x8x1xf32> to vector<8x8x8xf32>
    %20 = arith.subf %16, %19 : vector<8x8x8xf32>
    %21 = math.exp %20 : vector<8x8x8xf32>
    %cst_14 = arith.constant dense<0.000000e+00> : vector<8x8xf32>
    %22 = vector.multi_reduction <add>, %21, %cst_14 [2] : vector<8x8x8xf32> to vector<8x8xf32>
    %23 = arith.truncf %21 : vector<8x8x8xf32> to vector<8x8x8xbf16>
    "tpu.trace_start"() <{level = 10 : i32, message = "hqk,khd->qhd"}> : () -> ()
    %cst_15 = arith.constant dense<0.000000e+00> : vector<8x8x8xf32>
    %24 = tpu.matmul %15, %23, %cst_15 {dimension_numbers = #tpu.dot_dimension_numbers<[0], [2], [2], [1], [0, 1, 0, 2, 1, 1], [1], [0]>} : vector<8x8x8xbf16>, vector<8x8x8xbf16>, vector<8x8x8xf32> -> vector<8x8x8xf32>
    %25 = tpu.transpose %24, [2, 0, 1] : vector<8x8x8xf32> -> vector<8x8x8xf32>
    "tpu.trace_stop"() : () -> ()
    %26 = tpu.reciprocal %22 {approx = true} : vector<8x8xf32> -> vector<8x8xf32>
    %27 = tpu.transpose %26, [1, 0] : vector<8x8xf32> -> vector<8x8xf32>
    %28 = vector.shape_cast %27 : vector<8x8xf32> to vector<8x8x1xf32>
    %29 = vector.broadcast %28 : vector<8x8x1xf32> to vector<8x8x8xf32>
    %30 = arith.mulf %25, %29 : vector<8x8x8xf32>
    %31 = vector.shape_cast %30 : vector<8x8x8xf32> to vector<8x64xf32>
    %32 = arith.truncf %31 : vector<8x64xf32> to vector<8x64xbf16>
    %c0_16 = arith.constant 0 : index
    %c0_17 = arith.constant 0 : index
    %33 = vector.load %arg6[%c0_16, %c0_17] : memref<64x64xbf16, #tpu.memory_space<vmem>>, vector<64x64xbf16>
    %cst_18 = arith.constant dense<0.000000e+00> : vector<8x64xf32>
    %34 = tpu.matmul %32, %33, %cst_18 {dimension_numbers = #tpu.dot_dimension_numbers<[1], [0], [0], [1], [0, 0, 1, 1], [], []>} : vector<8x64xbf16>, vector<64x64xbf16>, vector<8x64xf32> -> vector<8x64xf32>
    %c0_19 = arith.constant 0 : index
    %c0_20 = arith.constant 0 : index
    %35 = vector.load %arg7[%c0_19, %c0_20] : memref<1x64xf32, #tpu.memory_space<vmem>>, vector<1x64xf32>
    %36 = vector.shape_cast %35 : vector<1x64xf32> to vector<64xf32>
    %37 = vector.shape_cast %36 : vector<64xf32> to vector<1x64xf32>
    %38 = vector.broadcast %37 : vector<1x64xf32> to vector<8x64xf32>
    %39 = arith.addf %34, %38 : vector<8x64xf32>
    %40 = arith.addf %4, %39 : vector<8x64xf32>
    %c0_21 = arith.constant 0 : index
    %c0_22 = arith.constant 0 : index
    %41 = vector.load %arg8[%c0_21, %c0_22] : memref<1x64xf32, #tpu.memory_space<vmem>>, vector<1x64xf32>
    %42 = vector.shape_cast %41 : vector<1x64xf32> to vector<64xf32>
    %c0_23 = arith.constant 0 : index
    %c0_24 = arith.constant 0 : index
    %43 = vector.load %arg9[%c0_23, %c0_24] : memref<1x64xf32, #tpu.memory_space<vmem>>, vector<1x64xf32>
    %44 = vector.shape_cast %43 : vector<1x64xf32> to vector<64xf32>
    %cst_25 = arith.constant dense<0.000000e+00> : vector<8xf32>
    %45 = vector.multi_reduction <add>, %40, %cst_25 [1] : vector<8x64xf32> to vector<8xf32>
    %46 = vector.shape_cast %45 : vector<8xf32> to vector<8x1xf32>
    %cst_26 = arith.constant 6.400000e+01 : f32
    %47 = vector.broadcast %cst_26 : f32 to vector<8x1xf32>
    %48 = arith.divf %46, %47 : vector<8x1xf32>
    %49 = vector.broadcast %48 : vector<8x1xf32> to vector<8x64xf32>
    %50 = arith.subf %40, %49 : vector<8x64xf32>
    %51 = arith.mulf %50, %50 : vector<8x64xf32>
    %cst_27 = arith.constant dense<0.000000e+00> : vector<8xf32>
    %52 = vector.multi_reduction <add>, %51, %cst_27 [1] : vector<8x64xf32> to vector<8xf32>
    %53 = vector.shape_cast %52 : vector<8xf32> to vector<8x1xf32>
    %cst_28 = arith.constant 6.400000e+01 : f32
    %54 = vector.broadcast %cst_28 : f32 to vector<8x1xf32>
    %55 = arith.divf %53, %54 : vector<8x1xf32>
    %cst_29 = arith.constant 9.99999974E-6 : f32
    %56 = vector.broadcast %cst_29 : f32 to vector<8x1xf32>
    %57 = arith.addf %55, %56 : vector<8x1xf32>
    %58 = math.rsqrt %57 : vector<8x1xf32>
    %59 = vector.broadcast %58 : vector<8x1xf32> to vector<8x64xf32>
    %60 = arith.mulf %50, %59 : vector<8x64xf32>
    %61 = vector.shape_cast %42 : vector<64xf32> to vector<1x64xf32>
    %62 = vector.broadcast %61 : vector<1x64xf32> to vector<8x64xf32>
    %63 = arith.mulf %60, %62 : vector<8x64xf32>
    %64 = vector.shape_cast %44 : vector<64xf32> to vector<1x64xf32>
    %65 = vector.broadcast %64 : vector<1x64xf32> to vector<8x64xf32>
    %66 = arith.addf %63, %65 : vector<8x64xf32>
    %67 = arith.truncf %66 : vector<8x64xf32> to vector<8x64xbf16>
    %c0_30 = arith.constant 0 : index
    %c0_31 = arith.constant 0 : index
    %68 = vector.load %arg10[%c0_30, %c0_31] : memref<64x256xbf16, #tpu.memory_space<vmem>>, vector<64x256xbf16>
    %cst_32 = arith.constant dense<0.000000e+00> : vector<8x256xf32>
    %69 = tpu.matmul %67, %68, %cst_32 {dimension_numbers = #tpu.dot_dimension_numbers<[1], [0], [0], [1], [0, 0, 1, 1], [], []>} : vector<8x64xbf16>, vector<64x256xbf16>, vector<8x256xf32> -> vector<8x256xf32>
    %c0_33 = arith.constant 0 : index
    %c0_34 = arith.constant 0 : index
    %70 = vector.load %arg11[%c0_33, %c0_34] : memref<1x256xf32, #tpu.memory_space<vmem>>, vector<1x256xf32>
    %71 = vector.shape_cast %70 : vector<1x256xf32> to vector<256xf32>
    %72 = vector.shape_cast %71 : vector<256xf32> to vector<1x256xf32>
    %73 = vector.broadcast %72 : vector<1x256xf32> to vector<8x256xf32>
    %74 = arith.addf %69, %73 : vector<8x256xf32>
    %cst_35 = arith.constant 5.000000e-01 : f32
    %75 = vector.broadcast %cst_35 : f32 to vector<8x256xf32>
    %76 = arith.mulf %75, %74 : vector<8x256xf32>
    %cst_36 = arith.constant 0.707106769 : f32
    %77 = vector.broadcast %cst_36 : f32 to vector<8x256xf32>
    %78 = arith.mulf %74, %77 : vector<8x256xf32>
    %79 = math.erf %78 : vector<8x256xf32>
    %cst_37 = arith.constant 1.000000e+00 : f32
    %80 = vector.broadcast %cst_37 : f32 to vector<8x256xf32>
    %81 = arith.addf %80, %79 : vector<8x256xf32>
    %82 = arith.mulf %76, %81 : vector<8x256xf32>
    %83 = arith.truncf %82 : vector<8x256xf32> to vector<8x256xbf16>
    %c0_38 = arith.constant 0 : index
    %c0_39 = arith.constant 0 : index
    %84 = vector.load %arg12[%c0_38, %c0_39] : memref<256x64xbf16, #tpu.memory_space<vmem>>, vector<256x64xbf16>
    %cst_40 = arith.constant dense<0.000000e+00> : vector<8x64xf32>
    %85 = tpu.matmul %83, %84, %cst_40 {dimension_numbers = #tpu.dot_dimension_numbers<[1], [0], [0], [1], [0, 0, 1, 1], [], []>} : vector<8x256xbf16>, vector<256x64xbf16>, vector<8x64xf32> -> vector<8x64xf32>
    %c0_41 = arith.constant 0 : index
    %c0_42 = arith.constant 0 : index
    %86 = vector.load %arg13[%c0_41, %c0_42] : memref<1x64xf32, #tpu.memory_space<vmem>>, vector<1x64xf32>
    %87 = vector.shape_cast %86 : vector<1x64xf32> to vector<64xf32>
    %88 = vector.shape_cast %87 : vector<64xf32> to vector<1x64xf32>
    %89 = vector.broadcast %88 : vector<1x64xf32> to vector<8x64xf32>
    %90 = arith.addf %85, %89 : vector<8x64xf32>
    %91 = arith.addf %40, %90 : vector<8x64xf32>
    %c0_43 = arith.constant 0 : index
    %c0_44 = arith.constant 0 : index
    %c0_45 = arith.constant 0 : index
    %92 = vector.load %arg14[%c0_43, %c0_44, %c0_45] : memref<1x8x64xf32, #tpu.memory_space<vmem>>, vector<1x8x64xf32>
    %93 = vector.shape_cast %92 : vector<1x8x64xf32> to vector<8x64xf32>
    %94 = vector.shape_cast %91 : vector<8x64xf32> to vector<1x8x64xf32>
    tpu.vector_store %arg14[%c0_43, %c0_44, %c0_45], %94 {strides = array<i32>} : memref<1x8x64xf32, #tpu.memory_space<vmem>>, vector<1x8x64xf32>,
    return
  }
  func.func @transform_0(%arg0: i32, %arg1: i32) -> (i32, i32, i32) {
    %c0_i32 = arith.constant 0 : i32
    %c0_i32_0 = arith.constant 0 : i32
    %c0_i32_1 = arith.constant 0 : i32
    return %arg0, %c0_i32, %c0_i32_0 : i32, i32, i32
  }
  func.func @transform_1(%arg0: i32, %arg1: i32) -> (i32, i32) {
    %c0_i32 = arith.constant 0 : i32
    %c0_i32_0 = arith.constant 0 : i32
    %c0_i32_1 = arith.constant 0 : i32
    return %c0_i32, %c0_i32_0 : i32, i32
  }
  func.func @transform_2(%arg0: i32, %arg1: i32) -> (i32, i32) {
    %c0_i32 = arith.constant 0 : i32
    %c0_i32_0 = arith.constant 0 : i32
    %c0_i32_1 = arith.constant 0 : i32
    return %c0_i32, %c0_i32_0 : i32, i32
  }
  func.func @transform_3(%arg0: i32, %arg1: i32) -> (i32, i32) {
    %c0_i32 = arith.constant 0 : i32
    %c0_i32_0 = arith.constant 0 : i32
    %c0_i32_1 = arith.constant 0 : i32
    return %c0_i32, %c0_i32_0 : i32, i32
  }
  func.func @transform_4(%arg0: i32, %arg1: i32) -> (i32, i32) {
    %c0_i32 = arith.constant 0 : i32
    %c0_i32_0 = arith.constant 0 : i32
    %c0_i32_1 = arith.constant 0 : i32
    return %c0_i32, %c0_i32_0 : i32, i32
  }
  func.func @transform_5(%arg0: i32, %arg1: i32) -> (i32, i32) {
    %c0_i32 = arith.constant 0 : i32
    %c0_i32_0 = arith.constant 0 : i32
    %c0_i32_1 = arith.constant 0 : i32
    return %c0_i32, %c0_i32_0 : i32, i32
  }
  func.func @transform_6(%arg0: i32, %arg1: i32) -> (i32, i32) {
    %c0_i32 = arith.constant 0 : i32
    %c0_i32_0 = arith.constant 0 : i32
    %c0_i32_1 = arith.constant 0 : i32
    return %c0_i32, %c0_i32_0 : i32, i32
  }
  func.func @transform_7(%arg0: i32, %arg1: i32) -> (i32, i32) {
    %c0_i32 = arith.constant 0 : i32
    %c0_i32_0 = arith.constant 0 : i32
    %c0_i32_1 = arith.constant 0 : i32
    return %c0_i32, %c0_i32_0 : i32, i32
  }
  func.func @transform_8(%arg0: i32, %arg1: i32) -> (i32, i32) {
    %c0_i32 = arith.constant 0 : i32
    %c0_i32_0 = arith.constant 0 : i32
    %c0_i32_1 = arith.constant 0 : i32
    return %c0_i32, %c0_i32_0 : i32, i32
  }
  func.func @transform_9(%arg0: i32, %arg1: i32) -> (i32, i32) {
    %c0_i32 = arith.constant 0 : i32
    %c0_i32_0 = arith.constant 0 : i32
    %c0_i32_1 = arith.constant 0 : i32
    return %c0_i32, %c0_i32_0 : i32, i32
  }
  func.func @transform_10(%arg0: i32, %arg1: i32) -> (i32, i32) {
    %c0_i32 = arith.constant 0 : i32
    %c0_i32_0 = arith.constant 0 : i32
    %c0_i32_1 = arith.constant 0 : i32
    return %c0_i32, %c0_i32_0 : i32, i32
  }
  func.func @transform_11(%arg0: i32, %arg1: i32) -> (i32, i32) {
    %c0_i32 = arith.constant 0 : i32
    %c0_i32_0 = arith.constant 0 : i32
    %c0_i32_1 = arith.constant 0 : i32
    return %c0_i32, %c0_i32_0 : i32, i32
  }
  func.func @transform_12(%arg0: i32, %arg1: i32) -> (i32, i32, i32) {
    %c0_i32 = arith.constant 0 : i32
    %c0_i32_0 = arith.constant 0 : i32
    return %arg0, %arg1, %c0_i32 : i32, i32, i32
  }
}

</mosaic_0001>

<bundles_post_ra>
// kernel: tpu_custom_call.1
= control target key start
LH: loop header
LB: loop body
LE: loop exit
PB: predicated region body
PF: predicated region fallthrough
CT: control target
= control target key end

     0   :  { %s4428_s0 = inlined_call_operand.vmem [shape: f32[2,8,64], index: 0, kind: input, shape index: {}]   ;;  %s4429_s1 = inlined_call_operand.vmem [shape: f32[1,64], index: 1, kind: input, shape index: {}]   ;;  %s4430_s2 = inlined_call_operand.vmem [shape: f32[1,64], index: 2, kind: input, shape index: {}]   ;;  %s4431_s3 = inlined_call_operand.vmem [shape: bf16[64,192], index: 3, kind: input, shape index: {}]   ;;  %s4432_s4 = inlined_call_operand.vmem [shape: bf16[64,64], index: 4, kind: input, shape index: {}]   ;;  %s4433_s5 = inlined_call_operand.vmem [shape: f32[1,64], index: 5, kind: input, shape index: {}]   ;;  %s4434_s6 = inlined_call_operand.vmem [shape: f32[1,64], index: 6, kind: input, shape index: {}]   ;;  %s4435_s7 = inlined_call_operand.vmem [shape: f32[1,64], index: 7, kind: input, shape index: {}]   ;;  %s4436_s8 = inlined_call_operand.vmem [shape: bf16[64,256], index: 8, kind: input, shape index: {}]   ;;  %s4437_s9 = inlined_call_operand.vmem [shape: f32[1,256], index: 9, kind: input, shape index: {}]   ;;  %s4438_s10 = inlined_call_operand.vmem [shape: bf16[256,64], index: 10, kind: input, shape index: {}]   ;;  %s4439_s11 = inlined_call_operand.vmem [shape: f32[1,64], index: 11, kind: input, shape index: {}]   ;;  %s4440_s12 = inlined_call_operand.hbm [shape: f32[2,8,64], index: 12, kind: output, shape index: {}]  }
   0x1   :  { %4443 = sst [smem:[#allocation10_spill]] %s4428_s0 }
   0x2   :  { %17 = vsyncpa [#allocation6], 0 }
   0x3   :  { %19 = vsyncpa [#allocation6 + $0x1], 0  ;;  %s3872_s21 = smov 0   ;;  %s3874_s22 = smov 0  }
   0x4   :  { %s3876_s23 = smov 0   ;;  %s3878_s24 = smov 0  }
   0x5   :  { %s3880_s25 = smov 0   ;;  %s3882_s26 = smov 0  }
   0x6 LB: > { %4444 = sst [smem:[#allocation8_spill]] %s3780_s25  ;;  %s3258_s27 = sadd.s32 4294967295, %s3784_s26   ;;  %s3784_s26 = sphi %s3882_s26, %s25_s26   ;;  %s3780_s25 = sphi %s3880_s25, %s4450_s25   ;;  %s3776_s24 = sphi %s3878_s24, %s4449_s24   ;;  %s3772_s23 = sphi %s3876_s23, %s4453_s23   ;;  %s3768_s22 = sphi %s3874_s22, %s4452_s22   ;;  %s3764_s21 = sphi %s3872_s21, %s4451_s21  }
   0x7   : > { %s3259_s28 = sadd.s32 4294967294, %s3784_s26   ;;  %s37_s29 = sadd.s32 1, %s3780_s25 }
   0x8   : > { %s303_s30 = sadd.s32 1, %s3772_s23  ;;  %p39_p0 = scmp.ge.s32.totalorder %s37_s29, 2 }
   0x9   : > { %p313_p1 = scmp.ne.s32.totalorder %s3772_s23, %s3768_s22  ;;  %p314_p2 = scmp.eq.s32.totalorder %s3258_s27, 1 }
   0xa   : > { %p319_p3 = scmp.ne.s32.totalorder %s3768_s22, %s3764_s21  ;;  %s4455_s29 = smov (%p39_p0, %s37_s29), 0 }
   0xb   : > { %4445 = sst [smem:[#allocation9_spill]] %s4455_s29  ;;  %p3912_p4 = por %p314_p2, %p313_p1 }
   0xc   : > { %p320_p5 = scmp.eq.s32.totalorder %s3259_s28, 1  ;;  %s298_s14 = ssub.s32 %s3780_s25, %s4455_s29 }
   0xd   : > { %p3262_p6 = scmp.ge.s32.totalorder %s3784_s26, 1  ;;  %p301_p7 = scmp.eq.s32.totalorder %s298_s14, 0 }
   0xe   : > { %p3919_p8 = por %p320_p5, %p319_p3  ;;  %p378_p9 = scmp.lt.s32.totalorder %s3784_s26, 3 }
   0xf   : > { %s3925_s16 = scalar_select %p301_p7, %s3772_s23, %s303_s30  }
  0x10   : > { %p379_p10 = pnand %p3262_p6, %p378_p9 }
  0x11   : > { %p419_p11 = scmp.lt.s32.totalorder (!%p379_p10), %s3776_s24, 1  ;;  %vm431_vm0 = vcmask (!%p379_p10), 523264   ;;  %s4448_s0 = sld [smem:[#allocation10_spill]] (!%p379_p10)  ;;  %v3617_v2 = vld [vmem:[%s4431_s3] ss:$8 sps:$4 sm:$0xff] (!%p379_p10)   ;;  %v3787_v8 = vmov (!%p379_p10), 0.0   ;;  %v686_v60 = vlaneseq (!%p379_p10) }
  0x12   : > { %382 = sbr.rel (%p379_p10) target bundleno = 2945 (0xb81), region = 68  ;;  %v3619_v3 = vld [vmem:[%s4431_s3 + $0x4] ss:$8 sps:$4 sm:$0xff] (!%p379_p10)   ;;  %s3786_s25 = smov (!%p379_p10), 64   ;;  %v3620_v4 = vld [vmem:[%s4431_s3 + $0x14] ss:$8 sps:$4 sm:$0xff] (!%p379_p10)   ;;  %3410 = vmatprep.subr.bf16.mxu1 (!%p379_p10), %v3787_v8  ;;  %3434 = vmatprep.subr.bf16.mxu0 (!%p379_p10), %v3787_v8 }
  0x13   : > { %503 = vrot.lane.b32.xlu1 (!%p379_p10), %v3617_v2, %s3786_s25  ;;  %v3622_v5 = vld [vmem:[%s4431_s3 + $0x20] ss:$8 sps:$4 sm:$0xff] (!%p379_p10)   ;;  %v3625_v6 = vld [vmem:[%s4431_s3 + $0x24] ss:$8 sps:$4 sm:$0xff] (!%p379_p10)   ;;  %v3626_v7 = vld [vmem:[%s4431_s3 + $0x30] ss:$8 sps:$4 sm:$0xff] (!%p379_p10)  }
  0x14   : > { %v3628_v9 = vld [vmem:[%s4431_s3 + $0x34] ss:$8 sps:$4 sm:$0xff] (!%p379_p10)   ;;  %v3624_v18 = vld [vmem:[%s4431_s3 + $0x10] ss:$8 sps:$4 sm:$0xff] (!%p379_p10)   ;;  %vm3788_vm1 = vmmov (!%p379_p10), 0   ;;  %vm461_vm2 = vcmask (!%p379_p10), 519168  }
  0x15   : > { %3418 = vmatprep.mubr.msk.bf16.mxu1 (!%p379_p10), %vm3788_vm1, %v3787_v8  ;;  %3436 = vmatprep.mubr.msk.bf16.mxu0 (!%p379_p10), %vm3788_vm1, %v3787_v8  ;;  %v3265_v32 = vld [vmem:[%s4429_s1] ss:$0 sm:$0xff] (!%p379_p10)  ;;  %v3630_v39 = vld [vmem:[%s4431_s3 + $0x10] ss:$8 sps:$4 sm:$0xff] (!%p379_p10)   ;;  %s3791_s19 = smov (!%p379_p10), 96   ;;  %s3792_s20 = smov (!%p379_p10), 104  }
  0x16   : > { %v3266_v34 = vld [vmem:[%s4430_s2] ss:$0 sm:$0xff] (!%p379_p10)  ;;  %v3632_v41 = vld [vmem:[%s4431_s3 + $0x30] ss:$8 sps:$4 sm:$0xff] (!%p379_p10)   ;;  %s3793_s28 = smov (!%p379_p10), 88   ;;  %s3794_s29 = smov (!%p379_p10), 80  }
  0x17   : > { %505 = vrot.lane.b32.xlu1 (!%p379_p10), %v3619_v3, %s3786_s25  ;;  %v3629_v37 = vld [vmem:[%s4431_s3] ss:$8 sps:$4 sm:$0xff] (!%p379_p10)   ;;  %s3795_s30 = smov (!%p379_p10), 72   ;;  %v3796_v58 = vmov (!%p379_p10), 1983009808   ;;  %vm1095_vm3 = vcmask (!%p379_p10), 1043456  }
  0x18   : > { %v3631_v40 = vld [vmem:[%s4431_s3 + $0x20] ss:$8 sps:$4 sm:$0xff] (!%p379_p10)   ;;  %v684_v59 = vunpack.c.l.s4 (!%p379_p10), %v3796_v58  ;;  %vm1091_vm4 = vcmask (!%p379_p10), 64512   ;;  %vm2479_vm5 = vcmask (!%p379_p10), 1041409   ;;  %vm2481_vm6 = vcmask (!%p379_p10), 1042434  }
  0x19   : > { %s420_s17 = scalar_select %p419_p11, %s3776_s24, 1  ;;  %vm2483_vm7 = vcmask 1043459   ;;  %vm2485_vm8 = vcmask 1044484   ;;  %vm2487_vm9 = vcmask 1045509   ;;  %vm2489_vm10 = vcmask 1046534  }
  0x1a   : > { %v685_v63 = vunpack.c.0.s8 %v684_v59  ;;  %vm2491_vm11 = vcmask 1047559   ;;  %vm2755_vm12 = vcmask 130048   ;;  %vm2757_vm13 = vcmask 195584  }
  0x1b   : > { %s3264_s18 = sshll.u32 %s420_s17, 3  ;;  %509 = vrot.lane.b32.xlu1 %v3620_v4, %s3786_s25  ;;  %s3789_s17 = smov 112   ;;  %vm2759_vm14 = vcmask 261120   ;;  %vm2761_vm15 = vcmask 326656  }
  0x1c   : > { %s3932_s27 = scalar_lea.vmem %s4448_s0, %s3264_s18  ;;  %s3790_s18 = smov 120  }
  0x1d   : > { %v428_v0 = vld [vmem:[%s3932_s27] sm:$0xff] }
  0x1e   : > { %v432_v1 = vsel %vm431_vm0, %v428_v0, 0.0 }
  0x1f   : > { %433 = vadd.xlane.f32.xlu0 %v432_v1  ;;  %511 = vrot.lane.b32.xlu1 %v3622_v5, %s3786_s25  ;;  %v3797_v5 = vmov 1934713408  }
  0x23   : > { %513 = vrot.lane.b32.xlu1 %v3625_v6, %s3786_s25  ;;  %v748_v6 = vunpack.c.l.s4 %v3797_v5 }
  0x27   : > { %515 = vrot.lane.b32.xlu1 %v3626_v7, %s3786_s25 }
  0x2b   : > { %517 = vrot.lane.b32.xlu1 %v3628_v9, %s3786_s25 }
  0x85   : > { %v504_v10 = vpop.permute.xlu1 %503 }
  0x89   : > { %v506_v12 = vpop.permute.xlu1 %505 }
  0x8a   : > { %v520_v14 = vsel %vm431_vm0, %v504_v10, %v506_v12 }
  0x8b   : > { %3411 = vmatpush3.bf16.msra.mxu1 %v520_v14  ;;  %v749_v14 = vunpack.c.0.s8 %v748_v6 }
  0x8c   : > { %3412 = vmatprep.subr.bf16.mxu1 %v3787_v8 }
  0x8d   : > { %v510_v19 = vpop.permute.xlu1 %509 }
  0x91   : > { %v512_v20 = vpop.permute.xlu1 %511 }
  0x95   : > { %v514_v21 = vpop.permute.xlu1 %513 }
  0x96   : > { %v522_v28 = vsel %vm431_vm0, %v512_v20, %v514_v21 }
  0x99   : > { %v516_v24 = vpop.permute.xlu1 %515 }
  0x9d   : > { %v518_v29 = vpop.permute.xlu1 %517 }
  0x9e   : > { %v523_v30 = vsel %vm431_vm0, %v516_v24, %v518_v29 }
  0xac   : > { %v434_v11 = vpop.xlane.xlu0 %433 }
  0xad   : > { %v436_v13 = vmul.f32 0.015625, %v434_v11 }
  0xaf   : > { %v437_v15 = vsub.f32 %v428_v0, %v436_v13  ;;  %v4031_v0 = vshrl.u32 %v686_v60, 7 }
  0xb1   : > { %v438_v16 = vmul.f32 %v437_v15, %v437_v15  ;;  %v4034_v3 = vsub.s32 %v685_v63, %v4031_v0  ;;  %v4041_v24 = vsub.s32 %v749_v14, %v4031_v0 }
  0xb3   : > { %v439_v17 = vsel %vm431_vm0, %v438_v16, 0.0 }
  0xb4   : > { %440 = vadd.xlane.f32.xlu0 %v439_v17 }
  0xca   : > { %507 = vrot.lane.b32.xlu0 %v3624_v18, %s3786_s25 }
 0x141   : > { %v441_v22 = vpop.xlane.xlu0 %440 }
 0x142   : > { %v442_v23 = vmul.f32 0.015625, %v441_v22 }
 0x144   : > { %v443_v25 = vadd.f32 1e-05, %v442_v23 }
 0x145   : > { %v508_v26 = vpop.permute.xlu0 %507 }
 0x146   : > { %3665 = vrsqrt.f32 %v443_v25  ;;  %v521_v27 = vsel %vm431_vm0, %v508_v26, %v510_v19 }
 0x147   : > { %3413 = vmatpush3.bf16.msra.mxu1 %v521_v27 }
 0x148   : > { %3414 = vmatprep.subr.bf16.mxu1 %v3787_v8 }
 0x14b   : > { %3415 = vmatpush3.bf16.msra.mxu1 %v522_v28 }
 0x14c   : > { %3416 = vmatprep.subr.bf16.mxu1 %v3787_v8 }
 0x14f   : > { %3417 = vmatpush3.bf16.msra.mxu1 %v523_v30 }
 0x150   : > { %v3666_v31 = vpop.eup %3665  ;;  %3422 = vmatprep.subr.bf16.mxu1 %v3787_v8 }
 0x151   : > { %v445_v33 = vmul.f32 %v3666_v31, %v437_v15 }
 0x153   : > { %v452_v35 = vmul.f32 %v3265_v32, %v445_v33 }
 0x155   : > { %v459_v36 = vadd.f32 %v3266_v34, %v452_v35 }
 0x157   : > { %v460_v38 = vpack.c.bf16 %v459_v36, %v459_v36 }
 0x159   : > { %462 = vst.msk [vmem:[#allocation2] sm:$0xf] %vm461_vm2, %v460_v38  ;;  %3419 = vmatmul.mubr.msk.bf16.vlgmr.msra.gmra.mrb[0].mxu1 %vm431_vm0, %v460_v38 }
 0x15a   : > { %3423 = vmatpush3.bf16.msra.mxu1 %v3629_v37  ;;  %3430 = vmatprep.mubr.msk.bf16.mxu1 %vm3788_vm1, %v3787_v8 }
 0x15b   : > { %3424 = vmatprep.subr.bf16.mxu1 %v3787_v8 }
 0x15e   : > { %3425 = vmatpush3.bf16.msra.mxu1 %v3630_v39 }
 0x15f   : > { %3426 = vmatprep.subr.bf16.mxu1 %v3787_v8 }
 0x160   : > { %v581_v42 = vld [vmem:[#allocation2] sm:$0xf] }
 0x162   : > { %3427 = vmatpush3.bf16.msra.mxu1 %v3631_v40 }
 0x163   : > { %3428 = vmatprep.subr.bf16.mxu1 %v3787_v8 }
 0x166   : > { %3429 = vmatpush3.bf16.msra.mxu1 %v3632_v41 }
 0x167   : > { %3440 = vmatprep.subr.bf16.mxu1 %v3787_v8 }
 0x169   : > { %3431 = vmatmul.mubr.msk.bf16.vlgmr.msra.gmra.mrb[4].mxu1 %vm431_vm0, %v581_v42 }
 0x16a   : > { %3442 = vmatprep.mubr.msk.bf16.mxu1 %vm3788_vm1, %v3787_v8 }
 0x22c   : > { %v565_v43 = vpop.f32.mrb[0].mxu1 }
 0x22d   : > { %v4012_v44 = vpack.c.bf16 %v565_v43, %v565_v43  ;;  %v3420_v45 = vpop.f32.mrb[1].mxu1 }
 0x22e   : > { %v568_v46 = vpop.f32.mrb[2].mxu1 }
 0x22f   : > { %572 = vst.msk [vmem:[#allocation3] sm:$0xf] %vm461_vm2, %v4012_v44  ;;  %v3421_v47 = vpop.f32.mrb[3].mxu1 }
 0x236   : > { %v825_v48 = vld [vmem:[#allocation3] sm:$0xf] }
 0x237   : > { %830 = vrot.lane.b32.xlu0 %v825_v48, %s3789_s17  ;;  %827 = vrot.lane.b32.xlu1 %v825_v48, %s3790_s18 }
 0x23b   : > { %836 = vrot.lane.b32.xlu0 %v825_v48, %s3791_s19  ;;  %833 = vrot.lane.b32.xlu1 %v825_v48, %s3792_s20 }
 0x23c   : > { %v652_v49 = vpop.f32.mrb[4].mxu1 }
 0x23d   : > { %v658_v50 = vmul.f32 0.35355338, %v652_v49  ;;  %v3432_v51 = vpop.f32.mrb[5].mxu1 }
 0x23e   : > { %v655_v52 = vpop.f32.mrb[6].mxu1 }
 0x23f   : > { %v3433_v53 = vpop.f32.mrb[7].mxu1  ;;  %839 = vrot.lane.b32.xlu1 %v825_v48, %s3793_s28  ;;  %660 = vrot.lane.b32.xlu0 %v658_v50, %s3790_s18 }
 0x243   : > { %663 = vrot.lane.b32.xlu1 %v658_v50, %s3789_s17  ;;  %666 = vrot.lane.b32.xlu0 %v658_v50, %s3792_s20 }
 0x247   : > { %669 = vrot.lane.b32.xlu1 %v658_v50, %s3791_s19  ;;  %672 = vrot.lane.b32.xlu0 %v658_v50, %s3793_s28 }
 0x24b   : > { %675 = vrot.lane.b32.xlu1 %v658_v50, %s3794_s29  ;;  %678 = vrot.lane.b32.xlu0 %v658_v50, %s3795_s30 }
 0x24f   : > { %842 = vrot.lane.b32.xlu1 %v825_v48, %s3794_s29  ;;  %845 = vrot.lane.b32.xlu0 %v825_v48, %s3795_s30 }
 0x272   : > { %963 = vxpose.xlu1.c.b16.start.end [1/1] (short) (narrow) %v825_v48, 16 }
 0x2a9   : > { %v831_v54 = vpop.permute.xlu0 %830  ;;  %v828_v55 = vpop.permute.xlu1 %827 }
 0x2aa   : > { %979 = vxpose.xlu0.c.b16.start.end [1/1] (short) (narrow) %v828_v55, 16 }
 0x2ad   : > { %v837_v56 = vpop.permute.xlu0 %836  ;;  %v834_v57 = vpop.permute.xlu1 %833 }
 0x2ae   : > { %1011 = vxpose.xlu1.c.b16.start.end [1/1] (short) (narrow) %v834_v57, 16  ;;  %995 = vxpose.xlu0.c.b16.start.end [1/1] (short) (narrow) %v831_v54, 16 }
 0x2b1   : > { %v840_v61 = vpop.permute.xlu1 %839  ;;  %v661_v62 = vpop.permute.xlu0 %660 }
 0x2b2   : > { %1043 = vxpose.xlu1.c.b16.start.end [1/1] (short) (narrow) %v840_v61, 16  ;;  %1027 = vxpose.xlu0.c.b16.start.end [1/1] (short) (narrow) %v837_v56, 16 }
 0x2b5   : > { %v664_v1 = vpop.permute.xlu1 %663  ;;  %v667_v2 = vpop.permute.xlu0 %666 }
 0x2b6   : > { %v681_v4 = vcombine.low %v658_v50, %v664_v1  ;;  %v697_v7 = vcombine.low %v661_v62, %v667_v2  ;;  %v682_v9 = vcombine.high %v658_v50, %v664_v1  ;;  %v698_v10 = vcombine.high %v661_v62, %v667_v2 }
 0x2b8   : > { %v689_v13 = vrot.slane %v681_v4, %v4034_v3  ;;  %v705_v15 = vrot.slane %v697_v7, %v4034_v3  ;;  %v696_v16 = vrot.slane %v682_v9, %v4034_v3  ;;  %v712_v17 = vrot.slane %v698_v10, %v4034_v3 }
 0x2b9   : > { %v670_v11 = vpop.permute.xlu1 %669  ;;  %v673_v12 = vpop.permute.xlu0 %672 }
 0x2ba   : > { %v745_v25 = vcombine.low %v689_v13, %v705_v15  ;;  %v746_v26 = vcombine.high %v689_v13, %v705_v15  ;;  %v761_v31 = vcombine.low %v696_v16, %v712_v17  ;;  %v762_v32 = vcombine.high %v696_v16, %v712_v17 }
 0x2bb   : > { %v3798_v13 = vmov 0  }
 0x2bc   : > { %v753_v39 = vrot.slane %v745_v25, %v4041_v24  ;;  %v760_v40 = vrot.slane %v746_v26, %v4041_v24  ;;  %v769_v46 = vrot.slane %v761_v31, %v4041_v24  ;;  %v776_v47 = vrot.slane %v762_v32, %v4041_v24 }
 0x2bd   : > { %v676_v18 = vpop.permute.xlu1 %675  ;;  %v679_v19 = vpop.permute.xlu0 %678 }
 0x2be   : > { %v713_v20 = vcombine.low %v670_v11, %v676_v18  ;;  %v714_v21 = vcombine.high %v670_v11, %v676_v18  ;;  %v729_v22 = vcombine.low %v673_v12, %v679_v19  ;;  %v730_v23 = vcombine.high %v673_v12, %v679_v19 }
 0x2c0   : > { %v721_v27 = vrot.slane %v713_v20, %v4034_v3  ;;  %v728_v28 = vrot.slane %v714_v21, %v4034_v3  ;;  %v737_v29 = vrot.slane %v729_v22, %v4034_v3  ;;  %v744_v30 = vrot.slane %v730_v23, %v4034_v3 }
 0x2c1   : > { %v843_v33 = vpop.permute.xlu1 %842  ;;  %v846_v34 = vpop.permute.xlu0 %845 }
 0x2c2   : > { %v777_v35 = vcombine.low %v721_v27, %v737_v29  ;;  %v778_v36 = vcombine.high %v721_v27, %v737_v29  ;;  %v793_v37 = vcombine.low %v728_v28, %v744_v30  ;;  %v794_v38 = vcombine.high %v728_v28, %v744_v30  ;;  %1059 = vxpose.xlu0.c.b16.start.end [1/1] (short) (narrow) %v843_v33, 16 }
 0x2c3   : > { %1075 = vxpose.xlu1.c.b16.start.end [1/1] (short) (narrow) %v846_v34, 16 }
 0x2c4   : > { %v785_v41 = vrot.slane %v777_v35, %v4041_v24  ;;  %v792_v42 = vrot.slane %v778_v36, %v4041_v24  ;;  %v801_v43 = vrot.slane %v793_v37, %v4041_v24  ;;  %v808_v45 = vrot.slane %v794_v38, %v4041_v24 }
 0x2c6   : > { %v809_v48 = vcombine.low %v753_v39, %v785_v41  ;;  %v810_v49 = vcombine.high %v753_v39, %v785_v41  ;;  %v811_v50 = vcombine.low %v760_v40, %v792_v42  ;;  %v812_v51 = vcombine.high %v760_v40, %v792_v42 }
 0x2c7   : > { %v813_v52 = vcombine.low %v769_v46, %v801_v43  ;;  %v814_v53 = vcombine.high %v769_v46, %v801_v43  ;;  %v815_v54 = vcombine.low %v776_v47, %v808_v45  ;;  %v816_v55 = vcombine.high %v776_v47, %v808_v45 }
 0x2c9   : > { %v3282_v56 = vpack.c.bf16 %v813_v52, %v809_v48  ;;  %v3283_v57 = vpack.c.bf16 %v815_v54, %v811_v50  ;;  %v3284_v58 = vpack.c.bf16 %v814_v53, %v810_v49  ;;  %v3285_v59 = vpack.c.bf16 %v816_v55, %v812_v51 }
 0x2cb   : > { %v878_v61 = vrot.slane %v3282_v56, %v4034_v3  ;;  %v886_v62 = vrot.slane %v3283_v57, %v4034_v3  ;;  %v912_v63 = vrot.slane %v3284_v58, %v4034_v3  ;;  %v920_v1 = vrot.slane %v3285_v59, %v4034_v3  ;;  %576 = vrot.lane.b32.xlu0 %v4012_v44, %s3786_s25  ;;  %s3802_s25 = smov 24  }
 0x2cd   : > { %v888_v2 = vcombine.high %v878_v61, %v886_v62  ;;  %v922_v4 = vcombine.high %v912_v63, %v920_v1  ;;  %v887_v11 = vcombine.low %v878_v61, %v886_v62  ;;  %v921_v12 = vcombine.low %v912_v63, %v920_v1 }
 0x2cf   : > { %v902_v5 = vrot.slane %v888_v2, %v4041_v24  ;;  %v936_v6 = vrot.slane %v922_v4, %v4041_v24  ;;  %v895_v19 = vrot.slane %v887_v11, %v4041_v24  ;;  %v929_v20 = vrot.slane %v921_v12, %v4041_v24 }
 0x2d1   : > { %v953_v7 = vpack.i.b16 %v936_v6, %v902_v5  ;;  %v954_v9 = vshrl.u32 %v902_v5, 16  ;;  %v955_v10 = vshrl.u32 %v936_v6, 16  ;;  %v4064_v14 = vcombine.high %v902_v5, %v3798_v13 }
 0x2d2   : > { %v4067_v15 = vcombine.high %v936_v6, %v3798_v13  ;;  %v941_v25 = vpack.i.b16 %v929_v20, %v895_v19  ;;  %v942_v26 = vshrl.u32 %v895_v19, 16  ;;  %v943_v27 = vshrl.u32 %v929_v20, 16 }
 0x2d3   : > { %v956_v16 = vpack.i.b16 %v955_v10, %v954_v9  ;;  %v960_v17 = vshrl.u32 %v4064_v14, 16  ;;  %v903_v31 = vcombine.high %v895_v19, %v3798_v13  ;;  %v937_v32 = vcombine.high %v929_v20, %v3798_v13 }
 0x2d4   : > { %v959_v44 = vpack.i.b16 %v4067_v15, %v4064_v14  ;;  %v961_v18 = vshrl.u32 %v4067_v15, 16  ;;  %v944_v30 = vpack.i.b16 %v943_v27, %v942_v26 }
 0x2d5   : > { %v947_v37 = vpack.i.b16 %v937_v32, %v903_v31  ;;  %v948_v38 = vshrl.u32 %v903_v31, 16  ;;  %v949_v39 = vshrl.u32 %v937_v32, 16 }
 0x2d6   : > { %v962_v21 = vpack.i.b16 %v961_v18, %v960_v17 }
 0x2d7   : > { %v950_v43 = vpack.i.b16 %v949_v39, %v948_v38 }
 0x2d8   : > { %v971_v22 = vpop.trf.xlu1 }
 0x2d9   : > { %v1097_v23 = vsel %vm1095_vm3, %v971_v22, 0 }
 0x2da   : > { %3435 = vmatpush3.bf16.msra.mxu0 %v1097_v23 }
 0x2db   : > { %3446 = vmatprep.subr.bf16.mxu0 %v3787_v8 }
 0x2dd   : > { %3437 = vmatmul.mubr.msk.bf16.vlgmr.msra.gmra.mrb[0].mxu0 %vm1091_vm4, %v941_v25 }
 0x2de   : > { %3448 = vmatprep.mubr.msk.bf16.mxu0 %vm3788_vm1, %v3787_v8 }
 0x310   : > { %v987_v28 = vpop.trf.xlu0 }
 0x311   : > { %v1143_v29 = vsel %vm1095_vm3, %v987_v28, 0 }
 0x312   : > { %3441 = vmatpush3.bf16.msra.mxu1 %v1143_v29 }
 0x313   : > { %3452 = vmatprep.subr.bf16.mxu1 %v3787_v8 }
 0x314   : > { %v1003_v33 = vpop.trf.xlu0  ;;  %v1019_v34 = vpop.trf.xlu1 }
 0x315   : > { %v1189_v35 = vsel %vm1095_vm3, %v1003_v33, 0  ;;  %3443 = vmatmul.mubr.msk.bf16.vlgmr.msra.gmra.mrb[8].mxu1 %vm1091_vm4, %v944_v30  ;;  %v1235_v36 = vsel %vm1095_vm3, %v1019_v34, 0 }
 0x316   : > { %3447 = vmatpush3.bf16.msra.mxu0 %v1189_v35  ;;  %3453 = vmatpush3.bf16.msra.mxu1 %v1235_v36 }
 0x317   : > { %3454 = vmatprep.mubr.msk.bf16.mxu1 %vm3788_vm1, %v3787_v8  ;;  %3458 = vmatprep.subr.bf16.mxu0 %v3787_v8 }
 0x318   : > { %v1035_v40 = vpop.trf.xlu0  ;;  %v1051_v41 = vpop.trf.xlu1  ;;  %3464 = vmatprep.subr.bf16.mxu1 %v3787_v8 }
 0x319   : > { %3449 = vmatmul.mubr.msk.bf16.vlgmr.msra.gmra.mrb[4].mxu0 %vm1091_vm4, %v947_v37  ;;  %v1281_v42 = vsel %vm1095_vm3, %v1035_v40, 0  ;;  %v1327_v45 = vsel %vm1095_vm3, %v1051_v41, 0 }
 0x31a   : > { %3459 = vmatpush3.bf16.msra.mxu0 %v1281_v42  ;;  %3460 = vmatprep.mubr.msk.bf16.mxu0 %vm3788_vm1, %v3787_v8 }
 0x31b   : > { %3470 = vmatprep.subr.bf16.mxu0 %v3787_v8 }
 0x31d   : > { %3455 = vmatmul.mubr.msk.bf16.vlgmr.msra.gmra.mrb[12].mxu1 %vm1091_vm4, %v950_v43 }
 0x31e   : > { %3465 = vmatpush3.bf16.msra.mxu1 %v1327_v45  ;;  %3466 = vmatprep.mubr.msk.bf16.mxu1 %vm3788_vm1, %v3787_v8 }
 0x31f   : > { %3476 = vmatprep.subr.bf16.mxu1 %v3787_v8 }
 0x321   : > { %3461 = vmatmul.mubr.msk.bf16.vlgmr.msra.gmra.mrb[8].mxu0 %vm1091_vm4, %v953_v7 }
 0x322   : > { %3472 = vmatprep.mubr.msk.bf16.mxu0 %vm3788_vm1, %v3787_v8 }
 0x325   : > { %3467 = vmatmul.mubr.msk.bf16.vlgmr.msra.gmra.mrb[16].mxu1 %vm1091_vm4, %v956_v16 }
 0x326   : > { %3478 = vmatprep.mubr.msk.bf16.mxu1 %vm3788_vm1, %v3787_v8 }
 0x328   : > { %v1067_v46 = vpop.trf.xlu0 }
 0x329   : > { %v1083_v47 = vpop.trf.xlu1  ;;  %v1373_v48 = vsel %vm1095_vm3, %v1067_v46, 0 }
 0x32a   : > { %v1419_v49 = vsel %vm1095_vm3, %v1083_v47, 0  ;;  %3471 = vmatpush3.bf16.msra.mxu0 %v1373_v48 }
 0x32b   : > { %3477 = vmatpush3.bf16.msra.mxu1 %v1419_v49  ;;  %3482 = vmatprep.subr.bf16.mxu0 %v3787_v8 }
 0x32c   : > { %3488 = vmatprep.subr.bf16.mxu1 %v3787_v8 }
 0x32d   : > { %3473 = vmatmul.mubr.msk.bf16.vlgmr.msra.gmra.mrb[12].mxu0 %vm1091_vm4, %v959_v44 }
 0x32e   : > { %3479 = vmatmul.mubr.msk.bf16.vlgmr.msra.gmra.mrb[20].mxu1 %vm1091_vm4, %v962_v21  ;;  %3484 = vmatprep.mubr.msk.bf16.mxu0 %vm3788_vm1, %v3787_v8 }
 0x32f   : > { %3490 = vmatprep.mubr.msk.bf16.mxu1 %vm3788_vm1, %v3787_v8 }
 0x33d   : > { %v577_v50 = vpop.permute.xlu0 %576 }
 0x33e   : > { %579 = vst.msk [vmem:[#allocation4] sm:$0xf] %vm461_vm2, %v577_v50  ;;  %vm2765_vm2 = vcmask 457728  }
 0x345   : > { %v4118_v51 = vld [vmem:[#allocation4] sm:$0xf] }
 0x346   : > { %853 = vrot.lane.b32.xlu0 %v4118_v51, %s3789_s17  ;;  %850 = vrot.lane.b32.xlu1 %v4118_v51, %s3790_s18  ;;  %s3803_s18 = smov 32   ;;  %s416_s17 = sand.u32 1, %s3768_s22  }
 0x34a   : > { %859 = vrot.lane.b32.xlu1 %v4118_v51, %s3791_s19  ;;  %s3804_s19 = smov 40  }
 0x3b0   : > { %v1133_v52 = vpop.f32.mrb[0].mxu0 }
 0x3b1   : > { %v3438_v53 = vpop.f32.mrb[1].mxu0  ;;  %v1461_v54 = vsel %vm1091_vm4, %v1133_v52, -inf }
 0x3b2   : > { %v1136_v55 = vpop.f32.mrb[2].mxu0  ;;  %1462 = vmax.xlane.f32.xlu1 %v1461_v54 }
 0x3b3   : > { %v3439_v56 = vpop.f32.mrb[3].mxu0 }
 0x3b8   : > { %v851_v31 = vpop.permute.xlu1 %850  ;;  %v854_v32 = vpop.permute.xlu0 %853 }
 0x3bc   : > { %v4144_v33 = vpop.permute.xlu1 %859 }
 0x3c3   : > { %862 = vrot.lane.b32.xlu1 %v4118_v51, %s3793_s28  ;;  %s3799_s28 = smov 16  }
 0x3e8   : > { %v1179_v57 = vpop.f32.mrb[8].mxu1 }
 0x3e9   : > { %v3444_v58 = vpop.f32.mrb[9].mxu1  ;;  %v1464_v59 = vsel %vm1091_vm4, %v1179_v57, -inf }
 0x3ea   : > { %1465 = vmax.xlane.f32.xlu0 %v1464_v59  ;;  %v1182_v61 = vpop.f32.mrb[10].mxu1 }
 0x3eb   : > { %v3445_v62 = vpop.f32.mrb[11].mxu1 }
 0x3ec   : > { %v1225_v63 = vpop.f32.mrb[4].mxu0 }
 0x3ed   : > { %v3450_v1 = vpop.f32.mrb[5].mxu0  ;;  %v1467_v2 = vsel %vm1091_vm4, %v1225_v63, -inf }
 0x3ee   : > { %v1228_v4 = vpop.f32.mrb[6].mxu0  ;;  %1468 = vmax.xlane.f32.xlu1 %v1467_v2 }
 0x3ef   : > { %v3451_v5 = vpop.f32.mrb[7].mxu0 }
 0x3f0   : > { %v1271_v6 = vpop.f32.mrb[12].mxu1 }
 0x3f1   : > { %v3456_v7 = vpop.f32.mrb[13].mxu1  ;;  %v1470_v9 = vsel %vm1091_vm4, %v1271_v6, -inf }
 0x3f2   : > { %1471 = vmax.xlane.f32.xlu0 %v1470_v9  ;;  %v1274_v10 = vpop.f32.mrb[14].mxu1 }
 0x3f3   : > { %v3457_v11 = vpop.f32.mrb[15].mxu1 }
 0x3f4   : > { %v1317_v12 = vpop.f32.mrb[8].mxu0 }
 0x3f5   : > { %v3462_v14 = vpop.f32.mrb[9].mxu0  ;;  %v1473_v15 = vsel %vm1091_vm4, %v1317_v12, -inf }
 0x3f6   : > { %v1320_v16 = vpop.f32.mrb[10].mxu0  ;;  %1474 = vmax.xlane.f32.xlu1 %v1473_v15 }
 0x3f7   : > { %v3463_v44 = vpop.f32.mrb[11].mxu0 }
 0x3f8   : > { %v4133_v17 = vpop.f32.mrb[16].mxu1 }
 0x3f9   : > { %v3468_v18 = vpop.f32.mrb[17].mxu1  ;;  %v1476_v37 = vsel %vm1091_vm4, %v4133_v17, -inf }
 0x3fa   : > { %v1366_v19 = vpop.f32.mrb[18].mxu1 }
 0x3fb   : > { %v3469_v20 = vpop.f32.mrb[19].mxu1 }
 0x400   : > { %v4135_v21 = vpop.f32.mrb[12].mxu0 }
 0x401   : > { %v4137_v22 = vpop.f32.mrb[20].mxu1  ;;  %v3474_v23 = vpop.f32.mrb[13].mxu0  ;;  %v1479_v25 = vsel %vm1091_vm4, %v4135_v21, -inf }
 0x402   : > { %v3480_v26 = vpop.f32.mrb[21].mxu1  ;;  %v1412_v27 = vpop.f32.mrb[14].mxu0  ;;  %1480 = vmax.xlane.f32.xlu1 %v1479_v25  ;;  %v1482_v54 = vsel %vm1091_vm4, %v4137_v22, -inf }
 0x403   : > { %v1458_v28 = vpop.f32.mrb[22].mxu1  ;;  %v3475_v29 = vpop.f32.mrb[15].mxu0 }
 0x404   : > { %v3481_v30 = vpop.f32.mrb[23].mxu1 }
 0x41f   : > { %1557 = vxpose.xlu0.c.b16.start.end [1/1] (short) (narrow) %v851_v31, 16 }
 0x423   : > { %1573 = vxpose.xlu0.c.b16.start.end [1/1] (short) (narrow) %v854_v32, 16 }
 0x42c   : > { %856 = vrot.lane.b32.xlu0 %v4118_v51, %s3792_s20  ;;  %s3805_s20 = smov 48  }
 0x42f   : > { %1541 = vxpose.xlu1.c.b16.start.end [1/1] (short) (narrow) %v4118_v51, 16 }
 0x43f   : > { %v1463_v34 = vpop.xlane.xlu1 %1462 }
 0x440   : > { %v1485_v35 = vsub.f32 %v1133_v52, %v1463_v34 }
 0x442   : > { %v1493_v36 = vmul.f32 1.442695, %v1485_v35 }
 0x443   : > { %v863_v41 = vpop.permute.xlu1 %862 }
 0x444   : > { %3667 = vpow2.f32 %v1493_v36 }
 0x44b   : > { %1477 = vmax.xlane.f32.xlu0 %v1476_v37 }
 0x44e   : > { %v4148_v38 = vpop.eup %3667 }
 0x44f   : > { %v1533_v39 = vpack.c.bf16 %v4148_v38, %v4148_v38 }
 0x451   : > { %v1673_v40 = vsel %vm1091_vm4, %v1533_v39, 0 }
 0x452   : > { %3483 = vmatpush3.bf16.xpose.msra.mxu0 %v1673_v40 }
 0x453   : > { %3494 = vmatprep.subr.bf16.mxu0 %v3787_v8 }
 0x461   : > { %865 = vrot.lane.b32.xlu0 %v4118_v51, %s3794_s29  ;;  %s3800_s29 = smov 8  }
 0x465   : > { %868 = vrot.lane.b32.xlu0 %v4118_v51, %s3795_s30  ;;  %s3801_s30 = smov 56  }
 0x477   : > { %v1466_v42 = vpop.xlane.xlu0 %1465 }
 0x478   : > { %v1486_v43 = vsub.f32 %v1179_v57, %v1466_v42 }
 0x47a   : > { %v1495_v45 = vmul.f32 1.442695, %v1486_v43 }
 0x47b   : > { %v1469_v46 = vpop.xlane.xlu1 %1468 }
 0x47c   : > { %3669 = vpow2.f32 %v1495_v45  ;;  %v1487_v47 = vsub.f32 %v1225_v63, %v1469_v46 }
 0x47e   : > { %v1497_v50 = vmul.f32 1.442695, %v1487_v47 }
 0x47f   : > { %v1472_v48 = vpop.xlane.xlu0 %1471 }
 0x480   : > { %v1488_v49 = vsub.f32 %v1271_v6, %v1472_v48 }
 0x482   : > { %v1499_v52 = vmul.f32 1.442695, %v1488_v49 }
 0x483   : > { %v1475_v53 = vpop.xlane.xlu1 %1474 }
 0x484   : > { %3671 = vpow2.f32 %v1499_v52  ;;  %1483 = vmax.xlane.f32.xlu0 %v1482_v54  ;;  %v1489_v55 = vsub.f32 %v1317_v12, %v1475_v53 }
 0x485   : > { %3673 = vpow2.f32 %v1497_v50  ;;  %v1565_v61 = vpop.trf.xlu0 }
 0x486   : > { %v3670_v51 = vpop.eup %3669  ;;  %v1501_v58 = vmul.f32 1.442695, %v1489_v55 }
 0x487   : > { %v1534_v56 = vpack.c.bf16 %v3670_v51, %v3670_v51  ;;  %v1512_v25 = vsel %vm1091_vm4, %v3670_v51, 0.0 }
 0x488   : > { %3675 = vpow2.f32 %v1501_v58 }
 0x489   : > { %v1719_v57 = vsel %vm1091_vm4, %v1534_v56, 0  ;;  %v1581_v11 = vpop.trf.xlu0 }
 0x48a   : > { %3489 = vmatpush3.bf16.xpose.msra.mxu1 %v1719_v57 }
 0x48b   : > { %3500 = vmatprep.subr.bf16.mxu1 %v3787_v8 }
 0x48e   : > { %v3672_v59 = vpop.eup %3671 }
 0x48f   : > { %v3674_v62 = vpop.eup %3673  ;;  %v1481_v63 = vpop.xlane.xlu1 %1480  ;;  %v1536_v1 = vpack.c.bf16 %v3672_v59, %v3672_v59 }
 0x490   : > { %v1491_v2 = vsub.f32 %v4135_v21, %v1481_v63  ;;  %v1535_v5 = vpack.c.bf16 %v3674_v62, %v3674_v62  ;;  %v1509_v21 = vsel %vm1091_vm4, %v4148_v38, 0.0  ;;  %v1515_v23 = vsel %vm1091_vm4, %v3674_v62, 0.0 }
 0x491   : > { %3491 = vmatmul.mubr.msk.bf16.vlgmr.msra.gmra.mrb[24].mxu1 %vm1091_vm4, %v1565_v61  ;;  %v1811_v4 = vsel %vm1091_vm4, %v1536_v1, 0 }
 0x492   : > { %3501 = vmatpush3.bf16.xpose.msra.mxu1 %v1811_v4  ;;  %3502 = vmatprep.mubr.msk.bf16.mxu1 %vm3788_vm1, %v3787_v8  ;;  %v1765_v7 = vsel %vm1091_vm4, %v1535_v5, 0  ;;  %v3676_v9 = vpop.eup %3675  ;;  %v1505_v19 = vmul.f32 1.442695, %v1491_v2  ;;  %v2446_v2 = vand.u32 127, %v686_v60 }
 0x493   : > { %3512 = vmatprep.subr.bf16.mxu1 %v3787_v8  ;;  %v1537_v10 = vpack.c.bf16 %v3676_v9, %v3676_v9  ;;  %v1521_v27 = vsel %vm1091_vm4, %v3676_v9, 0.0 }
 0x494   : > { %3677 = vpow2.f32 %v1505_v19 }
 0x495   : > { %v1549_v6 = vpop.trf.xlu1  ;;  %v1857_v12 = vsel %vm1091_vm4, %v1537_v10, 0 }
 0x496   : > { %3485 = vmatmul.mubr.msk.bf16.vlgmr.msra.gmra.mrb[16].mxu0 %vm1091_vm4, %v1549_v6  ;;  %v2449_v6 = vsub.s32 %v2446_v2, %v4031_v0 }
 0x497   : > { %3495 = vmatpush3.bf16.xpose.msra.mxu0 %v1765_v7  ;;  %3496 = vmatprep.mubr.msk.bf16.mxu0 %vm3788_vm1, %v3787_v8 }
 0x498   : > { %3506 = vmatprep.subr.bf16.mxu0 %v3787_v8 }
 0x49e   : > { %3497 = vmatmul.mubr.msk.bf16.vlgmr.msra.gmra.mrb[20].mxu0 %vm1091_vm4, %v1581_v11  ;;  %v857_v14 = vpop.permute.xlu0 %856  ;;  %v3678_v26 = vpop.eup %3677 }
 0x49f   : > { %3507 = vmatpush3.bf16.xpose.msra.mxu0 %v1857_v12  ;;  %3508 = vmatprep.mubr.msk.bf16.mxu0 %vm3788_vm1, %v3787_v8  ;;  %v1527_v29 = vsel %vm1091_vm4, %v3678_v26, 0.0  ;;  %v1539_v37 = vpack.c.bf16 %v3678_v26, %v3678_v26 }
 0x4a0   : > { %3518 = vmatprep.subr.bf16.mxu0 %v3787_v8 }
 0x4b1   : > { %1589 = vxpose.xlu0.c.b16.start.end [1/1] (short) (narrow) %v857_v14, 16 }
 0x4b5   : > { %1605 = vxpose.xlu0.c.b16.start.end [1/1] (short) (narrow) %v4144_v33, 16 }
 0x4b9   : > { %1621 = vxpose.xlu0.c.b16.start.end [1/1] (short) (narrow) %v863_v41, 16 }
 0x4d8   : > { %v1478_v15 = vpop.xlane.xlu0 %1477 }
 0x4d9   : > { %v1490_v44 = vsub.f32 %v4133_v17, %v1478_v15  ;;  %v1518_v17 = vsel %vm1091_vm4, %v3672_v59, 0.0 }
 0x4db   : > { %v1503_v20 = vmul.f32 1.442695, %v1490_v44 }
 0x4dc   : > { %v866_v16 = vpop.permute.xlu0 %865 }
 0x4dd   : > { %1637 = vxpose.xlu1.c.b16.start.end [1/1] (short) (narrow) %v866_v16, 16  ;;  %3679 = vpow2.f32 %v1503_v20 }
 0x4e0   : > { %v869_v18 = vpop.permute.xlu0 %868 }
 0x4e1   : > { %1653 = vxpose.xlu0.c.b16.start.end [1/1] (short) (narrow) %v869_v18, 16 }
 0x4e7   : > { %v3680_v28 = vpop.eup %3679 }
 0x4e8   : > { %v1524_v30 = vsel %vm1091_vm4, %v3680_v28, 0.0  ;;  %v1538_v34 = vpack.c.bf16 %v3680_v28, %v3680_v28 }
 0x4ea   : > { %1510 = vadd.xlane.f32.xlu1 %v1509_v21  ;;  %v1903_v36 = vsel %vm1091_vm4, %v1538_v34, 0 }
 0x4ee   : > { %1516 = vadd.xlane.f32.xlu1 %v1515_v23  ;;  %1513 = vadd.xlane.f32.xlu0 %v1512_v25 }
 0x4f2   : > { %1522 = vadd.xlane.f32.xlu1 %v1521_v27  ;;  %1519 = vadd.xlane.f32.xlu0 %v1518_v17 }
 0x4f6   : > { %1528 = vadd.xlane.f32.xlu1 %v1527_v29  ;;  %1525 = vadd.xlane.f32.xlu0 %v1524_v30 }
 0x511   : > { %v1484_v31 = vpop.xlane.xlu0 %1483 }
 0x512   : > { %v1492_v32 = vsub.f32 %v4137_v22, %v1484_v31  ;;  %v1949_v22 = vsel %vm1091_vm4, %v1539_v37, 0 }
 0x514   : > { %v1507_v33 = vmul.f32 1.442695, %v1492_v32 }
 0x516   : > { %3681 = vpow2.f32 %v1507_v33 }
 0x517   : > { %v1597_v35 = vpop.trf.xlu0 }
 0x518   : > { %3503 = vmatmul.mubr.msk.bf16.vlgmr.msra.gmra.mrb[28].mxu1 %vm1091_vm4, %v1597_v35 }
 0x519   : > { %3513 = vmatpush3.bf16.xpose.msra.mxu1 %v1903_v36  ;;  %3514 = vmatprep.mubr.msk.bf16.mxu1 %vm3788_vm1, %v3787_v8 }
 0x51a   : > { %3524 = vmatprep.subr.bf16.mxu1 %v3787_v8 }
 0x51b   : > { %v1613_v38 = vpop.trf.xlu0 }
 0x51c   : > { %3509 = vmatmul.mubr.msk.bf16.vlgmr.msra.gmra.mrb[24].mxu0 %vm1091_vm4, %v1613_v38 }
 0x51d   : > { %3519 = vmatpush3.bf16.xpose.msra.mxu0 %v1949_v22  ;;  %3520 = vmatprep.mubr.msk.bf16.mxu0 %vm3788_vm1, %v3787_v8 }
 0x51e   : > { %3530 = vmatprep.subr.bf16.mxu0 %v3787_v8 }
 0x51f   : > { %v1629_v39 = vpop.trf.xlu0 }
 0x520   : > { %v3682_v40 = vpop.eup %3681  ;;  %3515 = vmatmul.mubr.msk.bf16.vlgmr.msra.gmra.mrb[32].mxu1 %vm1091_vm4, %v1629_v39 }
 0x521   : > { %v1530_v41 = vsel %vm1091_vm4, %v3682_v40, 0.0  ;;  %v1540_v42 = vpack.c.bf16 %v3682_v40, %v3682_v40  ;;  %3526 = vmatprep.mubr.msk.bf16.mxu1 %vm3788_vm1, %v3787_v8 }
 0x522   : > { %1531 = vadd.xlane.f32.xlu0 %v1530_v41 }
 0x523   : > { %v1995_v43 = vsel %vm1091_vm4, %v1540_v42, 0 }
 0x524   : > { %3525 = vmatpush3.bf16.xpose.msra.mxu1 %v1995_v43 }
 0x543   : > { %v1645_v45 = vpop.trf.xlu1 }
 0x544   : > { %3521 = vmatmul.mubr.msk.bf16.vlgmr.msra.gmra.mrb[28].mxu0 %vm1091_vm4, %v1645_v45 }
 0x545   : > { %3538 = vmatprep.mubr.msk.bf16.mxu0 %vm3788_vm1, %v3787_v8  ;;  %vm2763_vm1 = vcmask 392192  }
 0x547   : > { %v1661_v46 = vpop.trf.xlu0 }
 0x548   : > { %3527 = vmatmul.mubr.msk.bf16.vlgmr.msra.gmra.mrb[36].mxu1 %vm1091_vm4, %v1661_v46 }
 0x549   : > { %2977 = vmatprep.mubr.bf16.mxu1 %v3798_v13 }
 0x564   : > { %v4209_v47 = vpop.f32.mrb[24].mxu1 }
 0x565   : > { %v3492_v48 = vpop.f32.mrb[25].mxu1 }
 0x566   : > { %v1758_v49 = vpop.f32.mrb[26].mxu1 }
 0x567   : > { %v3493_v50 = vpop.f32.mrb[27].mxu1 }
 0x569   : > { %v1709_v52 = vpop.f32.mrb[16].mxu0 }
 0x56a   : > { %v3486_v53 = vpop.f32.mrb[17].mxu0 }
 0x56b   : > { %v1712_v54 = vpop.f32.mrb[18].mxu0 }
 0x56c   : > { %v3487_v55 = vpop.f32.mrb[19].mxu0  ;;  %v2528_v54 = vsub.s32 0, %v4031_v0 }
 0x571   : > { %v1801_v51 = vpop.f32.mrb[20].mxu0 }
 0x572   : > { %v3498_v56 = vpop.f32.mrb[21].mxu0 }
 0x573   : > { %v1804_v58 = vpop.f32.mrb[22].mxu0  ;;  %v2535_v56 = vsub.s32 1, %v4031_v0 }
 0x574   : > { %v3499_v57 = vpop.f32.mrb[23].mxu0 }
 0x575   : > { %v2542_v57 = vsub.s32 2, %v4031_v0 }
 0x577   : > { %v1511_v59 = vpop.xlane.xlu1 %1510 }
 0x57b   : > { %v1514_v61 = vpop.xlane.xlu0 %1513  ;;  %v1517_v62 = vpop.xlane.xlu1 %1516 }
 0x57c   : > { %3683 = vrcp.f32 %v1514_v61  ;;  %v2549_v61 = vsub.s32 3, %v4031_v0 }
 0x57d   : > { %3685 = vrcp.f32 %v1511_v59 }
 0x57e   : > { %3687 = vrcp.f32 %v1517_v62 }
 0x57f   : > { %v1520_v63 = vpop.xlane.xlu0 %1519  ;;  %v1523_v13 = vpop.xlane.xlu1 %1522 }
 0x580   : > { %3689 = vrcp.f32 %v1520_v63  ;;  %v2556_v63 = vsub.s32 4, %v4031_v0 }
 0x581   : > { %3691 = vrcp.f32 %v1523_v13 }
 0x583   : > { %v1526_v1 = vpop.xlane.xlu0 %1525  ;;  %v1529_v4 = vpop.xlane.xlu1 %1528 }
 0x584   : > { %3693 = vrcp.f32 %v1526_v1  ;;  %v2563_v1 = vsub.s32 5, %v4031_v0 }
 0x585   : > { %3695 = vrcp.f32 %v1529_v4  ;;  %v2570_v4 = vsub.s32 6, %v4031_v0 }
 0x586   : > { %v3684_v5 = vpop.eup %3683 }
 0x587   : > { %v3686_v7 = vpop.eup %3685  ;;  %v2454_v10 = vrot.slane %v3684_v5, %v2449_v6 }
 0x588   : > { %v3688_v9 = vpop.eup %3687  ;;  %v2450_v12 = vrot.slane %v3686_v7, %v2449_v6 }
 0x589   : > { %v2458_v15 = vrot.slane %v3688_v9, %v2449_v6 }
 0x58a   : > { %v3690_v11 = vpop.eup %3689  ;;  %v2480_v18 = vsel %vm2479_vm5, %v2454_v10, %v2450_v12 }
 0x58b   : > { %v3692_v16 = vpop.eup %3691  ;;  %v2462_v44 = vrot.slane %v3690_v11, %v2449_v6  ;;  %v2482_v20 = vsel %vm2481_vm6, %v2458_v15, %v2480_v18 }
 0x58c   : > { %v2466_v19 = vrot.slane %v3692_v16, %v2449_v6 }
 0x58d   : > { %v2484_v25 = vsel %vm2483_vm7, %v2462_v44, %v2482_v20 }
 0x58e   : > { %v3694_v60 = vpop.eup %3693  ;;  %v2486_v27 = vsel %vm2485_vm8, %v2466_v19, %v2484_v25 }
 0x58f   : > { %v3696_v21 = vpop.eup %3695  ;;  %v2470_v23 = vrot.slane %v3694_v60, %v2449_v6 }
 0x590   : > { %v2474_v26 = vrot.slane %v3696_v21, %v2449_v6 }
 0x591   : > { %v2488_v17 = vsel %vm2487_vm9, %v2470_v23, %v2486_v27 }
 0x592   : > { %v2490_v30 = vsel %vm2489_vm10, %v2474_v26, %v2488_v17 }
 0x5af   : > { %v1532_v14 = vpop.xlane.xlu0 %1531 }
 0x5b0   : > { %3697 = vrcp.f32 %v1532_v14 }
 0x5ba   : > { %v3698_v28 = vpop.eup %3697 }
 0x5bb   : > { %v2478_v29 = vrot.slane %v3698_v28, %v2449_v6  ;;  %v2577_v6 = vsub.s32 7, %v4031_v0 }
 0x5bd   : > { %v2492_v31 = vsel %vm2491_vm11, %v2478_v29, %v2490_v30 }
 0x5be   : > { %2494 = vxpose.xlu1.b32.start.end [1/1] (short) (narrow) %v2492_v31, 8 }
 0x5c2   : > { %2037 = vxpose.xlu1.b32.start.end [1/1] (short) (narrow) %v1709_v52, 8 }
 0x5c6   : > { %2101 = vxpose.xlu1.b32.start.end [1/1] (short) (narrow) %v1801_v51, 8 }
 0x5eb   : > { %v1847_v32 = vpop.f32.mrb[28].mxu1 }
 0x5ec   : > { %2133 = vxpose.xlu1.b32.start.end [1/1] (short) (narrow) %v1847_v32, 8  ;;  %v3504_v33 = vpop.f32.mrb[29].mxu1 }
 0x5ed   : > { %v1850_v34 = vpop.f32.mrb[30].mxu1 }
 0x5ee   : > { %v3505_v35 = vpop.f32.mrb[31].mxu1 }
 0x5ef   : > { %v1893_v36 = vpop.f32.mrb[24].mxu0 }
 0x5f0   : > { %2165 = vxpose.xlu1.b32.start.end [1/1] (short) (narrow) %v1893_v36, 8  ;;  %v3510_v37 = vpop.f32.mrb[25].mxu0 }
 0x5f1   : > { %v1896_v38 = vpop.f32.mrb[26].mxu0 }
 0x5f2   : > { %v3511_v22 = vpop.f32.mrb[27].mxu0 }
 0x5f3   : > { %v1939_v39 = vpop.f32.mrb[32].mxu1 }
 0x5f4   : > { %2197 = vxpose.xlu1.b32.start.end [1/1] (short) (narrow) %v1939_v39, 8  ;;  %v3516_v40 = vpop.f32.mrb[33].mxu1 }
 0x5f5   : > { %v1942_v41 = vpop.f32.mrb[34].mxu1 }
 0x5f6   : > { %v3517_v42 = vpop.f32.mrb[35].mxu1 }
 0x617   : > { %v1985_v43 = vpop.f32.mrb[28].mxu0 }
 0x618   : > { %2229 = vxpose.xlu1.b32.start.end [1/1] (short) (narrow) %v1985_v43, 8  ;;  %v3522_v45 = vpop.f32.mrb[29].mxu0 }
 0x619   : > { %v1988_v46 = vpop.f32.mrb[30].mxu0 }
 0x61a   : > { %v3523_v48 = vpop.f32.mrb[31].mxu0 }
 0x61b   : > { %v2031_v49 = vpop.f32.mrb[36].mxu1 }
 0x61c   : > { %2261 = vxpose.xlu1.b32.start.end [1/1] (short) (narrow) %v2031_v49, 8  ;;  %v3528_v50 = vpop.f32.mrb[37].mxu1 }
 0x61d   : > { %v2034_v52 = vpop.f32.mrb[38].mxu1 }
 0x61e   : > { %v3529_v53 = vpop.f32.mrb[39].mxu1 }
 0x63e   : > { %v2510_v55 = vpop.trf.xlu1 }
 0x63f   : > { %v2529_v51 = vrot.slane %v2510_v55, %v2528_v54  ;;  %v2536_v58 = vrot.slane %v2510_v55, %v2535_v56  ;;  %v2543_v59 = vrot.slane %v2510_v55, %v2542_v57  ;;  %v2550_v62 = vrot.slane %v2510_v55, %v2549_v61 }
 0x640   : > { %v2557_v13 = vrot.slane %v2510_v55, %v2556_v63  ;;  %v2564_v2 = vrot.slane %v2510_v55, %v2563_v1  ;;  %v2571_v5 = vrot.slane %v2510_v55, %v2570_v4  ;;  %v2578_v7 = vrot.slane %v2510_v55, %v2577_v6 }
 0x641   : > { %2531 = vbcast.lane.b32.xlu0 %v2529_v51, 256 }
 0x642   : > { %v2053_v10 = vpop.trf.xlu1 }
 0x645   : > { %2538 = vbcast.lane.b32.xlu0 %v2536_v58, 256 }
 0x646   : > { %v2117_v12 = vpop.trf.xlu1 }
 0x647   : > { %v2293_v30 = vcombine.low %v2053_v10, %v2117_v12  ;;  %v2294_v31 = vcombine.high %v2053_v10, %v2117_v12 }
 0x649   : > { %2545 = vbcast.lane.b32.xlu0 %v2543_v59, 256  ;;  %v2301_v22 = vrot.slane %v2293_v30, %v4034_v3  ;;  %v2308_v39 = vrot.slane %v2294_v31, %v4034_v3 }
 0x64d   : > { %2552 = vbcast.lane.b32.xlu0 %v2550_v62, 256 }
 0x651   : > { %2559 = vbcast.lane.b32.xlu0 %v2557_v13, 256 }
 0x655   : > { %2566 = vbcast.lane.b32.xlu0 %v2564_v2, 256 }
 0x659   : > { %2573 = vbcast.lane.b32.xlu0 %v2571_v5, 256 }
 0x65d   : > { %2580 = vbcast.lane.b32.xlu0 %v2578_v7, 256 }
 0x66c   : > { %v2149_v15 = vpop.trf.xlu1 }
 0x670   : > { %v2181_v44 = vpop.trf.xlu1 }
 0x674   : > { %v2213_v60 = vpop.trf.xlu1 }
 0x67b   : > { %2069 = vxpose.xlu0.b32.start.end [1/1] (short) (narrow) %v4209_v47, 8 }
 0x698   : > { %v2245_v20 = vpop.trf.xlu1 }
 0x699   : > { %v2325_v25 = vcombine.low %v2181_v44, %v2245_v20  ;;  %v2326_v17 = vcombine.high %v2181_v44, %v2245_v20 }
 0x69b   : > { %v2333_v47 = vrot.slane %v2325_v25, %v4034_v3  ;;  %v2340_v32 = vrot.slane %v2326_v17, %v4034_v3 }
 0x69c   : > { %v2277_v23 = vpop.trf.xlu1 }
 0x69d   : > { %v2341_v26 = vcombine.low %v2213_v60, %v2277_v23  ;;  %v2342_v28 = vcombine.high %v2213_v60, %v2277_v23 }
 0x69f   : > { %v2349_v29 = vrot.slane %v2341_v26, %v4034_v3  ;;  %v2356_v33 = vrot.slane %v2342_v28, %v4034_v3 }
 0x6a1   : > { %v2389_v37 = vcombine.low %v2333_v47, %v2349_v29  ;;  %v2390_v38 = vcombine.high %v2333_v47, %v2349_v29  ;;  %v2405_v42 = vcombine.low %v2340_v32, %v2356_v33  ;;  %v2406_v43 = vcombine.high %v2340_v32, %v2356_v33 }
 0x6a3   : > { %v2397_v50 = vrot.slane %v2389_v37, %v4041_v24  ;;  %v2404_v52 = vrot.slane %v2390_v38, %v4041_v24  ;;  %v2413_v57 = vrot.slane %v2405_v42, %v4041_v24  ;;  %v2420_v59 = vrot.slane %v2406_v43, %v4041_v24 }
 0x6b3   : > { %v2532_v9 = vpop.permute.xlu0 %2531 }
 0x6b7   : > { %v2539_v11 = vpop.permute.xlu0 %2538 }
 0x6bb   : > { %v2546_v14 = vpop.permute.xlu0 %2545 }
 0x6bf   : > { %v2553_v16 = vpop.permute.xlu0 %2552 }
 0x6c3   : > { %v2560_v18 = vpop.permute.xlu0 %2559 }
 0x6c7   : > { %v2567_v19 = vpop.permute.xlu0 %2566 }
 0x6cb   : > { %v2574_v21 = vpop.permute.xlu0 %2573 }
 0x6cf   : > { %v2581_v27 = vpop.permute.xlu0 %2580 }
 0x6fb   : > { %v2085_v34 = vpop.trf.xlu0 }
 0x6fc   : > { %v2309_v35 = vcombine.low %v2085_v34, %v2149_v15  ;;  %v2310_v36 = vcombine.high %v2085_v34, %v2149_v15 }
 0x6fe   : > { %v2317_v40 = vrot.slane %v2309_v35, %v4034_v3  ;;  %v2324_v41 = vrot.slane %v2310_v36, %v4034_v3 }
 0x700   : > { %v2357_v45 = vcombine.low %v2301_v22, %v2317_v40  ;;  %v2358_v46 = vcombine.high %v2301_v22, %v2317_v40  ;;  %v2373_v48 = vcombine.low %v2308_v39, %v2324_v41  ;;  %v2374_v49 = vcombine.high %v2308_v39, %v2324_v41  ;;  %v3634_v39 = vld [vmem:[%s4432_s4 + $0x8] sm:$0xff]  }
 0x702   : > { %v2365_v53 = vrot.slane %v2357_v45, %v4041_v24  ;;  %v2372_v55 = vrot.slane %v2358_v46, %v4041_v24  ;;  %v2381_v51 = vrot.slane %v2373_v48, %v4041_v24  ;;  %v2388_v58 = vrot.slane %v2374_v49, %v4041_v24 }
 0x704   : > { %v2421_v61 = vcombine.low %v2365_v53, %v2397_v50  ;;  %v2422_v62 = vcombine.high %v2365_v53, %v2397_v50  ;;  %v2423_v63 = vcombine.low %v2372_v55, %v2404_v52  ;;  %v2424_v13 = vcombine.high %v2372_v55, %v2404_v52  ;;  %v3635_v50 = vld [vmem:[%s4432_s4 + $0x10] sm:$0xff]  }
 0x705   : > { %v2425_v1 = vcombine.low %v2381_v51, %v2413_v57  ;;  %v2426_v2 = vcombine.high %v2381_v51, %v2413_v57  ;;  %v2427_v4 = vcombine.low %v2388_v58, %v2420_v59  ;;  %v2428_v5 = vcombine.high %v2388_v58, %v2420_v59  ;;  %v3636_v58 = vld [vmem:[%s4432_s4 + $0x18] sm:$0xff]  }
 0x706   : > { %v2582_v6 = vmul.f32 %v2532_v9, %v2421_v61  ;;  %v2583_v7 = vmul.f32 %v2539_v11, %v2422_v62  ;;  %v2584_v10 = vmul.f32 %v2546_v14, %v2423_v63  ;;  %v2585_v12 = vmul.f32 %v2553_v16, %v2424_v13  ;;  %v3633_v14 = vld [vmem:[%s4432_s4] sm:$0xff]  }
 0x707   : > { %v2586_v15 = vmul.f32 %v2560_v18, %v2425_v1  ;;  %v2587_v44 = vmul.f32 %v2567_v19, %v2426_v2  ;;  %v2588_v60 = vmul.f32 %v2574_v21, %v2427_v4  ;;  %v2589_v20 = vmul.f32 %v2581_v27, %v2428_v5  ;;  %3531 = vmatpush3.bf16.msra.mxu0 %v3633_v14  ;;  %v3639_v14 = vld [vmem:[%s4436_s8 + $0x4] ss:$8 sps:$4 sm:$0xff]  }
 0x708   : > { %v2590_v23 = vcombine.low %v2582_v6, %v2584_v10  ;;  %v2606_v25 = vcombine.low %v2583_v7, %v2585_v12  ;;  %v2591_v26 = vcombine.high %v2582_v6, %v2584_v10  ;;  %v2607_v17 = vcombine.high %v2583_v7, %v2585_v12  ;;  %3532 = vmatprep.subr.bf16.mxu0 %v3787_v8 }
 0x709   : > { %v2622_v28 = vcombine.low %v2586_v15, %v2588_v60  ;;  %v2638_v47 = vcombine.low %v2587_v44, %v2589_v20  ;;  %v2623_v29 = vcombine.high %v2586_v15, %v2588_v60  ;;  %v2639_v30 = vcombine.high %v2587_v44, %v2589_v20  ;;  %v3302_v60 = vld [vmem:[%s4433_s5] ss:$0 sm:$0xff]  ;;  %2945 = vmatprep.subr.bf16.mxu1 %v3639_v14 }
 0x70a   : > { %v2598_v31 = vrot.slane %v2590_v23, %v4034_v3  ;;  %v2614_v32 = vrot.slane %v2606_v25, %v4034_v3  ;;  %v2605_v9 = vrot.slane %v2591_v26, %v4034_v3  ;;  %v2621_v11 = vrot.slane %v2607_v17, %v4034_v3  ;;  %v3705_v17 = vld [vmem:[%s3932_s27] sm:$0xff] }
 0x70b   : > { %v2630_v16 = vrot.slane %v2622_v28, %v4034_v3  ;;  %v2646_v18 = vrot.slane %v2638_v47, %v4034_v3  ;;  %v2637_v19 = vrot.slane %v2623_v29, %v4034_v3  ;;  %v2653_v21 = vrot.slane %v2639_v30, %v4034_v3  ;;  %3533 = vmatpush3.bf16.msra.mxu0 %v3634_v39 }
 0x70c   : > { %v2655_v27 = vcombine.high %v2598_v31, %v2614_v32  ;;  %v2654_v33 = vcombine.low %v2598_v31, %v2614_v32  ;;  %v2671_v36 = vcombine.high %v2605_v9, %v2621_v11  ;;  %v2670_v41 = vcombine.low %v2605_v9, %v2621_v11  ;;  %3534 = vmatprep.subr.bf16.mxu0 %v3787_v8 }
 0x70d   : > { %v2687_v34 = vcombine.high %v2630_v16, %v2646_v18  ;;  %v2686_v35 = vcombine.low %v2630_v16, %v2646_v18  ;;  %v2703_v37 = vcombine.high %v2637_v19, %v2653_v21  ;;  %v2702_v42 = vcombine.low %v2637_v19, %v2653_v21  ;;  %v3637_v16 = vld [vmem:[%s4436_s8] ss:$8 sps:$4 sm:$0xff]   ;;  %v3642_v18 = vld [vmem:[%s4436_s8 + $0x14] ss:$8 sps:$4 sm:$0xff]   ;;  %v3640_v19 = vld [vmem:[%s4436_s8 + $0x10] ss:$8 sps:$4 sm:$0xff]  }
 0x70e   : > { %v2669_v38 = vrot.slane %v2655_v27, %v4041_v24  ;;  %v2662_v22 = vrot.slane %v2654_v33, %v4041_v24  ;;  %v2685_v46 = vrot.slane %v2671_v36, %v4041_v24  ;;  %v2678_v55 = vrot.slane %v2670_v41, %v4041_v24  ;;  %2946 = vmatpush1.bf16.msra.mxu1 %v3637_v16  ;;  %v3645_v21 = vld [vmem:[%s4436_s8 + $0x24] ss:$8 sps:$4 sm:$0xff]   ;;  %v3643_v27 = vld [vmem:[%s4436_s8 + $0x20] ss:$8 sps:$4 sm:$0xff]   ;;  %v3648_v33 = vld [vmem:[%s4436_s8 + $0x34] ss:$8 sps:$4 sm:$0xff]  }
 0x70f   : > { %v2701_v40 = vrot.slane %v2687_v34, %v4041_v24  ;;  %v2694_v3 = vrot.slane %v2686_v35, %v4041_v24  ;;  %v2717_v48 = vrot.slane %v2703_v37, %v4041_v24  ;;  %3535 = vmatpush3.bf16.msra.mxu0 %v3635_v50  ;;  %v2710_v51 = vrot.slane %v2702_v42, %v4041_v24  ;;  %v3646_v34 = vld [vmem:[%s4436_s8 + $0x30] ss:$8 sps:$4 sm:$0xff]   ;;  %v3649_v35 = vld [vmem:[%s4438_s10 + $0x40] sm:$0xff]   ;;  %v3651_v37 = vld [vmem:[%s4438_s10 + $0x48] sm:$0xff]  }
 0x710   : > { %3536 = vmatprep.subr.bf16.mxu0 %v3787_v8  ;;  %2947 = vmatprep.subr.bf16.mxu1 %v3642_v18  ;;  %v3650_v36 = vld [vmem:[%s4438_s10] sm:$0xff]   ;;  %v3654_v50 = vld [vmem:[%s4438_s10 + $0x10] sm:$0xff]  }
 0x711   : > { %v2720_v43 = vcombine.low %v2669_v38, %v2701_v40  ;;  %v2719_v45 = vcombine.high %v2662_v22, %v2694_v3  ;;  %v2718_v49 = vcombine.low %v2662_v22, %v2694_v3  ;;  %v2725_v52 = vcombine.high %v2685_v46, %v2717_v48  ;;  %v3308_v41 = vld [vmem:[%s4434_s6] ss:$0 sm:$0xff] }
 0x712   : > { %v2721_v53 = vcombine.high %v2669_v38, %v2701_v40  ;;  %v2722_v57 = vcombine.low %v2678_v55, %v2710_v51  ;;  %v2723_v59 = vcombine.high %v2678_v55, %v2710_v51  ;;  %v2724_v61 = vcombine.low %v2685_v46, %v2717_v48  ;;  %2948 = vmatpush1.bf16.msra.mxu1 %v3640_v19  ;;  %v3652_v38 = vld [vmem:[%s4438_s10 + $0x8] sm:$0xff]   ;;  %v3657_v55 = vld [vmem:[%s4438_s10 + $0x60] sm:$0xff]  }
 0x713   : > { %2731 = vrot.lane.b32.xlu0 %v2720_v43, %s3799_s28  ;;  %2727 = vrot.lane.b32.xlu1 %v2719_v45, %s3800_s29  ;;  %v3309_v43 = vld [vmem:[%s4435_s7] ss:$0 sm:$0xff]  ;;  %s3337_s28 = sshll.u32 %s3776_s24, 7  ;;  %s3806_s24 = smov [#allocation5]  }
 0x714   : > { %3537 = vmatpush3.bf16.msra.mxu0 %v3636_v58  ;;  %2949 = vmatprep.subr.bf16.mxu1 %v3645_v21  ;;  %v3658_v51 = vld [vmem:[%s4438_s10 + $0x20] sm:$0xff]   ;;  %v3659_v58 = vld [vmem:[%s4438_s10 + $0x68] sm:$0xff]   ;;  %s4380_s14 = scalar_lea.hbm %s4440_s12, %s3337_s28 }
 0x715   : > { %3388 = vmatprep.subr.bf16.mxu0 %v3649_v35 }
 0x716   : > { %2950 = vmatpush1.bf16.msra.mxu1 %v3643_v27 }
 0x717   : > { %2751 = vrot.lane.b32.xlu0 %v2725_v52, %s3801_s30  ;;  %2735 = vrot.lane.b32.xlu1 %v2721_v53, %s3802_s25  ;;  %v3655_v52 = vld [vmem:[%s4438_s10 + $0x58] sm:$0xff]  }
 0x718   : > { %2951 = vmatprep.subr.bf16.mxu1 %v3648_v33  ;;  %v3656_v53 = vld [vmem:[%s4438_s10 + $0x18] sm:$0xff]  }
 0x71a   : > { %2952 = vmatpush1.bf16.msra.mxu1 %v3646_v34 }
 0x71b   : > { %2739 = vrot.lane.b32.xlu1 %v2722_v57, %s3803_s18  ;;  %v3660_v57 = vld [vmem:[%s4438_s10 + $0x28] sm:$0xff]   ;;  %s3263_s18 = sshll.u32 %s416_s17, 3 }
 0x71c   : > { %s418_s29 = scalar_lea.vmem [#allocation5], %s3263_s18  ;;  %s3710_s18 = sshll.u32 %s3806_s24, 4  ;;  %s3711_s18 = int_to_ptr.vmem [resolvable:$false] %s3710_s18 }
 0x71d   : > { %s3190_s30 = sshll.u32 %s418_s29, 4  ;;  %s3712_s0 = scalar_lea.vmem %s3711_s18, 256  ;;  %s4382_s30 = int_to_ptr.vmem [resolvable:$true] %s3190_s30 }
 0x71e   : > { %p3713_p1 = scmp.lt.s32.totalorder %s4382_s30, %s3711_s18 }
 0x71f   : > { %2743 = vrot.lane.b32.xlu1 %v2723_v59, %s3804_s19  ;;  %v3661_v59 = vld [vmem:[%s4438_s10 + $0x70] sm:$0xff]   ;;  %s3176_s19 = scalar_lea.sflag [#allocation6], %s416_s17 }
 0x723   : > { %2747 = vrot.lane.b32.xlu1 %v2724_v61, %s3805_s20  ;;  %v3662_v61 = vld [vmem:[%s4438_s10 + $0x30] sm:$0xff]   ;;  %s3706_s20 = scalar_lea.vmem %s4382_s30, 128 }
 0x724   : > { %p3707_p12 = scmp.ne.s32.totalorder %s4382_s30, %s3706_s20  ;;  %p3714_p2 = scmp.lt.s32.totalorder %s3712_s0, %s3706_s20 }
 0x726   : > { %p3708_p13 = pnand %p3707_p12, %p3912_p4  ;;  %p3715_p3 = por %p3714_p2, %p3713_p1 }
 0x728   : > { %p3709_p0 = pneg %p3708_p13 }
 0x72a   : > { %p3716_p5 = pnand %p3715_p3, %p3709_p0 }
 0x785   : > { %v2728_v24 = vpop.permute.xlu1 %2727  ;;  %v2732_v63 = vpop.permute.xlu0 %2731 }
 0x786   : > { %v2754_v13 = vsel %vm1091_vm4, %v2718_v49, %v2728_v24  ;;  %v3653_v49 = vld [vmem:[%s4438_s10 + $0x50] sm:$0xff]   ;;  %v3663_v24 = vld [vmem:[%s4438_s10 + $0x78] sm:$0xff]  }
 0x787   : > { %v2756_v2 = vsel %vm2755_vm12, %v2754_v13, %v2732_v63 }
 0x789   : > { %v2736_v8 = vpop.permute.xlu1 %2735  ;;  %v2752_v10 = vpop.permute.xlu0 %2751 }
 0x78a   : > { %v2758_v4 = vsel %vm2757_vm13, %v2756_v2, %v2736_v8  ;;  %v3664_v8 = vld [vmem:[%s4438_s10 + $0x38] sm:$0xff]  }
 0x78d   : > { %v2740_v62 = vpop.permute.xlu1 %2739 }
 0x78e   : > { %v2760_v5 = vsel %vm2759_vm14, %v2758_v4, %v2740_v62  ;;  %v2890_v62 = vld [vmem:[%s4437_s9] sm:$0x3] }
 0x78f   : > { %v2895_v63 = vrot.slane %v2890_v62, %v2528_v54  ;;  %v2899_v13 = vrot.slane %v2890_v62, %v2535_v56 }
 0x791   : > { %v2744_v1 = vpop.permute.xlu1 %2743 }
 0x792   : > { %v2762_v6 = vsel %vm2761_vm15, %v2760_v5, %v2744_v1 }
 0x795   : > { %v2748_v7 = vpop.permute.xlu1 %2747 }
 0x796   : > { %v2764_v12 = vsel %vm2763_vm1, %v2762_v6, %v2748_v7 }
 0x797   : > { %v2766_v15 = vsel %vm2765_vm2, %v2764_v12, %v2752_v10 }
 0x798   : > { %v2767_v44 = vpack.c.bf16 %v2766_v15, %v2766_v15 }
 0x79a   : > { %3539 = vmatmul.mubr.msk.bf16.vlgmr.msra.gmra.mrb[32].mxu0 %vm431_vm0, %v2767_v44 }
 0x79b   : > { %3389 = vmatpush3.bf16.msra.mxu0 %v3650_v36 }
 0x79c   : > { %3390 = vmatprep.subr.bf16.mxu0 %v3651_v37 }
 0x79f   : > { %3391 = vmatpush3.bf16.msra.mxu0 %v3652_v38 }
 0x7a0   : > { %3392 = vmatprep.subr.bf16.mxu0 %v3653_v49 }
 0x7a3   : > { %3393 = vmatpush3.bf16.msra.mxu0 %v3654_v50 }
 0x7a4   : > { %3394 = vmatprep.subr.bf16.mxu0 %v3655_v52 }
 0x7a7   : > { %3395 = vmatpush3.bf16.msra.mxu0 %v3656_v53 }
 0x7a8   : > { %3396 = vmatprep.subr.bf16.mxu0 %v3657_v55 }
 0x7ab   : > { %3397 = vmatpush3.bf16.msra.mxu0 %v3658_v51 }
 0x7ac   : > { %3398 = vmatprep.subr.bf16.mxu0 %v3659_v58 }
 0x7af   : > { %3399 = vmatpush3.bf16.msra.mxu0 %v3660_v57 }
 0x7b0   : > { %3400 = vmatprep.subr.bf16.mxu0 %v3661_v59 }
 0x7b3   : > { %3401 = vmatpush3.bf16.msra.mxu0 %v3662_v61 }
 0x7b4   : > { %3402 = vmatprep.subr.bf16.mxu0 %v3663_v24 }
 0x7b7   : > { %3403 = vmatpush3.bf16.msra.mxu0 %v3664_v8 }
 0x86d   : > { %v2844_v20 = vpop.f32.mrb[32].mxu0 }
 0x86e   : > { %v2845_v23 = vadd.f32 %v3302_v60, %v2844_v20  ;;  %v3540_v25 = vpop.f32.mrb[33].mxu0 }
 0x86f   : > { %v2847_v26 = vpop.f32.mrb[34].mxu0 }
 0x870   : > { %v4279_v28 = vadd.f32 %v3705_v17, %v2845_v23  ;;  %v3541_v47 = vpop.f32.mrb[35].mxu0 }
 0x871   : > { %v3319_v47 = vld [vmem:[%s4439_s11] ss:$0 sm:$0xff] }
 0x872   : > { %v2853_v29 = vsel %vm431_vm0, %v4279_v28, 0.0 }
 0x873   : > { %2854 = vadd.xlane.f32.xlu1 %v2853_v29 }
 0x900   : > { %v2855_v30 = vpop.xlane.xlu1 %2854 }
 0x901   : > { %v2857_v31 = vmul.f32 0.015625, %v2855_v30 }
 0x903   : > { %v2858_v32 = vsub.f32 %v4279_v28, %v2857_v31 }
 0x905   : > { %v2859_v9 = vmul.f32 %v2858_v32, %v2858_v32 }
 0x907   : > { %v2860_v11 = vsel %vm431_vm0, %v2859_v9, 0.0 }
 0x908   : > { %2861 = vadd.xlane.f32.xlu0 %v2860_v11 }
 0x995   : > { %v2862_v22 = vpop.xlane.xlu0 %2861 }
 0x996   : > { %v2863_v39 = vmul.f32 0.015625, %v2862_v22 }
 0x998   : > { %v2864_v40 = vadd.f32 1e-05, %v2863_v39 }
 0x99a   : > { %3699 = vrsqrt.f32 %v2864_v40 }
 0x9a4   : > { %v3700_v3 = vpop.eup %3699 }
 0x9a5   : > { %v2866_v42 = vmul.f32 %v3700_v3, %v2858_v32 }
 0x9a7   : > { %v2873_v45 = vmul.f32 %v3308_v41, %v2866_v42 }
 0x9a9   : > { %v2880_v46 = vadd.f32 %v3309_v43, %v2873_v45 }
 0x9ab   : > { %v2881_v48 = vpack.c.bf16 %v2880_v46, %v2880_v46 }
 0x9ad   : > { %3318 = vmatmul.mubr.msk.bf16.vlgmr.msra.gmra.mrb[40].mxu1 %vm431_vm0, %v2881_v48 }
 0xa80   : > { %v2979_v1 = vpop.f32.mrb[40].mxu1 }
 0xa81   : > { %v2980_v2 = vadd.f32 %v2979_v1, %v2895_v63  ;;  %v2981_v4 = vpop.f32.mrb[41].mxu1 }
 0xa82   : > { %v2982_v5 = vadd.f32 %v2981_v4, %v2899_v13  ;;  %v2983_v6 = vpop.f32.mrb[42].mxu1 }
 0xa83   : > { %v2988_v7 = vmul.f32 0.70710677, %v2980_v2  ;;  %v2984_v10 = vpop.f32.mrb[43].mxu1  ;;  %v2986_v60 = vmul.f32 0.5, %v2980_v2 }
 0xa84   : > { %v2989_v12 = vmul.f32 0.70710677, %v2982_v5  ;;  %v2987_v23 = vmul.f32 0.5, %v2982_v5 }
 0xa85   : > { %3701 = verf.f32 %v2988_v7 }
 0xa86   : > { %3703 = verf.f32 %v2989_v12 }
 0xa8f   : > { %v3702_v15 = vpop.eup %3701 }
 0xa90   : > { %v3704_v44 = vpop.eup %3703  ;;  %v2992_v20 = vadd.f32 1.0, %v3702_v15 }
 0xa91   : > { %v2993_v54 = vadd.f32 1.0, %v3704_v44 }
 0xa92   : > { %v2994_v0 = vmul.f32 %v2992_v20, %v2986_v60 }
 0xa93   : > { %v2995_v56 = vmul.f32 %v2993_v54, %v2987_v23 }
 0xa94   : > { %v2996_v26 = vpack.c.bf16 %v2994_v0, %v2994_v0 }
 0xa95   : > { %v2997_v25 = vpack.c.bf16 %v2995_v56, %v2995_v56 }
 0xa97   : > { %3165 = vmatprep.mubr.bf16.mxu0 %v2997_v25 }
 0xa98   : > { %3166 = vmatmul.mubr.bf16.vlgmr.msra.gmra.mrb[36].mxu0 %v2996_v26 }
 0xb6b   : > { %v3404_v17 = vpop.f32.mrb[36].mxu0 }
 0xb6c   : > { %v3405_v29 = vpop.f32.mrb[37].mxu0 }
 0xb6d   : > { %v3406_v30 = vadd.f32 %v3405_v29, %v3404_v17  ;;  %v3407_v31 = vpop.f32.mrb[38].mxu0 }
 0xb6e   : > { %v3408_v32 = vpop.f32.mrb[39].mxu0 }
 0xb6f   : > { %v3168_v9 = vadd.f32 %v3406_v30, %v3319_v47 }
 0xb71   : > { %v3173_v11 = vadd.f32 %v3168_v9, %v4279_v28 }
 0xb73   : > { %3174 = vst.msk [vmem:[%s418_s29] sm:$0xff] %vm431_vm0, %v3173_v11 }
 0xb74   : > { %3719 = shalt.err (!%p3716_p5)
}
 0xb75   : > { %s3720_s17 = scalar_lea.hbm %s4380_s14, 128  ;;  %s3724_s25 = scalar_lea.hbm %s4440_s12, 256 }
 0xb76   : > { %p3721_p6 = scmp.ne.s32.totalorder %s4380_s14, %s3720_s17  ;;  %p3725_p10 = scmp.lt.u32.totalorder %s4380_s14, %s4440_s12 }
 0xb77   : > { %p3726_p11 = scmp.lt.u32.totalorder %s3724_s25, %s3720_s17  ;;  %p3728_p13 = scmp.lt.u32.totalorder %s3720_s17, %s4380_s14 }
 0xb78   : > { %p3722_p7 = pnand %p3721_p6, %p3912_p4 }
 0xb79   : > { %p3727_p12 = por %p3726_p11, %p3725_p10 }
 0xb7a   : > { %p3723_p9 = pneg %p3722_p7 }
 0xb7b   : > { %p3729_p0 = por %p3728_p13, %p3727_p12 }
 0xb7d   : > { %p3730_p1 = pnand %p3729_p0, %p3723_p9 }
 0xb7f   : > { %3733 = shalt.err (!%p3730_p1)
}
 0xb80   : > { %3542 = dma.vmem_to_hbm [thread:$0]  (%p3912_p4), %s4382_s30, 128, %s4380_s14, %s3176_s19  }
 0xb81 PF: > { %p3548_p2 = scmp.ge.s32.totalorder %s3784_s26, 2  ;;  %s3202_s0 = sand.u32 1, %s3764_s21  }
 0xb82   : > { %s3203_s20 = scalar_lea.sflag [#allocation6], %s3202_s0 }
 0xb83   : > { %p3545_p3 = pnand %p3548_p2, %p3919_p8 }
 0xb85   : > { %3759 = dma.done.wait (!%p3545_p3), %s3203_s20, 128  }
 0xb86   : > { %3761 = vsyncadd (!%p3545_p3), %s3203_s20, 4294967168  ;;  %s25_s26 = sadd.s32 1, %s3784_s26   ;;  %s4449_s24 = sld [smem:[#allocation8_spill]] }
 0xb87   : > { %p22_p5 = scmp.ge.s32.totalorder %s25_s26, 4   ;;  %s4450_s25 = sld [smem:[#allocation9_spill]] }
 0xb88   : > { %s4451_s21 = smov %s3768_s22  ;;  %s4452_s22 = smov %s3772_s23 }
 0xb89   : > { %s4453_s23 = smov %s3925_s16  ;;  %24 = sbr.rel (!%p22_p5) target bundleno = 6 (0x6), region = 107 }
 0xb90   :  { %3208 = vsyncpa [#allocation6], 1 }
 0xb91   :  { %3210 = vsyncpa [#allocation6 + $0x1], 1 }

// kernel: tpu_custom_call.1
= control target key start
LH: loop header
LB: loop body
LE: loop exit
PB: predicated region body
PF: predicated region fallthrough
CT: control target
= control target key end

     0   :  { %s4428_s0 = inlined_call_operand.vmem [shape: f32[2,8,64], index: 0, kind: input, shape index: {}]   ;;  %s4429_s1 = inlined_call_operand.vmem [shape: f32[1,64], index: 1, kind: input, shape index: {}]   ;;  %s4430_s2 = inlined_call_operand.vmem [shape: f32[1,64], index: 2, kind: input, shape index: {}]   ;;  %s4431_s3 = inlined_call_operand.vmem [shape: bf16[64,192], index: 3, kind: input, shape index: {}]   ;;  %s4432_s4 = inlined_call_operand.vmem [shape: bf16[64,64], index: 4, kind: input, shape index: {}]   ;;  %s4433_s5 = inlined_call_operand.vmem [shape: f32[1,64], index: 5, kind: input, shape index: {}]   ;;  %s4434_s6 = inlined_call_operand.vmem [shape: f32[1,64], index: 6, kind: input, shape index: {}]   ;;  %s4435_s7 = inlined_call_operand.vmem [shape: f32[1,64], index: 7, kind: input, shape index: {}]   ;;  %s4436_s8 = inlined_call_operand.vmem [shape: bf16[64,256], index: 8, kind: input, shape index: {}]   ;;  %s4437_s9 = inlined_call_operand.vmem [shape: f32[1,256], index: 9, kind: input, shape index: {}]   ;;  %s4438_s10 = inlined_call_operand.vmem [shape: bf16[256,64], index: 10, kind: input, shape index: {}]   ;;  %s4439_s11 = inlined_call_operand.vmem [shape: f32[1,64], index: 11, kind: input, shape index: {}]   ;;  %s4440_s12 = inlined_call_operand.hbm [shape: f32[2,8,64], index: 12, kind: output, shape index: {}]  }
   0x1   :  { %4443 = sst [smem:[#allocation10_spill]] %s4428_s0 }
   0x2   :  { %17 = vsyncpa [#allocation6], 0 }
   0x3   :  { %19 = vsyncpa [#allocation6 + $0x1], 0  ;;  %s3872_s21 = smov 0   ;;  %s3874_s22 = smov 0  }
   0x4   :  { %s3876_s23 = smov 0   ;;  %s3878_s24 = smov 0  }
   0x5   :  { %s3880_s25 = smov 0   ;;  %s3882_s26 = smov 0  }
   0x6 LB: > { %4444 = sst [smem:[#allocation8_spill]] %s3780_s25  ;;  %s3258_s27 = sadd.s32 4294967295, %s3784_s26   ;;  %s3784_s26 = sphi %s3882_s26, %s25_s26   ;;  %s3780_s25 = sphi %s3880_s25, %s4450_s25   ;;  %s3776_s24 = sphi %s3878_s24, %s4449_s24   ;;  %s3772_s23 = sphi %s3876_s23, %s4453_s23   ;;  %s3768_s22 = sphi %s3874_s22, %s4452_s22   ;;  %s3764_s21 = sphi %s3872_s21, %s4451_s21  }
   0x7   : > { %s3259_s28 = sadd.s32 4294967294, %s3784_s26   ;;  %s37_s29 = sadd.s32 1, %s3780_s25 }
   0x8   : > { %s303_s30 = sadd.s32 1, %s3772_s23  ;;  %p39_p0 = scmp.ge.s32.totalorder %s37_s29, 2 }
   0x9   : > { %p313_p1 = scmp.ne.s32.totalorder %s3772_s23, %s3768_s22  ;;  %p314_p2 = scmp.eq.s32.totalorder %s3258_s27, 1 }
   0xa   : > { %p319_p3 = scmp.ne.s32.totalorder %s3768_s22, %s3764_s21  ;;  %s4455_s29 = smov (%p39_p0, %s37_s29), 0 }
   0xb   : > { %4445 = sst [smem:[#allocation9_spill]] %s4455_s29  ;;  %p3912_p4 = por %p314_p2, %p313_p1 }
   0xc   : > { %p320_p5 = scmp.eq.s32.totalorder %s3259_s28, 1  ;;  %s298_s14 = ssub.s32 %s3780_s25, %s4455_s29 }
   0xd   : > { %p3262_p6 = scmp.ge.s32.totalorder %s3784_s26, 1  ;;  %p301_p7 = scmp.eq.s32.totalorder %s298_s14, 0 }
   0xe   : > { %p3919_p8 = por %p320_p5, %p319_p3  ;;  %p378_p9 = scmp.lt.s32.totalorder %s3784_s26, 3 }
   0xf   : > { %s3925_s16 = scalar_select %p301_p7, %s3772_s23, %s303_s30  }
  0x10   : > { %p379_p10 = pnand %p3262_p6, %p378_p9 }
  0x11   : > { %p419_p11 = scmp.lt.s32.totalorder (!%p379_p10), %s3776_s24, 1  ;;  %vm431_vm0 = vcmask (!%p379_p10), 523264   ;;  %s4448_s0 = sld [smem:[#allocation10_spill]] (!%p379_p10)  ;;  %v3617_v2 = vld [vmem:[%s4431_s3] ss:$8 sps:$4 sm:$0xff] (!%p379_p10)   ;;  %v3787_v8 = vmov (!%p379_p10), 0.0   ;;  %v686_v60 = vlaneseq (!%p379_p10) }
  0x12   : > { %382 = sbr.rel (%p379_p10) target bundleno = 2945 (0xb81), region = 68  ;;  %v3619_v3 = vld [vmem:[%s4431_s3 + $0x4] ss:$8 sps:$4 sm:$0xff] (!%p379_p10)   ;;  %s3786_s25 = smov (!%p379_p10), 64   ;;  %v3620_v4 = vld [vmem:[%s4431_s3 + $0x14] ss:$8 sps:$4 sm:$0xff] (!%p379_p10)   ;;  %3410 = vmatprep.subr.bf16.mxu1 (!%p379_p10), %v3787_v8  ;;  %3434 = vmatprep.subr.bf16.mxu0 (!%p379_p10), %v3787_v8 }
  0x13   : > { %503 = vrot.lane.b32.xlu1 (!%p379_p10), %v3617_v2, %s3786_s25  ;;  %v3622_v5 = vld [vmem:[%s4431_s3 + $0x20] ss:$8 sps:$4 sm:$0xff] (!%p379_p10)   ;;  %v3625_v6 = vld [vmem:[%s4431_s3 + $0x24] ss:$8 sps:$4 sm:$0xff] (!%p379_p10)   ;;  %v3626_v7 = vld [vmem:[%s4431_s3 + $0x30] ss:$8 sps:$4 sm:$0xff] (!%p379_p10)  }
  0x14   : > { %v3628_v9 = vld [vmem:[%s4431_s3 + $0x34] ss:$8 sps:$4 sm:$0xff] (!%p379_p10)   ;;  %v3624_v18 = vld [vmem:[%s4431_s3 + $0x10] ss:$8 sps:$4 sm:$0xff] (!%p379_p10)   ;;  %vm3788_vm1 = vmmov (!%p379_p10), 0   ;;  %vm461_vm2 = vcmask (!%p379_p10), 519168  }
  0x15   : > { %3418 = vmatprep.mubr.msk.bf16.mxu1 (!%p379_p10), %vm3788_vm1, %v3787_v8  ;;  %3436 = vmatprep.mubr.msk.bf16.mxu0 (!%p379_p10), %vm3788_vm1, %v3787_v8  ;;  %v3265_v32 = vld [vmem:[%s4429_s1] ss:$0 sm:$0xff] (!%p379_p10)  ;;  %v3630_v39 = vld [vmem:[%s4431_s3 + $0x10] ss:$8 sps:$4 sm:$0xff] (!%p379_p10)   ;;  %s3791_s19 = smov (!%p379_p10), 96   ;;  %s3792_s20 = smov (!%p379_p10), 104  }
  0x16   : > { %v3266_v34 = vld [vmem:[%s4430_s2] ss:$0 sm:$0xff] (!%p379_p10)  ;;  %v3632_v41 = vld [vmem:[%s4431_s3 + $0x30] ss:$8 sps:$4 sm:$0xff] (!%p379_p10)   ;;  %s3793_s28 = smov (!%p379_p10), 88   ;;  %s3794_s29 = smov (!%p379_p10), 80  }
  0x17   : > { %505 = vrot.lane.b32.xlu1 (!%p379_p10), %v3619_v3, %s3786_s25  ;;  %v3629_v37 = vld [vmem:[%s4431_s3] ss:$8 sps:$4 sm:$0xff] (!%p379_p10)   ;;  %s3795_s30 = smov (!%p379_p10), 72   ;;  %v3796_v58 = vmov (!%p379_p10), 1983009808   ;;  %vm1095_vm3 = vcmask (!%p379_p10), 1043456  }
  0x18   : > { %v3631_v40 = vld [vmem:[%s4431_s3 + $0x20] ss:$8 sps:$4 sm:$0xff] (!%p379_p10)   ;;  %v684_v59 = vunpack.c.l.s4 (!%p379_p10), %v3796_v58  ;;  %vm1091_vm4 = vcmask (!%p379_p10), 64512   ;;  %vm2479_vm5 = vcmask (!%p379_p10), 1041409   ;;  %vm2481_vm6 = vcmask (!%p379_p10), 1042434  }
  0x19   : > { %s420_s17 = scalar_select %p419_p11, %s3776_s24, 1  ;;  %vm2483_vm7 = vcmask 1043459   ;;  %vm2485_vm8 = vcmask 1044484   ;;  %vm2487_vm9 = vcmask 1045509   ;;  %vm2489_vm10 = vcmask 1046534  }
  0x1a   : > { %v685_v63 = vunpack.c.0.s8 %v684_v59  ;;  %vm2491_vm11 = vcmask 1047559   ;;  %vm2755_vm12 = vcmask 130048   ;;  %vm2757_vm13 = vcmask 195584  }
  0x1b   : > { %s3264_s18 = sshll.u32 %s420_s17, 3  ;;  %509 = vrot.lane.b32.xlu1 %v3620_v4, %s3786_s25  ;;  %s3789_s17 = smov 112   ;;  %vm2759_vm14 = vcmask 261120   ;;  %vm2761_vm15 = vcmask 326656  }
  0x1c   : > { %s3932_s27 = scalar_lea.vmem %s4448_s0, %s3264_s18  ;;  %s3790_s18 = smov 120  }
  0x1d   : > { %v428_v0 = vld [vmem:[%s3932_s27] sm:$0xff] }
  0x1e   : > { %v432_v1 = vsel %vm431_vm0, %v428_v0, 0.0 }
  0x1f   : > { %433 = vadd.xlane.f32.xlu0 %v432_v1  ;;  %511 = vrot.lane.b32.xlu1 %v3622_v5, %s3786_s25  ;;  %v3797_v5 = vmov 1934713408  }
  0x23   : > { %513 = vrot.lane.b32.xlu1 %v3625_v6, %s3786_s25  ;;  %v748_v6 = vunpack.c.l.s4 %v3797_v5 }
  0x27   : > { %515 = vrot.lane.b32.xlu1 %v3626_v7, %s3786_s25 }
  0x2b   : > { %517 = vrot.lane.b32.xlu1 %v3628_v9, %s3786_s25 }
  0x85   : > { %v504_v10 = vpop.permute.xlu1 %503 }
  0x89   : > { %v506_v12 = vpop.permute.xlu1 %505 }
  0x8a   : > { %v520_v14 = vsel %vm431_vm0, %v504_v10, %v506_v12 }
  0x8b   : > { %3411 = vmatpush3.bf16.msra.mxu1 %v520_v14  ;;  %v749_v14 = vunpack.c.0.s8 %v748_v6 }
  0x8c   : > { %3412 = vmatprep.subr.bf16.mxu1 %v3787_v8 }
  0x8d   : > { %v510_v19 = vpop.permute.xlu1 %509 }
  0x91   : > { %v512_v20 = vpop.permute.xlu1 %511 }
  0x95   : > { %v514_v21 = vpop.permute.xlu1 %513 }
  0x96   : > { %v522_v28 = vsel %vm431_vm0, %v512_v20, %v514_v21 }
  0x99   : > { %v516_v24 = vpop.permute.xlu1 %515 }
  0x9d   : > { %v518_v29 = vpop.permute.xlu1 %517 }
  0x9e   : > { %v523_v30 = vsel %vm431_vm0, %v516_v24, %v518_v29 }
  0xac   : > { %v434_v11 = vpop.xlane.xlu0 %433 }
  0xad   : > { %v436_v13 = vmul.f32 0.015625, %v434_v11 }
  0xaf   : > { %v437_v15 = vsub.f32 %v428_v0, %v436_v13  ;;  %v4031_v0 = vshrl.u32 %v686_v60, 7 }
  0xb1   : > { %v438_v16 = vmul.f32 %v437_v15, %v437_v15  ;;  %v4034_v3 = vsub.s32 %v685_v63, %v4031_v0  ;;  %v4041_v24 = vsub.s32 %v749_v14, %v4031_v0 }
  0xb3   : > { %v439_v17 = vsel %vm431_vm0, %v438_v16, 0.0 }
  0xb4   : > { %440 = vadd.xlane.f32.xlu0 %v439_v17 }
  0xca   : > { %507 = vrot.lane.b32.xlu0 %v3624_v18, %s3786_s25 }
 0x141   : > { %v441_v22 = vpop.xlane.xlu0 %440 }
 0x142   : > { %v442_v23 = vmul.f32 0.015625, %v441_v22 }
 0x144   : > { %v443_v25 = vadd.f32 1e-05, %v442_v23 }
 0x145   : > { %v508_v26 = vpop.permute.xlu0 %507 }
 0x146   : > { %3665 = vrsqrt.f32 %v443_v25  ;;  %v521_v27 = vsel %vm431_vm0, %v508_v26, %v510_v19 }
 0x147   : > { %3413 = vmatpush3.bf16.msra.mxu1 %v521_v27 }
 0x148   : > { %3414 = vmatprep.subr.bf16.mxu1 %v3787_v8 }
 0x14b   : > { %3415 = vmatpush3.bf16.msra.mxu1 %v522_v28 }
 0x14c   : > { %3416 = vmatprep.subr.bf16.mxu1 %v3787_v8 }
 0x14f   : > { %3417 = vmatpush3.bf16.msra.mxu1 %v523_v30 }
 0x150   : > { %v3666_v31 = vpop.eup %3665  ;;  %3422 = vmatprep.subr.bf16.mxu1 %v3787_v8 }
 0x151   : > { %v445_v33 = vmul.f32 %v3666_v31, %v437_v15 }
 0x153   : > { %v452_v35 = vmul.f32 %v3265_v32, %v445_v33 }
 0x155   : > { %v459_v36 = vadd.f32 %v3266_v34, %v452_v35 }
 0x157   : > { %v460_v38 = vpack.c.bf16 %v459_v36, %v459_v36 }
 0x159   : > { %462 = vst.msk [vmem:[#allocation2] sm:$0xf] %vm461_vm2, %v460_v38  ;;  %3419 = vmatmul.mubr.msk.bf16.vlgmr.msra.gmra.mrb[0].mxu1 %vm431_vm0, %v460_v38 }
 0x15a   : > { %3423 = vmatpush3.bf16.msra.mxu1 %v3629_v37  ;;  %3430 = vmatprep.mubr.msk.bf16.mxu1 %vm3788_vm1, %v3787_v8 }
 0x15b   : > { %3424 = vmatprep.subr.bf16.mxu1 %v3787_v8 }
 0x15e   : > { %3425 = vmatpush3.bf16.msra.mxu1 %v3630_v39 }
 0x15f   : > { %3426 = vmatprep.subr.bf16.mxu1 %v3787_v8 }
 0x160   : > { %v581_v42 = vld [vmem:[#allocation2] sm:$0xf] }
 0x162   : > { %3427 = vmatpush3.bf16.msra.mxu1 %v3631_v40 }
 0x163   : > { %3428 = vmatprep.subr.bf16.mxu1 %v3787_v8 }
 0x166   : > { %3429 = vmatpush3.bf16.msra.mxu1 %v3632_v41 }
 0x167   : > { %3440 = vmatprep.subr.bf16.mxu1 %v3787_v8 }
 0x169   : > { %3431 = vmatmul.mubr.msk.bf16.vlgmr.msra.gmra.mrb[4].mxu1 %vm431_vm0, %v581_v42 }
 0x16a   : > { %3442 = vmatprep.mubr.msk.bf16.mxu1 %vm3788_vm1, %v3787_v8 }
 0x22c   : > { %v565_v43 = vpop.f32.mrb[0].mxu1 }
 0x22d   : > { %v4012_v44 = vpack.c.bf16 %v565_v43, %v565_v43  ;;  %v3420_v45 = vpop.f32.mrb[1].mxu1 }
 0x22e   : > { %v568_v46 = vpop.f32.mrb[2].mxu1 }
 0x22f   : > { %572 = vst.msk [vmem:[#allocation3] sm:$0xf] %vm461_vm2, %v4012_v44  ;;  %v3421_v47 = vpop.f32.mrb[3].mxu1 }
 0x236   : > { %v825_v48 = vld [vmem:[#allocation3] sm:$0xf] }
 0x237   : > { %830 = vrot.lane.b32.xlu0 %v825_v48, %s3789_s17  ;;  %827 = vrot.lane.b32.xlu1 %v825_v48, %s3790_s18 }
 0x23b   : > { %836 = vrot.lane.b32.xlu0 %v825_v48, %s3791_s19  ;;  %833 = vrot.lane.b32.xlu1 %v825_v48, %s3792_s20 }
 0x23c   : > { %v652_v49 = vpop.f32.mrb[4].mxu1 }
 0x23d   : > { %v658_v50 = vmul.f32 0.35355338, %v652_v49  ;;  %v3432_v51 = vpop.f32.mrb[5].mxu1 }
 0x23e   : > { %v655_v52 = vpop.f32.mrb[6].mxu1 }
 0x23f   : > { %v3433_v53 = vpop.f32.mrb[7].mxu1  ;;  %839 = vrot.lane.b32.xlu1 %v825_v48, %s3793_s28  ;;  %660 = vrot.lane.b32.xlu0 %v658_v50, %s3790_s18 }
 0x243   : > { %663 = vrot.lane.b32.xlu1 %v658_v50, %s3789_s17  ;;  %666 = vrot.lane.b32.xlu0 %v658_v50, %s3792_s20 }
 0x247   : > { %669 = vrot.lane.b32.xlu1 %v658_v50, %s3791_s19  ;;  %672 = vrot.lane.b32.xlu0 %v658_v50, %s3793_s28 }
 0x24b   : > { %675 = vrot.lane.b32.xlu1 %v658_v50, %s3794_s29  ;;  %678 = vrot.lane.b32.xlu0 %v658_v50, %s3795_s30 }
 0x24f   : > { %842 = vrot.lane.b32.xlu1 %v825_v48, %s3794_s29  ;;  %845 = vrot.lane.b32.xlu0 %v825_v48, %s3795_s30 }
 0x272   : > { %963 = vxpose.xlu1.c.b16.start.end [1/1] (short) (narrow) %v825_v48, 16 }
 0x2a9   : > { %v831_v54 = vpop.permute.xlu0 %830  ;;  %v828_v55 = vpop.permute.xlu1 %827 }
 0x2aa   : > { %979 = vxpose.xlu0.c.b16.start.end [1/1] (short) (narrow) %v828_v55, 16 }
 0x2ad   : > { %v837_v56 = vpop.permute.xlu0 %836  ;;  %v834_v57 = vpop.permute.xlu1 %833 }
 0x2ae   : > { %1011 = vxpose.xlu1.c.b16.start.end [1/1] (short) (narrow) %v834_v57, 16  ;;  %995 = vxpose.xlu0.c.b16.start.end [1/1] (short) (narrow) %v831_v54, 16 }
 0x2b1   : > { %v840_v61 = vpop.permute.xlu1 %839  ;;  %v661_v62 = vpop.permute.xlu0 %660 }
 0x2b2   : > { %1043 = vxpose.xlu1.c.b16.start.end [1/1] (short) (narrow) %v840_v61, 16  ;;  %1027 = vxpose.xlu0.c.b16.start.end [1/1] (short) (narrow) %v837_v56, 16 }
 0x2b5   : > { %v664_v1 = vpop.permute.xlu1 %663  ;;  %v667_v2 = vpop.permute.xlu0 %666 }
 0x2b6   : > { %v681_v4 = vcombine.low %v658_v50, %v664_v1  ;;  %v697_v7 = vcombine.low %v661_v62, %v667_v2  ;;  %v682_v9 = vcombine.high %v658_v50, %v664_v1  ;;  %v698_v10 = vcombine.high %v661_v62, %v667_v2 }
 0x2b8   : > { %v689_v13 = vrot.slane %v681_v4, %v4034_v3  ;;  %v705_v15 = vrot.slane %v697_v7, %v4034_v3  ;;  %v696_v16 = vrot.slane %v682_v9, %v4034_v3  ;;  %v712_v17 = vrot.slane %v698_v10, %v4034_v3 }
 0x2b9   : > { %v670_v11 = vpop.permute.xlu1 %669  ;;  %v673_v12 = vpop.permute.xlu0 %672 }
 0x2ba   : > { %v745_v25 = vcombine.low %v689_v13, %v705_v15  ;;  %v746_v26 = vcombine.high %v689_v13, %v705_v15  ;;  %v761_v31 = vcombine.low %v696_v16, %v712_v17  ;;  %v762_v32 = vcombine.high %v696_v16, %v712_v17 }
 0x2bb   : > { %v3798_v13 = vmov 0  }
 0x2bc   : > { %v753_v39 = vrot.slane %v745_v25, %v4041_v24  ;;  %v760_v40 = vrot.slane %v746_v26, %v4041_v24  ;;  %v769_v46 = vrot.slane %v761_v31, %v4041_v24  ;;  %v776_v47 = vrot.slane %v762_v32, %v4041_v24 }
 0x2bd   : > { %v676_v18 = vpop.permute.xlu1 %675  ;;  %v679_v19 = vpop.permute.xlu0 %678 }
 0x2be   : > { %v713_v20 = vcombine.low %v670_v11, %v676_v18  ;;  %v714_v21 = vcombine.high %v670_v11, %v676_v18  ;;  %v729_v22 = vcombine.low %v673_v12, %v679_v19  ;;  %v730_v23 = vcombine.high %v673_v12, %v679_v19 }
 0x2c0   : > { %v721_v27 = vrot.slane %v713_v20, %v4034_v3  ;;  %v728_v28 = vrot.slane %v714_v21, %v4034_v3  ;;  %v737_v29 = vrot.slane %v729_v22, %v4034_v3  ;;  %v744_v30 = vrot.slane %v730_v23, %v4034_v3 }
 0x2c1   : > { %v843_v33 = vpop.permute.xlu1 %842  ;;  %v846_v34 = vpop.permute.xlu0 %845 }
 0x2c2   : > { %v777_v35 = vcombine.low %v721_v27, %v737_v29  ;;  %v778_v36 = vcombine.high %v721_v27, %v737_v29  ;;  %v793_v37 = vcombine.low %v728_v28, %v744_v30  ;;  %v794_v38 = vcombine.high %v728_v28, %v744_v30  ;;  %1059 = vxpose.xlu0.c.b16.start.end [1/1] (short) (narrow) %v843_v33, 16 }
 0x2c3   : > { %1075 = vxpose.xlu1.c.b16.start.end [1/1] (short) (narrow) %v846_v34, 16 }
 0x2c4   : > { %v785_v41 = vrot.slane %v777_v35, %v4041_v24  ;;  %v792_v42 = vrot.slane %v778_v36, %v4041_v24  ;;  %v801_v43 = vrot.slane %v793_v37, %v4041_v24  ;;  %v808_v45 = vrot.slane %v794_v38, %v4041_v24 }
 0x2c6   : > { %v809_v48 = vcombine.low %v753_v39, %v785_v41  ;;  %v810_v49 = vcombine.high %v753_v39, %v785_v41  ;;  %v811_v50 = vcombine.low %v760_v40, %v792_v42  ;;  %v812_v51 = vcombine.high %v760_v40, %v792_v42 }
 0x2c7   : > { %v813_v52 = vcombine.low %v769_v46, %v801_v43  ;;  %v814_v53 = vcombine.high %v769_v46, %v801_v43  ;;  %v815_v54 = vcombine.low %v776_v47, %v808_v45  ;;  %v816_v55 = vcombine.high %v776_v47, %v808_v45 }
 0x2c9   : > { %v3282_v56 = vpack.c.bf16 %v813_v52, %v809_v48  ;;  %v3283_v57 = vpack.c.bf16 %v815_v54, %v811_v50  ;;  %v3284_v58 = vpack.c.bf16 %v814_v53, %v810_v49  ;;  %v3285_v59 = vpack.c.bf16 %v816_v55, %v812_v51 }
 0x2cb   : > { %v878_v61 = vrot.slane %v3282_v56, %v4034_v3  ;;  %v886_v62 = vrot.slane %v3283_v57, %v4034_v3  ;;  %v912_v63 = vrot.slane %v3284_v58, %v4034_v3  ;;  %v920_v1 = vrot.slane %v3285_v59, %v4034_v3  ;;  %576 = vrot.lane.b32.xlu0 %v4012_v44, %s3786_s25  ;;  %s3802_s25 = smov 24  }
 0x2cd   : > { %v888_v2 = vcombine.high %v878_v61, %v886_v62  ;;  %v922_v4 = vcombine.high %v912_v63, %v920_v1  ;;  %v887_v11 = vcombine.low %v878_v61, %v886_v62  ;;  %v921_v12 = vcombine.low %v912_v63, %v920_v1 }
 0x2cf   : > { %v902_v5 = vrot.slane %v888_v2, %v4041_v24  ;;  %v936_v6 = vrot.slane %v922_v4, %v4041_v24  ;;  %v895_v19 = vrot.slane %v887_v11, %v4041_v24  ;;  %v929_v20 = vrot.slane %v921_v12, %v4041_v24 }
 0x2d1   : > { %v953_v7 = vpack.i.b16 %v936_v6, %v902_v5  ;;  %v954_v9 = vshrl.u32 %v902_v5, 16  ;;  %v955_v10 = vshrl.u32 %v936_v6, 16  ;;  %v4064_v14 = vcombine.high %v902_v5, %v3798_v13 }
 0x2d2   : > { %v4067_v15 = vcombine.high %v936_v6, %v3798_v13  ;;  %v941_v25 = vpack.i.b16 %v929_v20, %v895_v19  ;;  %v942_v26 = vshrl.u32 %v895_v19, 16  ;;  %v943_v27 = vshrl.u32 %v929_v20, 16 }
 0x2d3   : > { %v956_v16 = vpack.i.b16 %v955_v10, %v954_v9  ;;  %v960_v17 = vshrl.u32 %v4064_v14, 16  ;;  %v903_v31 = vcombine.high %v895_v19, %v3798_v13  ;;  %v937_v32 = vcombine.high %v929_v20, %v3798_v13 }
 0x2d4   : > { %v959_v44 = vpack.i.b16 %v4067_v15, %v4064_v14  ;;  %v961_v18 = vshrl.u32 %v4067_v15, 16  ;;  %v944_v30 = vpack.i.b16 %v943_v27, %v942_v26 }
 0x2d5   : > { %v947_v37 = vpack.i.b16 %v937_v32, %v903_v31  ;;  %v948_v38 = vshrl.u32 %v903_v31, 16  ;;  %v949_v39 = vshrl.u32 %v937_v32, 16 }
 0x2d6   : > { %v962_v21 = vpack.i.b16 %v961_v18, %v960_v17 }
 0x2d7   : > { %v950_v43 = vpack.i.b16 %v949_v39, %v948_v38 }
 0x2d8   : > { %v971_v22 = vpop.trf.xlu1 }
 0x2d9   : > { %v1097_v23 = vsel %vm1095_vm3, %v971_v22, 0 }
 0x2da   : > { %3435 = vmatpush3.bf16.msra.mxu0 %v1097_v23 }
 0x2db   : > { %3446 = vmatprep.subr.bf16.mxu0 %v3787_v8 }
 0x2dd   : > { %3437 = vmatmul.mubr.msk.bf16.vlgmr.msra.gmra.mrb[0].mxu0 %vm1091_vm4, %v941_v25 }
 0x2de   : > { %3448 = vmatprep.mubr.msk.bf16.mxu0 %vm3788_vm1, %v3787_v8 }
 0x310   : > { %v987_v28 = vpop.trf.xlu0 }
 0x311   : > { %v1143_v29 = vsel %vm1095_vm3, %v987_v28, 0 }
 0x312   : > { %3441 = vmatpush3.bf16.msra.mxu1 %v1143_v29 }
 0x313   : > { %3452 = vmatprep.subr.bf16.mxu1 %v3787_v8 }
 0x314   : > { %v1003_v33 = vpop.trf.xlu0  ;;  %v1019_v34 = vpop.trf.xlu1 }
 0x315   : > { %v1189_v35 = vsel %vm1095_vm3, %v1003_v33, 0  ;;  %3443 = vmatmul.mubr.msk.bf16.vlgmr.msra.gmra.mrb[8].mxu1 %vm1091_vm4, %v944_v30  ;;  %v1235_v36 = vsel %vm1095_vm3, %v1019_v34, 0 }
 0x316   : > { %3447 = vmatpush3.bf16.msra.mxu0 %v1189_v35  ;;  %3453 = vmatpush3.bf16.msra.mxu1 %v1235_v36 }
 0x317   : > { %3454 = vmatprep.mubr.msk.bf16.mxu1 %vm3788_vm1, %v3787_v8  ;;  %3458 = vmatprep.subr.bf16.mxu0 %v3787_v8 }
 0x318   : > { %v1035_v40 = vpop.trf.xlu0  ;;  %v1051_v41 = vpop.trf.xlu1  ;;  %3464 = vmatprep.subr.bf16.mxu1 %v3787_v8 }
 0x319   : > { %3449 = vmatmul.mubr.msk.bf16.vlgmr.msra.gmra.mrb[4].mxu0 %vm1091_vm4, %v947_v37  ;;  %v1281_v42 = vsel %vm1095_vm3, %v1035_v40, 0  ;;  %v1327_v45 = vsel %vm1095_vm3, %v1051_v41, 0 }
 0x31a   : > { %3459 = vmatpush3.bf16.msra.mxu0 %v1281_v42  ;;  %3460 = vmatprep.mubr.msk.bf16.mxu0 %vm3788_vm1, %v3787_v8 }
 0x31b   : > { %3470 = vmatprep.subr.bf16.mxu0 %v3787_v8 }
 0x31d   : > { %3455 = vmatmul.mubr.msk.bf16.vlgmr.msra.gmra.mrb[12].mxu1 %vm1091_vm4, %v950_v43 }
 0x31e   : > { %3465 = vmatpush3.bf16.msra.mxu1 %v1327_v45  ;;  %3466 = vmatprep.mubr.msk.bf16.mxu1 %vm3788_vm1, %v3787_v8 }
 0x31f   : > { %3476 = vmatprep.subr.bf16.mxu1 %v3787_v8 }
 0x321   : > { %3461 = vmatmul.mubr.msk.bf16.vlgmr.msra.gmra.mrb[8].mxu0 %vm1091_vm4, %v953_v7 }
 0x322   : > { %3472 = vmatprep.mubr.msk.bf16.mxu0 %vm3788_vm1, %v3787_v8 }
 0x325   : > { %3467 = vmatmul.mubr.msk.bf16.vlgmr.msra.gmra.mrb[16].mxu1 %vm1091_vm4, %v956_v16 }
 0x326   : > { %3478 = vmatprep.mubr.msk.bf16.mxu1 %vm3788_vm1, %v3787_v8 }
 0x328   : > { %v1067_v46 = vpop.trf.xlu0 }
 0x329   : > { %v1083_v47 = vpop.trf.xlu1  ;;  %v1373_v48 = vsel %vm1095_vm3, %v1067_v46, 0 }
 0x32a   : > { %v1419_v49 = vsel %vm1095_vm3, %v1083_v47, 0  ;;  %3471 = vmatpush3.bf16.msra.mxu0 %v1373_v48 }
 0x32b   : > { %3477 = vmatpush3.bf16.msra.mxu1 %v1419_v49  ;;  %3482 = vmatprep.subr.bf16.mxu0 %v3787_v8 }
 0x32c   : > { %3488 = vmatprep.subr.bf16.mxu1 %v3787_v8 }
 0x32d   : > { %3473 = vmatmul.mubr.msk.bf16.vlgmr.msra.gmra.mrb[12].mxu0 %vm1091_vm4, %v959_v44 }
 0x32e   : > { %3479 = vmatmul.mubr.msk.bf16.vlgmr.msra.gmra.mrb[20].mxu1 %vm1091_vm4, %v962_v21  ;;  %3484 = vmatprep.mubr.msk.bf16.mxu0 %vm3788_vm1, %v3787_v8 }
 0x32f   : > { %3490 = vmatprep.mubr.msk.bf16.mxu1 %vm3788_vm1, %v3787_v8 }
 0x33d   : > { %v577_v50 = vpop.permute.xlu0 %576 }
 0x33e   : > { %579 = vst.msk [vmem:[#allocation4] sm:$0xf] %vm461_vm2, %v577_v50  ;;  %vm2765_vm2 = vcmask 457728  }
 0x345   : > { %v4118_v51 = vld [vmem:[#allocation4] sm:$0xf] }
 0x346   : > { %853 = vrot.lane.b32.xlu0 %v4118_v51, %s3789_s17  ;;  %850 = vrot.lane.b32.xlu1 %v4118_v51, %s3790_s18  ;;  %s3803_s18 = smov 32   ;;  %s416_s17 = sand.u32 1, %s3768_s22  }
 0x34a   : > { %859 = vrot.lane.b32.xlu1 %v4118_v51, %s3791_s19  ;;  %s3804_s19 = smov 40  }
 0x3b0   : > { %v1133_v52 = vpop.f32.mrb[0].mxu0 }
 0x3b1   : > { %v3438_v53 = vpop.f32.mrb[1].mxu0  ;;  %v1461_v54 = vsel %vm1091_vm4, %v1133_v52, -inf }
 0x3b2   : > { %v1136_v55 = vpop.f32.mrb[2].mxu0  ;;  %1462 = vmax.xlane.f32.xlu1 %v1461_v54 }
 0x3b3   : > { %v3439_v56 = vpop.f32.mrb[3].mxu0 }
 0x3b8   : > { %v851_v31 = vpop.permute.xlu1 %850  ;;  %v854_v32 = vpop.permute.xlu0 %853 }
 0x3bc   : > { %v4144_v33 = vpop.permute.xlu1 %859 }
 0x3c3   : > { %862 = vrot.lane.b32.xlu1 %v4118_v51, %s3793_s28  ;;  %s3799_s28 = smov 16  }
 0x3e8   : > { %v1179_v57 = vpop.f32.mrb[8].mxu1 }
 0x3e9   : > { %v3444_v58 = vpop.f32.mrb[9].mxu1  ;;  %v1464_v59 = vsel %vm1091_vm4, %v1179_v57, -inf }
 0x3ea   : > { %1465 = vmax.xlane.f32.xlu0 %v1464_v59  ;;  %v1182_v61 = vpop.f32.mrb[10].mxu1 }
 0x3eb   : > { %v3445_v62 = vpop.f32.mrb[11].mxu1 }
 0x3ec   : > { %v1225_v63 = vpop.f32.mrb[4].mxu0 }
 0x3ed   : > { %v3450_v1 = vpop.f32.mrb[5].mxu0  ;;  %v1467_v2 = vsel %vm1091_vm4, %v1225_v63, -inf }
 0x3ee   : > { %v1228_v4 = vpop.f32.mrb[6].mxu0  ;;  %1468 = vmax.xlane.f32.xlu1 %v1467_v2 }
 0x3ef   : > { %v3451_v5 = vpop.f32.mrb[7].mxu0 }
 0x3f0   : > { %v1271_v6 = vpop.f32.mrb[12].mxu1 }
 0x3f1   : > { %v3456_v7 = vpop.f32.mrb[13].mxu1  ;;  %v1470_v9 = vsel %vm1091_vm4, %v1271_v6, -inf }
 0x3f2   : > { %1471 = vmax.xlane.f32.xlu0 %v1470_v9  ;;  %v1274_v10 = vpop.f32.mrb[14].mxu1 }
 0x3f3   : > { %v3457_v11 = vpop.f32.mrb[15].mxu1 }
 0x3f4   : > { %v1317_v12 = vpop.f32.mrb[8].mxu0 }
 0x3f5   : > { %v3462_v14 = vpop.f32.mrb[9].mxu0  ;;  %v1473_v15 = vsel %vm1091_vm4, %v1317_v12, -inf }
 0x3f6   : > { %v1320_v16 = vpop.f32.mrb[10].mxu0  ;;  %1474 = vmax.xlane.f32.xlu1 %v1473_v15 }
 0x3f7   : > { %v3463_v44 = vpop.f32.mrb[11].mxu0 }
 0x3f8   : > { %v4133_v17 = vpop.f32.mrb[16].mxu1 }
 0x3f9   : > { %v3468_v18 = vpop.f32.mrb[17].mxu1  ;;  %v1476_v37 = vsel %vm1091_vm4, %v4133_v17, -inf }
 0x3fa   : > { %v1366_v19 = vpop.f32.mrb[18].mxu1 }
 0x3fb   : > { %v3469_v20 = vpop.f32.mrb[19].mxu1 }
 0x400   : > { %v4135_v21 = vpop.f32.mrb[12].mxu0 }
 0x401   : > { %v4137_v22 = vpop.f32.mrb[20].mxu1  ;;  %v3474_v23 = vpop.f32.mrb[13].mxu0  ;;  %v1479_v25 = vsel %vm1091_vm4, %v4135_v21, -inf }
 0x402   : > { %v3480_v26 = vpop.f32.mrb[21].mxu1  ;;  %v1412_v27 = vpop.f32.mrb[14].mxu0  ;;  %1480 = vmax.xlane.f32.xlu1 %v1479_v25  ;;  %v1482_v54 = vsel %vm1091_vm4, %v4137_v22, -inf }
 0x403   : > { %v1458_v28 = vpop.f32.mrb[22].mxu1  ;;  %v3475_v29 = vpop.f32.mrb[15].mxu0 }
 0x404   : > { %v3481_v30 = vpop.f32.mrb[23].mxu1 }
 0x41f   : > { %1557 = vxpose.xlu0.c.b16.start.end [1/1] (short) (narrow) %v851_v31, 16 }
 0x423   : > { %1573 = vxpose.xlu0.c.b16.start.end [1/1] (short) (narrow) %v854_v32, 16 }
 0x42c   : > { %856 = vrot.lane.b32.xlu0 %v4118_v51, %s3792_s20  ;;  %s3805_s20 = smov 48  }
 0x42f   : > { %1541 = vxpose.xlu1.c.b16.start.end [1/1] (short) (narrow) %v4118_v51, 16 }
 0x43f   : > { %v1463_v34 = vpop.xlane.xlu1 %1462 }
 0x440   : > { %v1485_v35 = vsub.f32 %v1133_v52, %v1463_v34 }
 0x442   : > { %v1493_v36 = vmul.f32 1.442695, %v1485_v35 }
 0x443   : > { %v863_v41 = vpop.permute.xlu1 %862 }
 0x444   : > { %3667 = vpow2.f32 %v1493_v36 }
 0x44b   : > { %1477 = vmax.xlane.f32.xlu0 %v1476_v37 }
 0x44e   : > { %v4148_v38 = vpop.eup %3667 }
 0x44f   : > { %v1533_v39 = vpack.c.bf16 %v4148_v38, %v4148_v38 }
 0x451   : > { %v1673_v40 = vsel %vm1091_vm4, %v1533_v39, 0 }
 0x452   : > { %3483 = vmatpush3.bf16.xpose.msra.mxu0 %v1673_v40 }
 0x453   : > { %3494 = vmatprep.subr.bf16.mxu0 %v3787_v8 }
 0x461   : > { %865 = vrot.lane.b32.xlu0 %v4118_v51, %s3794_s29  ;;  %s3800_s29 = smov 8  }
 0x465   : > { %868 = vrot.lane.b32.xlu0 %v4118_v51, %s3795_s30  ;;  %s3801_s30 = smov 56  }
 0x477   : > { %v1466_v42 = vpop.xlane.xlu0 %1465 }
 0x478   : > { %v1486_v43 = vsub.f32 %v1179_v57, %v1466_v42 }
 0x47a   : > { %v1495_v45 = vmul.f32 1.442695, %v1486_v43 }
 0x47b   : > { %v1469_v46 = vpop.xlane.xlu1 %1468 }
 0x47c   : > { %3669 = vpow2.f32 %v1495_v45  ;;  %v1487_v47 = vsub.f32 %v1225_v63, %v1469_v46 }
 0x47e   : > { %v1497_v50 = vmul.f32 1.442695, %v1487_v47 }
 0x47f   : > { %v1472_v48 = vpop.xlane.xlu0 %1471 }
 0x480   : > { %v1488_v49 = vsub.f32 %v1271_v6, %v1472_v48 }
 0x482   : > { %v1499_v52 = vmul.f32 1.442695, %v1488_v49 }
 0x483   : > { %v1475_v53 = vpop.xlane.xlu1 %1474 }
 0x484   : > { %3671 = vpow2.f32 %v1499_v52  ;;  %1483 = vmax.xlane.f32.xlu0 %v1482_v54  ;;  %v1489_v55 = vsub.f32 %v1317_v12, %v1475_v53 }
 0x485   : > { %3673 = vpow2.f32 %v1497_v50  ;;  %v1565_v61 = vpop.trf.xlu0 }
 0x486   : > { %v3670_v51 = vpop.eup %3669  ;;  %v1501_v58 = vmul.f32 1.442695, %v1489_v55 }
 0x487   : > { %v1534_v56 = vpack.c.bf16 %v3670_v51, %v3670_v51  ;;  %v1512_v25 = vsel %vm1091_vm4, %v3670_v51, 0.0 }
 0x488   : > { %3675 = vpow2.f32 %v1501_v58 }
 0x489   : > { %v1719_v57 = vsel %vm1091_vm4, %v1534_v56, 0  ;;  %v1581_v11 = vpop.trf.xlu0 }
 0x48a   : > { %3489 = vmatpush3.bf16.xpose.msra.mxu1 %v1719_v57 }
 0x48b   : > { %3500 = vmatprep.subr.bf16.mxu1 %v3787_v8 }
 0x48e   : > { %v3672_v59 = vpop.eup %3671 }
 0x48f   : > { %v3674_v62 = vpop.eup %3673  ;;  %v1481_v63 = vpop.xlane.xlu1 %1480  ;;  %v1536_v1 = vpack.c.bf16 %v3672_v59, %v3672_v59 }
 0x490   : > { %v1491_v2 = vsub.f32 %v4135_v21, %v1481_v63  ;;  %v1535_v5 = vpack.c.bf16 %v3674_v62, %v3674_v62  ;;  %v1509_v21 = vsel %vm1091_vm4, %v4148_v38, 0.0  ;;  %v1515_v23 = vsel %vm1091_vm4, %v3674_v62, 0.0 }
 0x491   : > { %3491 = vmatmul.mubr.msk.bf16.vlgmr.msra.gmra.mrb[24].mxu1 %vm1091_vm4, %v1565_v61  ;;  %v1811_v4 = vsel %vm1091_vm4, %v1536_v1, 0 }
 0x492   : > { %3501 = vmatpush3.bf16.xpose.msra.mxu1 %v1811_v4  ;;  %3502 = vmatprep.mubr.msk.bf16.mxu1 %vm3788_vm1, %v3787_v8  ;;  %v1765_v7 = vsel %vm1091_vm4, %v1535_v5, 0  ;;  %v3676_v9 = vpop.eup %3675  ;;  %v1505_v19 = vmul.f32 1.442695, %v1491_v2  ;;  %v2446_v2 = vand.u32 127, %v686_v60 }
 0x493   : > { %3512 = vmatprep.subr.bf16.mxu1 %v3787_v8  ;;  %v1537_v10 = vpack.c.bf16 %v3676_v9, %v3676_v9  ;;  %v1521_v27 = vsel %vm1091_vm4, %v3676_v9, 0.0 }
 0x494   : > { %3677 = vpow2.f32 %v1505_v19 }
 0x495   : > { %v1549_v6 = vpop.trf.xlu1  ;;  %v1857_v12 = vsel %vm1091_vm4, %v1537_v10, 0 }
 0x496   : > { %3485 = vmatmul.mubr.msk.bf16.vlgmr.msra.gmra.mrb[16].mxu0 %vm1091_vm4, %v1549_v6  ;;  %v2449_v6 = vsub.s32 %v2446_v2, %v4031_v0 }
 0x497   : > { %3495 = vmatpush3.bf16.xpose.msra.mxu0 %v1765_v7  ;;  %3496 = vmatprep.mubr.msk.bf16.mxu0 %vm3788_vm1, %v3787_v8 }
 0x498   : > { %3506 = vmatprep.subr.bf16.mxu0 %v3787_v8 }
 0x49e   : > { %3497 = vmatmul.mubr.msk.bf16.vlgmr.msra.gmra.mrb[20].mxu0 %vm1091_vm4, %v1581_v11  ;;  %v857_v14 = vpop.permute.xlu0 %856  ;;  %v3678_v26 = vpop.eup %3677 }
 0x49f   : > { %3507 = vmatpush3.bf16.xpose.msra.mxu0 %v1857_v12  ;;  %3508 = vmatprep.mubr.msk.bf16.mxu0 %vm3788_vm1, %v3787_v8  ;;  %v1527_v29 = vsel %vm1091_vm4, %v3678_v26, 0.0  ;;  %v1539_v37 = vpack.c.bf16 %v3678_v26, %v3678_v26 }
 0x4a0   : > { %3518 = vmatprep.subr.bf16.mxu0 %v3787_v8 }
 0x4b1   : > { %1589 = vxpose.xlu0.c.b16.start.end [1/1] (short) (narrow) %v857_v14, 16 }
 0x4b5   : > { %1605 = vxpose.xlu0.c.b16.start.end [1/1] (short) (narrow) %v4144_v33, 16 }
 0x4b9   : > { %1621 = vxpose.xlu0.c.b16.start.end [1/1] (short) (narrow) %v863_v41, 16 }
 0x4d8   : > { %v1478_v15 = vpop.xlane.xlu0 %1477 }
 0x4d9   : > { %v1490_v44 = vsub.f32 %v4133_v17, %v1478_v15  ;;  %v1518_v17 = vsel %vm1091_vm4, %v3672_v59, 0.0 }
 0x4db   : > { %v1503_v20 = vmul.f32 1.442695, %v1490_v44 }
 0x4dc   : > { %v866_v16 = vpop.permute.xlu0 %865 }
 0x4dd   : > { %1637 = vxpose.xlu1.c.b16.start.end [1/1] (short) (narrow) %v866_v16, 16  ;;  %3679 = vpow2.f32 %v1503_v20 }
 0x4e0   : > { %v869_v18 = vpop.permute.xlu0 %868 }
 0x4e1   : > { %1653 = vxpose.xlu0.c.b16.start.end [1/1] (short) (narrow) %v869_v18, 16 }
 0x4e7   : > { %v3680_v28 = vpop.eup %3679 }
 0x4e8   : > { %v1524_v30 = vsel %vm1091_vm4, %v3680_v28, 0.0  ;;  %v1538_v34 = vpack.c.bf16 %v3680_v28, %v3680_v28 }
 0x4ea   : > { %1510 = vadd.xlane.f32.xlu1 %v1509_v21  ;;  %v1903_v36 = vsel %vm1091_vm4, %v1538_v34, 0 }
 0x4ee   : > { %1516 = vadd.xlane.f32.xlu1 %v1515_v23  ;;  %1513 = vadd.xlane.f32.xlu0 %v1512_v25 }
 0x4f2   : > { %1522 = vadd.xlane.f32.xlu1 %v1521_v27  ;;  %1519 = vadd.xlane.f32.xlu0 %v1518_v17 }
 0x4f6   : > { %1528 = vadd.xlane.f32.xlu1 %v1527_v29  ;;  %1525 = vadd.xlane.f32.xlu0 %v1524_v30 }
 0x511   : > { %v1484_v31 = vpop.xlane.xlu0 %1483 }
 0x512   : > { %v1492_v32 = vsub.f32 %v4137_v22, %v1484_v31  ;;  %v1949_v22 = vsel %vm1091_vm4, %v1539_v37, 0 }
 0x514   : > { %v1507_v33 = vmul.f32 1.442695, %v1492_v32 }
 0x516   : > { %3681 = vpow2.f32 %v1507_v33 }
 0x517   : > { %v1597_v35 = vpop.trf.xlu0 }
 0x518   : > { %3503 = vmatmul.mubr.msk.bf16.vlgmr.msra.gmra.mrb[28].mxu1 %vm1091_vm4, %v1597_v35 }
 0x519   : > { %3513 = vmatpush3.bf16.xpose.msra.mxu1 %v1903_v36  ;;  %3514 = vmatprep.mubr.msk.bf16.mxu1 %vm3788_vm1, %v3787_v8 }
 0x51a   : > { %3524 = vmatprep.subr.bf16.mxu1 %v3787_v8 }
 0x51b   : > { %v1613_v38 = vpop.trf.xlu0 }
 0x51c   : > { %3509 = vmatmul.mubr.msk.bf16.vlgmr.msra.gmra.mrb[24].mxu0 %vm1091_vm4, %v1613_v38 }
 0x51d   : > { %3519 = vmatpush3.bf16.xpose.msra.mxu0 %v1949_v22  ;;  %3520 = vmatprep.mubr.msk.bf16.mxu0 %vm3788_vm1, %v3787_v8 }
 0x51e   : > { %3530 = vmatprep.subr.bf16.mxu0 %v3787_v8 }
 0x51f   : > { %v1629_v39 = vpop.trf.xlu0 }
 0x520   : > { %v3682_v40 = vpop.eup %3681  ;;  %3515 = vmatmul.mubr.msk.bf16.vlgmr.msra.gmra.mrb[32].mxu1 %vm1091_vm4, %v1629_v39 }
 0x521   : > { %v1530_v41 = vsel %vm1091_vm4, %v3682_v40, 0.0  ;;  %v1540_v42 = vpack.c.bf16 %v3682_v40, %v3682_v40  ;;  %3526 = vmatprep.mubr.msk.bf16.mxu1 %vm3788_vm1, %v3787_v8 }
 0x522   : > { %1531 = vadd.xlane.f32.xlu0 %v1530_v41 }
 0x523   : > { %v1995_v43 = vsel %vm1091_vm4, %v1540_v42, 0 }
 0x524   : > { %3525 = vmatpush3.bf16.xpose.msra.mxu1 %v1995_v43 }
 0x543   : > { %v1645_v45 = vpop.trf.xlu1 }
 0x544   : > { %3521 = vmatmul.mubr.msk.bf16.vlgmr.msra.gmra.mrb[28].mxu0 %vm1091_vm4, %v1645_v45 }
 0x545   : > { %3538 = vmatprep.mubr.msk.bf16.mxu0 %vm3788_vm1, %v3787_v8  ;;  %vm2763_vm1 = vcmask 392192  }
 0x547   : > { %v1661_v46 = vpop.trf.xlu0 }
 0x548   : > { %3527 = vmatmul.mubr.msk.bf16.vlgmr.msra.gmra.mrb[36].mxu1 %vm1091_vm4, %v1661_v46 }
 0x549   : > { %2977 = vmatprep.mubr.bf16.mxu1 %v3798_v13 }
 0x564   : > { %v4209_v47 = vpop.f32.mrb[24].mxu1 }
 0x565   : > { %v3492_v48 = vpop.f32.mrb[25].mxu1 }
 0x566   : > { %v1758_v49 = vpop.f32.mrb[26].mxu1 }
 0x567   : > { %v3493_v50 = vpop.f32.mrb[27].mxu1 }
 0x569   : > { %v1709_v52 = vpop.f32.mrb[16].mxu0 }
 0x56a   : > { %v3486_v53 = vpop.f32.mrb[17].mxu0 }
 0x56b   : > { %v1712_v54 = vpop.f32.mrb[18].mxu0 }
 0x56c   : > { %v3487_v55 = vpop.f32.mrb[19].mxu0  ;;  %v2528_v54 = vsub.s32 0, %v4031_v0 }
 0x571   : > { %v1801_v51 = vpop.f32.mrb[20].mxu0 }
 0x572   : > { %v3498_v56 = vpop.f32.mrb[21].mxu0 }
 0x573   : > { %v1804_v58 = vpop.f32.mrb[22].mxu0  ;;  %v2535_v56 = vsub.s32 1, %v4031_v0 }
 0x574   : > { %v3499_v57 = vpop.f32.mrb[23].mxu0 }
 0x575   : > { %v2542_v57 = vsub.s32 2, %v4031_v0 }
 0x577   : > { %v1511_v59 = vpop.xlane.xlu1 %1510 }
 0x57b   : > { %v1514_v61 = vpop.xlane.xlu0 %1513  ;;  %v1517_v62 = vpop.xlane.xlu1 %1516 }
 0x57c   : > { %3683 = vrcp.f32 %v1514_v61  ;;  %v2549_v61 = vsub.s32 3, %v4031_v0 }
 0x57d   : > { %3685 = vrcp.f32 %v1511_v59 }
 0x57e   : > { %3687 = vrcp.f32 %v1517_v62 }
 0x57f   : > { %v1520_v63 = vpop.xlane.xlu0 %1519  ;;  %v1523_v13 = vpop.xlane.xlu1 %1522 }
 0x580   : > { %3689 = vrcp.f32 %v1520_v63  ;;  %v2556_v63 = vsub.s32 4, %v4031_v0 }
 0x581   : > { %3691 = vrcp.f32 %v1523_v13 }
 0x583   : > { %v1526_v1 = vpop.xlane.xlu0 %1525  ;;  %v1529_v4 = vpop.xlane.xlu1 %1528 }
 0x584   : > { %3693 = vrcp.f32 %v1526_v1  ;;  %v2563_v1 = vsub.s32 5, %v4031_v0 }
 0x585   : > { %3695 = vrcp.f32 %v1529_v4  ;;  %v2570_v4 = vsub.s32 6, %v4031_v0 }
 0x586   : > { %v3684_v5 = vpop.eup %3683 }
 0x587   : > { %v3686_v7 = vpop.eup %3685  ;;  %v2454_v10 = vrot.slane %v3684_v5, %v2449_v6 }
 0x588   : > { %v3688_v9 = vpop.eup %3687  ;;  %v2450_v12 = vrot.slane %v3686_v7, %v2449_v6 }
 0x589   : > { %v2458_v15 = vrot.slane %v3688_v9, %v2449_v6 }
 0x58a   : > { %v3690_v11 = vpop.eup %3689  ;;  %v2480_v18 = vsel %vm2479_vm5, %v2454_v10, %v2450_v12 }
 0x58b   : > { %v3692_v16 = vpop.eup %3691  ;;  %v2462_v44 = vrot.slane %v3690_v11, %v2449_v6  ;;  %v2482_v20 = vsel %vm2481_vm6, %v2458_v15, %v2480_v18 }
 0x58c   : > { %v2466_v19 = vrot.slane %v3692_v16, %v2449_v6 }
 0x58d   : > { %v2484_v25 = vsel %vm2483_vm7, %v2462_v44, %v2482_v20 }
 0x58e   : > { %v3694_v60 = vpop.eup %3693  ;;  %v2486_v27 = vsel %vm2485_vm8, %v2466_v19, %v2484_v25 }
 0x58f   : > { %v3696_v21 = vpop.eup %3695  ;;  %v2470_v23 = vrot.slane %v3694_v60, %v2449_v6 }
 0x590   : > { %v2474_v26 = vrot.slane %v3696_v21, %v2449_v6 }
 0x591   : > { %v2488_v17 = vsel %vm2487_vm9, %v2470_v23, %v2486_v27 }
 0x592   : > { %v2490_v30 = vsel %vm2489_vm10, %v2474_v26, %v2488_v17 }
 0x5af   : > { %v1532_v14 = vpop.xlane.xlu0 %1531 }
 0x5b0   : > { %3697 = vrcp.f32 %v1532_v14 }
 0x5ba   : > { %v3698_v28 = vpop.eup %3697 }
 0x5bb   : > { %v2478_v29 = vrot.slane %v3698_v28, %v2449_v6  ;;  %v2577_v6 = vsub.s32 7, %v4031_v0 }
 0x5bd   : > { %v2492_v31 = vsel %vm2491_vm11, %v2478_v29, %v2490_v30 }
 0x5be   : > { %2494 = vxpose.xlu1.b32.start.end [1/1] (short) (narrow) %v2492_v31, 8 }
 0x5c2   : > { %2037 = vxpose.xlu1.b32.start.end [1/1] (short) (narrow) %v1709_v52, 8 }
 0x5c6   : > { %2101 = vxpose.xlu1.b32.start.end [1/1] (short) (narrow) %v1801_v51, 8 }
 0x5eb   : > { %v1847_v32 = vpop.f32.mrb[28].mxu1 }
 0x5ec   : > { %2133 = vxpose.xlu1.b32.start.end [1/1] (short) (narrow) %v1847_v32, 8  ;;  %v3504_v33 = vpop.f32.mrb[29].mxu1 }
 0x5ed   : > { %v1850_v34 = vpop.f32.mrb[30].mxu1 }
 0x5ee   : > { %v3505_v35 = vpop.f32.mrb[31].mxu1 }
 0x5ef   : > { %v1893_v36 = vpop.f32.mrb[24].mxu0 }
 0x5f0   : > { %2165 = vxpose.xlu1.b32.start.end [1/1] (short) (narrow) %v1893_v36, 8  ;;  %v3510_v37 = vpop.f32.mrb[25].mxu0 }
 0x5f1   : > { %v1896_v38 = vpop.f32.mrb[26].mxu0 }
 0x5f2   : > { %v3511_v22 = vpop.f32.mrb[27].mxu0 }
 0x5f3   : > { %v1939_v39 = vpop.f32.mrb[32].mxu1 }
 0x5f4   : > { %2197 = vxpose.xlu1.b32.start.end [1/1] (short) (narrow) %v1939_v39, 8  ;;  %v3516_v40 = vpop.f32.mrb[33].mxu1 }
 0x5f5   : > { %v1942_v41 = vpop.f32.mrb[34].mxu1 }
 0x5f6   : > { %v3517_v42 = vpop.f32.mrb[35].mxu1 }
 0x617   : > { %v1985_v43 = vpop.f32.mrb[28].mxu0 }
 0x618   : > { %2229 = vxpose.xlu1.b32.start.end [1/1] (short) (narrow) %v1985_v43, 8  ;;  %v3522_v45 = vpop.f32.mrb[29].mxu0 }
 0x619   : > { %v1988_v46 = vpop.f32.mrb[30].mxu0 }
 0x61a   : > { %v3523_v48 = vpop.f32.mrb[31].mxu0 }
 0x61b   : > { %v2031_v49 = vpop.f32.mrb[36].mxu1 }
 0x61c   : > { %2261 = vxpose.xlu1.b32.start.end [1/1] (short) (narrow) %v2031_v49, 8  ;;  %v3528_v50 = vpop.f32.mrb[37].mxu1 }
 0x61d   : > { %v2034_v52 = vpop.f32.mrb[38].mxu1 }
 0x61e   : > { %v3529_v53 = vpop.f32.mrb[39].mxu1 }
 0x63e   : > { %v2510_v55 = vpop.trf.xlu1 }
 0x63f   : > { %v2529_v51 = vrot.slane %v2510_v55, %v2528_v54  ;;  %v2536_v58 = vrot.slane %v2510_v55, %v2535_v56  ;;  %v2543_v59 = vrot.slane %v2510_v55, %v2542_v57  ;;  %v2550_v62 = vrot.slane %v2510_v55, %v2549_v61 }
 0x640   : > { %v2557_v13 = vrot.slane %v2510_v55, %v2556_v63  ;;  %v2564_v2 = vrot.slane %v2510_v55, %v2563_v1  ;;  %v2571_v5 = vrot.slane %v2510_v55, %v2570_v4  ;;  %v2578_v7 = vrot.slane %v2510_v55, %v2577_v6 }
 0x641   : > { %2531 = vbcast.lane.b32.xlu0 %v2529_v51, 256 }
 0x642   : > { %v2053_v10 = vpop.trf.xlu1 }
 0x645   : > { %2538 = vbcast.lane.b32.xlu0 %v2536_v58, 256 }
 0x646   : > { %v2117_v12 = vpop.trf.xlu1 }
 0x647   : > { %v2293_v30 = vcombine.low %v2053_v10, %v2117_v12  ;;  %v2294_v31 = vcombine.high %v2053_v10, %v2117_v12 }
 0x649   : > { %2545 = vbcast.lane.b32.xlu0 %v2543_v59, 256  ;;  %v2301_v22 = vrot.slane %v2293_v30, %v4034_v3  ;;  %v2308_v39 = vrot.slane %v2294_v31, %v4034_v3 }
 0x64d   : > { %2552 = vbcast.lane.b32.xlu0 %v2550_v62, 256 }
 0x651   : > { %2559 = vbcast.lane.b32.xlu0 %v2557_v13, 256 }
 0x655   : > { %2566 = vbcast.lane.b32.xlu0 %v2564_v2, 256 }
 0x659   : > { %2573 = vbcast.lane.b32.xlu0 %v2571_v5, 256 }
 0x65d   : > { %2580 = vbcast.lane.b32.xlu0 %v2578_v7, 256 }
 0x66c   : > { %v2149_v15 = vpop.trf.xlu1 }
 0x670   : > { %v2181_v44 = vpop.trf.xlu1 }
 0x674   : > { %v2213_v60 = vpop.trf.xlu1 }
 0x67b   : > { %2069 = vxpose.xlu0.b32.start.end [1/1] (short) (narrow) %v4209_v47, 8 }
 0x698   : > { %v2245_v20 = vpop.trf.xlu1 }
 0x699   : > { %v2325_v25 = vcombine.low %v2181_v44, %v2245_v20  ;;  %v2326_v17 = vcombine.high %v2181_v44, %v2245_v20 }
 0x69b   : > { %v2333_v47 = vrot.slane %v2325_v25, %v4034_v3  ;;  %v2340_v32 = vrot.slane %v2326_v17, %v4034_v3 }
 0x69c   : > { %v2277_v23 = vpop.trf.xlu1 }
 0x69d   : > { %v2341_v26 = vcombine.low %v2213_v60, %v2277_v23  ;;  %v2342_v28 = vcombine.high %v2213_v60, %v2277_v23 }
 0x69f   : > { %v2349_v29 = vrot.slane %v2341_v26, %v4034_v3  ;;  %v2356_v33 = vrot.slane %v2342_v28, %v4034_v3 }
 0x6a1   : > { %v2389_v37 = vcombine.low %v2333_v47, %v2349_v29  ;;  %v2390_v38 = vcombine.high %v2333_v47, %v2349_v29  ;;  %v2405_v42 = vcombine.low %v2340_v32, %v2356_v33  ;;  %v2406_v43 = vcombine.high %v2340_v32, %v2356_v33 }
 0x6a3   : > { %v2397_v50 = vrot.slane %v2389_v37, %v4041_v24  ;;  %v2404_v52 = vrot.slane %v2390_v38, %v4041_v24  ;;  %v2413_v57 = vrot.slane %v2405_v42, %v4041_v24  ;;  %v2420_v59 = vrot.slane %v2406_v43, %v4041_v24 }
 0x6b3   : > { %v2532_v9 = vpop.permute.xlu0 %2531 }
 0x6b7   : > { %v2539_v11 = vpop.permute.xlu0 %2538 }
 0x6bb   : > { %v2546_v14 = vpop.permute.xlu0 %2545 }
 0x6bf   : > { %v2553_v16 = vpop.permute.xlu0 %2552 }
 0x6c3   : > { %v2560_v18 = vpop.permute.xlu0 %2559 }
 0x6c7   : > { %v2567_v19 = vpop.permute.xlu0 %2566 }
 0x6cb   : > { %v2574_v21 = vpop.permute.xlu0 %2573 }
 0x6cf   : > { %v2581_v27 = vpop.permute.xlu0 %2580 }
 0x6fb   : > { %v2085_v34 = vpop.trf.xlu0 }
 0x6fc   : > { %v2309_v35 = vcombine.low %v2085_v34, %v2149_v15  ;;  %v2310_v36 = vcombine.high %v2085_v34, %v2149_v15 }
 0x6fe   : > { %v2317_v40 = vrot.slane %v2309_v35, %v4034_v3  ;;  %v2324_v41 = vrot.slane %v2310_v36, %v4034_v3 }
 0x700   : > { %v2357_v45 = vcombine.low %v2301_v22, %v2317_v40  ;;  %v2358_v46 = vcombine.high %v2301_v22, %v2317_v40  ;;  %v2373_v48 = vcombine.low %v2308_v39, %v2324_v41  ;;  %v2374_v49 = vcombine.high %v2308_v39, %v2324_v41  ;;  %v3634_v39 = vld [vmem:[%s4432_s4 + $0x8] sm:$0xff]  }
 0x702   : > { %v2365_v53 = vrot.slane %v2357_v45, %v4041_v24  ;;  %v2372_v55 = vrot.slane %v2358_v46, %v4041_v24  ;;  %v2381_v51 = vrot.slane %v2373_v48, %v4041_v24  ;;  %v2388_v58 = vrot.slane %v2374_v49, %v4041_v24 }
 0x704   : > { %v2421_v61 = vcombine.low %v2365_v53, %v2397_v50  ;;  %v2422_v62 = vcombine.high %v2365_v53, %v2397_v50  ;;  %v2423_v63 = vcombine.low %v2372_v55, %v2404_v52  ;;  %v2424_v13 = vcombine.high %v2372_v55, %v2404_v52  ;;  %v3635_v50 = vld [vmem:[%s4432_s4 + $0x10] sm:$0xff]  }
 0x705   : > { %v2425_v1 = vcombine.low %v2381_v51, %v2413_v57  ;;  %v2426_v2 = vcombine.high %v2381_v51, %v2413_v57  ;;  %v2427_v4 = vcombine.low %v2388_v58, %v2420_v59  ;;  %v2428_v5 = vcombine.high %v2388_v58, %v2420_v59  ;;  %v3636_v58 = vld [vmem:[%s4432_s4 + $0x18] sm:$0xff]  }
 0x706   : > { %v2582_v6 = vmul.f32 %v2532_v9, %v2421_v61  ;;  %v2583_v7 = vmul.f32 %v2539_v11, %v2422_v62  ;;  %v2584_v10 = vmul.f32 %v2546_v14, %v2423_v63  ;;  %v2585_v12 = vmul.f32 %v2553_v16, %v2424_v13  ;;  %v3633_v14 = vld [vmem:[%s4432_s4] sm:$0xff]  }
 0x707   : > { %v2586_v15 = vmul.f32 %v2560_v18, %v2425_v1  ;;  %v2587_v44 = vmul.f32 %v2567_v19, %v2426_v2  ;;  %v2588_v60 = vmul.f32 %v2574_v21, %v2427_v4  ;;  %v2589_v20 = vmul.f32 %v2581_v27, %v2428_v5  ;;  %3531 = vmatpush3.bf16.msra.mxu0 %v3633_v14  ;;  %v3639_v14 = vld [vmem:[%s4436_s8 + $0x4] ss:$8 sps:$4 sm:$0xff]  }
 0x708   : > { %v2590_v23 = vcombine.low %v2582_v6, %v2584_v10  ;;  %v2606_v25 = vcombine.low %v2583_v7, %v2585_v12  ;;  %v2591_v26 = vcombine.high %v2582_v6, %v2584_v10  ;;  %v2607_v17 = vcombine.high %v2583_v7, %v2585_v12  ;;  %3532 = vmatprep.subr.bf16.mxu0 %v3787_v8 }
 0x709   : > { %v2622_v28 = vcombine.low %v2586_v15, %v2588_v60  ;;  %v2638_v47 = vcombine.low %v2587_v44, %v2589_v20  ;;  %v2623_v29 = vcombine.high %v2586_v15, %v2588_v60  ;;  %v2639_v30 = vcombine.high %v2587_v44, %v2589_v20  ;;  %v3302_v60 = vld [vmem:[%s4433_s5] ss:$0 sm:$0xff]  ;;  %2945 = vmatprep.subr.bf16.mxu1 %v3639_v14 }
 0x70a   : > { %v2598_v31 = vrot.slane %v2590_v23, %v4034_v3  ;;  %v2614_v32 = vrot.slane %v2606_v25, %v4034_v3  ;;  %v2605_v9 = vrot.slane %v2591_v26, %v4034_v3  ;;  %v2621_v11 = vrot.slane %v2607_v17, %v4034_v3  ;;  %v3705_v17 = vld [vmem:[%s3932_s27] sm:$0xff] }
 0x70b   : > { %v2630_v16 = vrot.slane %v2622_v28, %v4034_v3  ;;  %v2646_v18 = vrot.slane %v2638_v47, %v4034_v3  ;;  %v2637_v19 = vrot.slane %v2623_v29, %v4034_v3  ;;  %v2653_v21 = vrot.slane %v2639_v30, %v4034_v3  ;;  %3533 = vmatpush3.bf16.msra.mxu0 %v3634_v39 }
 0x70c   : > { %v2655_v27 = vcombine.high %v2598_v31, %v2614_v32  ;;  %v2654_v33 = vcombine.low %v2598_v31, %v2614_v32  ;;  %v2671_v36 = vcombine.high %v2605_v9, %v2621_v11  ;;  %v2670_v41 = vcombine.low %v2605_v9, %v2621_v11  ;;  %3534 = vmatprep.subr.bf16.mxu0 %v3787_v8 }
 0x70d   : > { %v2687_v34 = vcombine.high %v2630_v16, %v2646_v18  ;;  %v2686_v35 = vcombine.low %v2630_v16, %v2646_v18  ;;  %v2703_v37 = vcombine.high %v2637_v19, %v2653_v21  ;;  %v2702_v42 = vcombine.low %v2637_v19, %v2653_v21  ;;  %v3637_v16 = vld [vmem:[%s4436_s8] ss:$8 sps:$4 sm:$0xff]   ;;  %v3642_v18 = vld [vmem:[%s4436_s8 + $0x14] ss:$8 sps:$4 sm:$0xff]   ;;  %v3640_v19 = vld [vmem:[%s4436_s8 + $0x10] ss:$8 sps:$4 sm:$0xff]  }
 0x70e   : > { %v2669_v38 = vrot.slane %v2655_v27, %v4041_v24  ;;  %v2662_v22 = vrot.slane %v2654_v33, %v4041_v24  ;;  %v2685_v46 = vrot.slane %v2671_v36, %v4041_v24  ;;  %v2678_v55 = vrot.slane %v2670_v41, %v4041_v24  ;;  %2946 = vmatpush1.bf16.msra.mxu1 %v3637_v16  ;;  %v3645_v21 = vld [vmem:[%s4436_s8 + $0x24] ss:$8 sps:$4 sm:$0xff]   ;;  %v3643_v27 = vld [vmem:[%s4436_s8 + $0x20] ss:$8 sps:$4 sm:$0xff]   ;;  %v3648_v33 = vld [vmem:[%s4436_s8 + $0x34] ss:$8 sps:$4 sm:$0xff]  }
 0x70f   : > { %v2701_v40 = vrot.slane %v2687_v34, %v4041_v24  ;;  %v2694_v3 = vrot.slane %v2686_v35, %v4041_v24  ;;  %v2717_v48 = vrot.slane %v2703_v37, %v4041_v24  ;;  %3535 = vmatpush3.bf16.msra.mxu0 %v3635_v50  ;;  %v2710_v51 = vrot.slane %v2702_v42, %v4041_v24  ;;  %v3646_v34 = vld [vmem:[%s4436_s8 + $0x30] ss:$8 sps:$4 sm:$0xff]   ;;  %v3649_v35 = vld [vmem:[%s4438_s10 + $0x40] sm:$0xff]   ;;  %v3651_v37 = vld [vmem:[%s4438_s10 + $0x48] sm:$0xff]  }
 0x710   : > { %3536 = vmatprep.subr.bf16.mxu0 %v3787_v8  ;;  %2947 = vmatprep.subr.bf16.mxu1 %v3642_v18  ;;  %v3650_v36 = vld [vmem:[%s4438_s10] sm:$0xff]   ;;  %v3654_v50 = vld [vmem:[%s4438_s10 + $0x10] sm:$0xff]  }
 0x711   : > { %v2720_v43 = vcombine.low %v2669_v38, %v2701_v40  ;;  %v2719_v45 = vcombine.high %v2662_v22, %v2694_v3  ;;  %v2718_v49 = vcombine.low %v2662_v22, %v2694_v3  ;;  %v2725_v52 = vcombine.high %v2685_v46, %v2717_v48  ;;  %v3308_v41 = vld [vmem:[%s4434_s6] ss:$0 sm:$0xff] }
 0x712   : > { %v2721_v53 = vcombine.high %v2669_v38, %v2701_v40  ;;  %v2722_v57 = vcombine.low %v2678_v55, %v2710_v51  ;;  %v2723_v59 = vcombine.high %v2678_v55, %v2710_v51  ;;  %v2724_v61 = vcombine.low %v2685_v46, %v2717_v48  ;;  %2948 = vmatpush1.bf16.msra.mxu1 %v3640_v19  ;;  %v3652_v38 = vld [vmem:[%s4438_s10 + $0x8] sm:$0xff]   ;;  %v3657_v55 = vld [vmem:[%s4438_s10 + $0x60] sm:$0xff]  }
 0x713   : > { %2731 = vrot.lane.b32.xlu0 %v2720_v43, %s3799_s28  ;;  %2727 = vrot.lane.b32.xlu1 %v2719_v45, %s3800_s29  ;;  %v3309_v43 = vld [vmem:[%s4435_s7] ss:$0 sm:$0xff]  ;;  %s3337_s28 = sshll.u32 %s3776_s24, 7  ;;  %s3806_s24 = smov [#allocation5]  }
 0x714   : > { %3537 = vmatpush3.bf16.msra.mxu0 %v3636_v58  ;;  %2949 = vmatprep.subr.bf16.mxu1 %v3645_v21  ;;  %v3658_v51 = vld [vmem:[%s4438_s10 + $0x20] sm:$0xff]   ;;  %v3659_v58 = vld [vmem:[%s4438_s10 + $0x68] sm:$0xff]   ;;  %s4380_s14 = scalar_lea.hbm %s4440_s12, %s3337_s28 }
 0x715   : > { %3388 = vmatprep.subr.bf16.mxu0 %v3649_v35 }
 0x716   : > { %2950 = vmatpush1.bf16.msra.mxu1 %v3643_v27 }
 0x717   : > { %2751 = vrot.lane.b32.xlu0 %v2725_v52, %s3801_s30  ;;  %2735 = vrot.lane.b32.xlu1 %v2721_v53, %s3802_s25  ;;  %v3655_v52 = vld [vmem:[%s4438_s10 + $0x58] sm:$0xff]  }
 0x718   : > { %2951 = vmatprep.subr.bf16.mxu1 %v3648_v33  ;;  %v3656_v53 = vld [vmem:[%s4438_s10 + $0x18] sm:$0xff]  }
 0x71a   : > { %2952 = vmatpush1.bf16.msra.mxu1 %v3646_v34 }
 0x71b   : > { %2739 = vrot.lane.b32.xlu1 %v2722_v57, %s3803_s18  ;;  %v3660_v57 = vld [vmem:[%s4438_s10 + $0x28] sm:$0xff]   ;;  %s3263_s18 = sshll.u32 %s416_s17, 3 }
 0x71c   : > { %s418_s29 = scalar_lea.vmem [#allocation5], %s3263_s18  ;;  %s3710_s18 = sshll.u32 %s3806_s24, 4  ;;  %s3711_s18 = int_to_ptr.vmem [resolvable:$false] %s3710_s18 }
 0x71d   : > { %s3190_s30 = sshll.u32 %s418_s29, 4  ;;  %s3712_s0 = scalar_lea.vmem %s3711_s18, 256  ;;  %s4382_s30 = int_to_ptr.vmem [resolvable:$true] %s3190_s30 }
 0x71e   : > { %p3713_p1 = scmp.lt.s32.totalorder %s4382_s30, %s3711_s18 }
 0x71f   : > { %2743 = vrot.lane.b32.xlu1 %v2723_v59, %s3804_s19  ;;  %v3661_v59 = vld [vmem:[%s4438_s10 + $0x70] sm:$0xff]   ;;  %s3176_s19 = scalar_lea.sflag [#allocation6], %s416_s17 }
 0x723   : > { %2747 = vrot.lane.b32.xlu1 %v2724_v61, %s3805_s20  ;;  %v3662_v61 = vld [vmem:[%s4438_s10 + $0x30] sm:$0xff]   ;;  %s3706_s20 = scalar_lea.vmem %s4382_s30, 128 }
 0x724   : > { %p3707_p12 = scmp.ne.s32.totalorder %s4382_s30, %s3706_s20  ;;  %p3714_p2 = scmp.lt.s32.totalorder %s3712_s0, %s3706_s20 }
 0x726   : > { %p3708_p13 = pnand %p3707_p12, %p3912_p4  ;;  %p3715_p3 = por %p3714_p2, %p3713_p1 }
 0x728   : > { %p3709_p0 = pneg %p3708_p13 }
 0x72a   : > { %p3716_p5 = pnand %p3715_p3, %p3709_p0 }
 0x785   : > { %v2728_v24 = vpop.permute.xlu1 %2727  ;;  %v2732_v63 = vpop.permute.xlu0 %2731 }
 0x786   : > { %v2754_v13 = vsel %vm1091_vm4, %v2718_v49, %v2728_v24  ;;  %v3653_v49 = vld [vmem:[%s4438_s10 + $0x50] sm:$0xff]   ;;  %v3663_v24 = vld [vmem:[%s4438_s10 + $0x78] sm:$0xff]  }
 0x787   : > { %v2756_v2 = vsel %vm2755_vm12, %v2754_v13, %v2732_v63 }
 0x789   : > { %v2736_v8 = vpop.permute.xlu1 %2735  ;;  %v2752_v10 = vpop.permute.xlu0 %2751 }
 0x78a   : > { %v2758_v4 = vsel %vm2757_vm13, %v2756_v2, %v2736_v8  ;;  %v3664_v8 = vld [vmem:[%s4438_s10 + $0x38] sm:$0xff]  }
 0x78d   : > { %v2740_v62 = vpop.permute.xlu1 %2739 }
 0x78e   : > { %v2760_v5 = vsel %vm2759_vm14, %v2758_v4, %v2740_v62  ;;  %v2890_v62 = vld [vmem:[%s4437_s9] sm:$0x3] }
 0x78f   : > { %v2895_v63 = vrot.slane %v2890_v62, %v2528_v54  ;;  %v2899_v13 = vrot.slane %v2890_v62, %v2535_v56 }
 0x791   : > { %v2744_v1 = vpop.permute.xlu1 %2743 }
 0x792   : > { %v2762_v6 = vsel %vm2761_vm15, %v2760_v5, %v2744_v1 }
 0x795   : > { %v2748_v7 = vpop.permute.xlu1 %2747 }
 0x796   : > { %v2764_v12 = vsel %vm2763_vm1, %v2762_v6, %v2748_v7 }
 0x797   : > { %v2766_v15 = vsel %vm2765_vm2, %v2764_v12, %v2752_v10 }
 0x798   : > { %v2767_v44 = vpack.c.bf16 %v2766_v15, %v2766_v15 }
 0x79a   : > { %3539 = vmatmul.mubr.msk.bf16.vlgmr.msra.gmra.mrb[32].mxu0 %vm431_vm0, %v2767_v44 }
 0x79b   : > { %3389 = vmatpush3.bf16.msra.mxu0 %v3650_v36 }
 0x79c   : > { %3390 = vmatprep.subr.bf16.mxu0 %v3651_v37 }
 0x79f   : > { %3391 = vmatpush3.bf16.msra.mxu0 %v3652_v38 }
 0x7a0   : > { %3392 = vmatprep.subr.bf16.mxu0 %v3653_v49 }
 0x7a3   : > { %3393 = vmatpush3.bf16.msra.mxu0 %v3654_v50 }
 0x7a4   : > { %3394 = vmatprep.subr.bf16.mxu0 %v3655_v52 }
 0x7a7   : > { %3395 = vmatpush3.bf16.msra.mxu0 %v3656_v53 }
 0x7a8   : > { %3396 = vmatprep.subr.bf16.mxu0 %v3657_v55 }
 0x7ab   : > { %3397 = vmatpush3.bf16.msra.mxu0 %v3658_v51 }
 0x7ac   : > { %3398 = vmatprep.subr.bf16.mxu0 %v3659_v58 }
 0x7af   : > { %3399 = vmatpush3.bf16.msra.mxu0 %v3660_v57 }
 0x7b0   : > { %3400 = vmatprep.subr.bf16.mxu0 %v3661_v59 }
 0x7b3   : > { %3401 = vmatpush3.bf16.msra.mxu0 %v3662_v61 }
 0x7b4   : > { %3402 = vmatprep.subr.bf16.mxu0 %v3663_v24 }
 0x7b7   : > { %3403 = vmatpush3.bf16.msra.mxu0 %v3664_v8 }
 0x86d   : > { %v2844_v20 = vpop.f32.mrb[32].mxu0 }
 0x86e   : > { %v2845_v23 = vadd.f32 %v3302_v60, %v2844_v20  ;;  %v3540_v25 = vpop.f32.mrb[33].mxu0 }
 0x86f   : > { %v2847_v26 = vpop.f32.mrb[34].mxu0 }
 0x870   : > { %v4279_v28 = vadd.f32 %v3705_v17, %v2845_v23  ;;  %v3541_v47 = vpop.f32.mrb[35].mxu0 }
 0x871   : > { %v3319_v47 = vld [vmem:[%s4439_s11] ss:$0 sm:$0xff] }
 0x872   : > { %v2853_v29 = vsel %vm431_vm0, %v4279_v28, 0.0 }
 0x873   : > { %2854 = vadd.xlane.f32.xlu1 %v2853_v29 }
 0x900   : > { %v2855_v30 = vpop.xlane.xlu1 %2854 }
 0x901   : > { %v2857_v31 = vmul.f32 0.015625, %v2855_v30 }
 0x903   : > { %v2858_v32 = vsub.f32 %v4279_v28, %v2857_v31 }
 0x905   : > { %v2859_v9 = vmul.f32 %v2858_v32, %v2858_v32 }
 0x907   : > { %v2860_v11 = vsel %vm431_vm0, %v2859_v9, 0.0 }
 0x908   : > { %2861 = vadd.xlane.f32.xlu0 %v2860_v11 }
 0x995   : > { %v2862_v22 = vpop.xlane.xlu0 %2861 }
 0x996   : > { %v2863_v39 = vmul.f32 0.015625, %v2862_v22 }
 0x998   : > { %v2864_v40 = vadd.f32 1e-05, %v2863_v39 }
 0x99a   : > { %3699 = vrsqrt.f32 %v2864_v40 }
 0x9a4   : > { %v3700_v3 = vpop.eup %3699 }
 0x9a5   : > { %v2866_v42 = vmul.f32 %v3700_v3, %v2858_v32 }
 0x9a7   : > { %v2873_v45 = vmul.f32 %v3308_v41, %v2866_v42 }
 0x9a9   : > { %v2880_v46 = vadd.f32 %v3309_v43, %v2873_v45 }
 0x9ab   : > { %v2881_v48 = vpack.c.bf16 %v2880_v46, %v2880_v46 }
 0x9ad   : > { %3318 = vmatmul.mubr.msk.bf16.vlgmr.msra.gmra.mrb[40].mxu1 %vm431_vm0, %v2881_v48 }
 0xa80   : > { %v2979_v1 = vpop.f32.mrb[40].mxu1 }
 0xa81   : > { %v2980_v2 = vadd.f32 %v2979_v1, %v2895_v63  ;;  %v2981_v4 = vpop.f32.mrb[41].mxu1 }
 0xa82   : > { %v2982_v5 = vadd.f32 %v2981_v4, %v2899_v13  ;;  %v2983_v6 = vpop.f32.mrb[42].mxu1 }
 0xa83   : > { %v2988_v7 = vmul.f32 0.70710677, %v2980_v2  ;;  %v2984_v10 = vpop.f32.mrb[43].mxu1  ;;  %v2986_v60 = vmul.f32 0.5, %v2980_v2 }
 0xa84   : > { %v2989_v12 = vmul.f32 0.70710677, %v2982_v5  ;;  %v2987_v23 = vmul.f32 0.5, %v2982_v5 }
 0xa85   : > { %3701 = verf.f32 %v2988_v7 }
 0xa86   : > { %3703 = verf.f32 %v2989_v12 }
 0xa8f   : > { %v3702_v15 = vpop.eup %3701 }
 0xa90   : > { %v3704_v44 = vpop.eup %3703  ;;  %v2992_v20 = vadd.f32 1.0, %v3702_v15 }
 0xa91   : > { %v2993_v54 = vadd.f32 1.0, %v3704_v44 }
 0xa92   : > { %v2994_v0 = vmul.f32 %v2992_v20, %v2986_v60 }
 0xa93   : > { %v2995_v56 = vmul.f32 %v2993_v54, %v2987_v23 }
 0xa94   : > { %v2996_v26 = vpack.c.bf16 %v2994_v0, %v2994_v0 }
 0xa95   : > { %v2997_v25 = vpack.c.bf16 %v2995_v56, %v2995_v56 }
 0xa97   : > { %3165 = vmatprep.mubr.bf16.mxu0 %v2997_v25 }
 0xa98   : > { %3166 = vmatmul.mubr.bf16.vlgmr.msra.gmra.mrb[36].mxu0 %v2996_v26 }
 0xb6b   : > { %v3404_v17 = vpop.f32.mrb[36].mxu0 }
 0xb6c   : > { %v3405_v29 = vpop.f32.mrb[37].mxu0 }
 0xb6d   : > { %v3406_v30 = vadd.f32 %v3405_v29, %v3404_v17  ;;  %v3407_v31 = vpop.f32.mrb[38].mxu0 }
 0xb6e   : > { %v3408_v32 = vpop.f32.mrb[39].mxu0 }
 0xb6f   : > { %v3168_v9 = vadd.f32 %v3406_v30, %v3319_v47 }
 0xb71   : > { %v3173_v11 = vadd.f32 %v3168_v9, %v4279_v28 }
 0xb73   : > { %3174 = vst.msk [vmem:[%s418_s29] sm:$0xff] %vm431_vm0, %v3173_v11 }
 0xb74   : > { %3719 = shalt.err (!%p3716_p5)
}
 0xb75   : > { %s3720_s17 = scalar_lea.hbm %s4380_s14, 128  ;;  %s3724_s25 = scalar_lea.hbm %s4440_s12, 256 }
 0xb76   : > { %p3721_p6 = scmp.ne.s32.totalorder %s4380_s14, %s3720_s17  ;;  %p3725_p10 = scmp.lt.u32.totalorder %s4380_s14, %s4440_s12 }
 0xb77   : > { %p3726_p11 = scmp.lt.u32.totalorder %s3724_s25, %s3720_s17  ;;  %p3728_p13 = scmp.lt.u32.totalorder %s3720_s17, %s4380_s14 }
 0xb78   : > { %p3722_p7 = pnand %p3721_p6, %p3912_p4 }
 0xb79   : > { %p3727_p12 = por %p3726_p11, %p3725_p10 }
 0xb7a   : > { %p3723_p9 = pneg %p3722_p7 }
 0xb7b   : > { %p3729_p0 = por %p3728_p13, %p3727_p12 }
 0xb7d   : > { %p3730_p1 = pnand %p3729_p0, %p3723_p9 }
 0xb7f   : > { %3733 = shalt.err (!%p3730_p1)
}
 0xb80   : > { %3542 = dma.vmem_to_hbm [thread:$0]  (%p3912_p4), %s4382_s30, 128, %s4380_s14, %s3176_s19  }
 0xb81 PF: > { %p3548_p2 = scmp.ge.s32.totalorder %s3784_s26, 2  ;;  %s3202_s0 = sand.u32 1, %s3764_s21  }
 0xb82   : > { %s3203_s20 = scalar_lea.sflag [#allocation6], %s3202_s0 }
 0xb83   : > { %p3545_p3 = pnand %p3548_p2, %p3919_p8 }
 0xb85   : > { %3759 = dma.done.wait (!%p3545_p3), %s3203_s20, 128  }
 0xb86   : > { %3761 = vsyncadd (!%p3545_p3), %s3203_s20, 4294967168  ;;  %s25_s26 = sadd.s32 1, %s3784_s26   ;;  %s4449_s24 = sld [smem:[#allocation8_spill]] }
 0xb87   : > { %p22_p5 = scmp.ge.s32.totalorder %s25_s26, 4   ;;  %s4450_s25 = sld [smem:[#allocation9_spill]] }
 0xb88   : > { %s4451_s21 = smov %s3768_s22  ;;  %s4452_s22 = smov %s3772_s23 }
 0xb89   : > { %s4453_s23 = smov %s3925_s16  ;;  %24 = sbr.rel (!%p22_p5) target bundleno = 6 (0x6), region = 107 }
 0xb90   :  { %3208 = vsyncpa [#allocation6], 1 }
 0xb91   :  { %3210 = vsyncpa [#allocation6 + $0x1], 1 }

</bundles_post_ra>
